<compile_context>
chip_gen: v5e
topology: v5e:2x2
jax: 0.10.0
libtpu: 0.0.40
codegen_flags: <defaults>
</compile_context>

<pallas_src>
import functools

import jax
import jax.numpy as jnp
from jax import lax
from jax.experimental import pallas as pl
from jax.experimental.pallas import tpu as pltpu


def _round_up(x, m):
    return ((x + m - 1) // m) * m


def _mls_kernel(mu_r_ref, mu_c_ref, s2_r_ref, s2_c_ref, nrm_r_ref, nrm_c_ref,
                o_ref, *, cos_func, rows_per_step, n_dchunks):
    tm, tn = o_ref.shape
    rc = rows_per_step
    DC = 128  # D padded to a multiple of 128 in the wrapper

    # Column-side norms (cos branch only); loaded once per output tile.
    nc = nrm_c_ref[...] if cos_func else None            # (1, tn)

    @pl.loop(0, tm // rc)
    def _(c):
        row0 = pl.multiple_of(c * rc, rc)

        def d_body(d, carry):
            d0 = pl.multiple_of(d * DC, DC)
            xr = mu_r_ref[pl.ds(row0, rc), pl.ds(d0, DC)]     # (rc, DC)
            s2r = s2_r_ref[pl.ds(row0, rc), pl.ds(d0, DC)]    # (rc, DC)
            xc = mu_c_ref[:, pl.ds(d0, DC)]                   # (tn, DC)
            s2c = s2_c_ref[:, pl.ds(d0, DC)]                  # (tn, DC)

            sig = s2r[:, None, :] + s2c[None, :, :]           # (rc, tn, DC)
            z = sig + 1e-10
            # EUP approx reciprocal + one Newton-Raphson step: ~1e-6 rel err,
            # still cheaper than the exact (multi-step) refinement.
            rec = pl.reciprocal(z, approx=True)
            rec = rec * (2.0 - z * rec)
            logsig = jnp.log(sig)                             # EUP

            if cos_func:
                # The per-pair 1/(||mu_i||*||mu_j||+1e-5) scale only applies
                # to the fn term, so the two sums must stay separate here.
                acc_fn, acc_log = carry
                fn = -(xr[:, None, :] * xc[None, :, :])
                acc_fn = acc_fn + jnp.sum(fn * rec, axis=2)
                acc_log = acc_log + jnp.sum(logsig, axis=2)
                return (acc_fn, acc_log)
            else:
                # Fused single reduction: one cross-lane reduce pass.
                (acc,) = carry
                dlt = xr[:, None, :] - xc[None, :, :]
                acc = acc + jnp.sum(dlt * dlt * rec + logsig, axis=2)
                return (acc,)

        if cos_func:
            init = (jnp.zeros((rc, tn), jnp.float32),
                    jnp.zeros((rc, tn), jnp.float32))
        else:
            init = (jnp.zeros((rc, tn), jnp.float32),)

        carry = lax.fori_loop(0, n_dchunks, d_body, init,
                              unroll=True if n_dchunks <= 4 else False)

        if cos_func:
            acc_fn, acc_log = carry
            nr = nrm_r_ref[pl.ds(row0, rc), :]                       # (rc, 1)
            # Off the N^2*D path -> keep exact.
            scale = pl.reciprocal(nr * nc + 1e-5, approx=False)      # (rc, tn)
            total = acc_fn * scale + acc_log
        else:
            (total,) = carry

        o_ref[pl.ds(row0, rc), :] = (-total).astype(o_ref.dtype)


def mls_pallas(mu_X, log_sigma, cos_func=False, tm=128, tn=128):
    N, D = mu_X.shape
    mu_X = mu_X.astype(jnp.float32)
    log_sigma = log_sigma.astype(jnp.float32)

    # Hoisted out of the O(N^2 * D) kernel: normalize, exp, and (cos) norms.
    nrm = jnp.sqrt(jnp.sum(mu_X * mu_X, axis=1, keepdims=True))
    mu = mu_X / jnp.maximum(nrm, 1e-12)                 # F.normalize
    s2 = jnp.exp(log_sigma)
    mun = jnp.sqrt(jnp.sum(mu * mu, axis=1, keepdims=True))  # ||normalized mu||

    # Pad D to a multiple of 128: mu -> 0 and s2 -> 0.5 so each padded dim
    # contributes exactly 0 (sig = 1.0 -> log = 0, fn = 0).
    Dp = _round_up(D, 128)
    if Dp != D:
        mu = jnp.pad(mu, ((0, 0), (0, Dp - D)))
        s2 = jnp.pad(s2, ((0, 0), (0, Dp - D)), constant_values=0.5)
    n_dchunks = Dp // 128

    # Tile constraints: tm % 8 == 0 (sublanes), tn % 128 == 0 (lane-dense out).
    tm = min(_round_up(max(int(tm), 8), 8), _round_up(N, 8))
    tn = min(_round_up(max(int(tn), 128), 128), _round_up(N, 128))
    # v7x megacore: aim for >= 2 tiles along a "parallel" axis for medium N so
    # both TensorCores get work (no effect on v5e/v6e single-TC).
    if (_round_up(N, tm) // tm) < 2 and (_round_up(N, tn) // tn) < 2 and N > 8:
        tm = max(8, _round_up((N + 1) // 2, 8))

    # Largest row chunk in {32, 16, 8} that divides tm (tm is a multiple of 8,
    # so the fallback always divides — no rows can be silently dropped).
    if tm % 32 == 0:
        rows_per_step = 32
    elif tm % 16 == 0:
        rows_per_step = 16
    else:
        rows_per_step = 8

    Nr = _round_up(N, tm)   # padded row count
    Nc = _round_up(N, tn)   # padded col count

    # Row/col padding keeps the (discarded) padded region finite:
    # mu rows -> 0, sigma^2 rows -> 1 (log finite), norms -> 0.
    mu_r = jnp.pad(mu, ((0, Nr - N), (0, 0)))
    mu_c = jnp.pad(mu, ((0, Nc - N), (0, 0)))
    s2_r = jnp.pad(s2, ((0, Nr - N), (0, 0)), constant_values=1.0)
    s2_c = jnp.pad(s2, ((0, Nc - N), (0, 0)), constant_values=1.0)
    nrm_r = jnp.pad(mun, ((0, Nr - N), (0, 0)))
    nrm_c = jnp.pad(mun, ((0, Nc - N), (0, 0))).reshape(1, Nc)

    kernel = functools.partial(
        _mls_kernel, cos_func=cos_func,
        rows_per_step=rows_per_step, n_dchunks=n_dchunks)

    # VMEM budget: double-buffered BlockSpec tiles + in-kernel (rc, tn, 128)
    # temporaries.  Explicit limit matters mainly on v7x (32 MiB scoped
    # default, 64 MiB physical) with large D.
    buf_bytes = 4 * (2 * tm * Dp + 2 * tn * Dp + tm + tn + tm * tn)
    temp_bytes = 4 * 4 * rows_per_step * tn * 128
    vmem_limit = int(min(96 << 20,
                         max(32 << 20, 2 * buf_bytes + temp_bytes + (4 << 20))))

    out = pl.pallas_call(
        kernel,
        out_shape=jax.ShapeDtypeStruct((Nr, Nc), jnp.float32),
        grid_spec=pltpu.PrefetchScalarGridSpec(
            num_scalar_prefetch=0,
            grid=(Nr // tm, Nc // tn),
            in_specs=[
                pl.BlockSpec((tm, Dp), lambda i, j: (i, 0)),   # mu rows
                pl.BlockSpec((tn, Dp), lambda i, j: (j, 0)),   # mu cols
                pl.BlockSpec((tm, Dp), lambda i, j: (i, 0)),   # sigma^2 rows
                pl.BlockSpec((tn, Dp), lambda i, j: (j, 0)),   # sigma^2 cols
                pl.BlockSpec((tm, 1), lambda i, j: (i, 0)),    # ||mu|| rows
                pl.BlockSpec((1, tn), lambda i, j: (0, j)),    # ||mu|| cols
            ],
            out_specs=pl.BlockSpec((tm, tn), lambda i, j: (i, j)),
        ),
        compiler_params=pltpu.CompilerParams(
            dimension_semantics=("parallel", "parallel"),
            vmem_limit_bytes=vmem_limit),
    )(mu_r, mu_c, s2_r, s2_c, nrm_r, nrm_c)

    return out[:N, :N]


def mls_reference(mu_X, log_sigma, cos_func=False):
    # Pure-JAX reference mirroring the PyTorch forward.
    nrm = jnp.sqrt(jnp.sum(mu_X * mu_X, axis=1, keepdims=True))
    mu = mu_X / jnp.maximum(nrm, 1e-12)
    s2 = jnp.exp(log_sigma)
    sig_sum = s2[:, None, :] + s2[None, :, :]
    if cos_func:
        num = -jnp.einsum("ij,dj->idj", mu, mu)
        n = jnp.linalg.norm(mu, axis=-1)
        fn = num / (n[:, None] * n[None, :] + 1e-5)[..., None]
    else:
        fn = (mu[:, None, :] - mu[None, :, :]) ** 2
    diff = fn / (1e-10 + sig_sum) + jnp.log(sig_sum)
    return -jnp.sum(diff, axis=2)


if __name__ == "__main__":
    key = jax.random.PRNGKey(0)
    k1, k2 = jax.random.split(key)
    N, D = 8, 32  # small batch of embeddings
    mu_X = jax.random.normal(k1, (N, D), dtype=jnp.float32)
    log_sigma = 0.1 * jax.random.normal(k2, (N, D), dtype=jnp.float32)

    out = mls_pallas(mu_X, log_sigma, cos_func=False)
    jax.block_until_ready(out)
    ref = mls_reference(mu_X, log_sigma, cos_func=False)
    assert out.shape == (N, N)
    assert jnp.allclose(out, ref, rtol=1e-4, atol=1e-4)

    # cos_func=True branch.
    out_cos = mls_pallas(mu_X, log_sigma, cos_func=True)
    jax.block_until_ready(out_cos)
    ref_cos = mls_reference(mu_X, log_sigma, cos_func=True)
    assert jnp.allclose(out_cos, ref_cos, rtol=1e-4, atol=1e-4)

    # Non-divisible N exercises padding / the multi-tile + megacore-split path.
    k3, k4 = jax.random.split(k2)
    N2, D2 = 20, 32
    mu2 = jax.random.normal(k3, (N2, D2), dtype=jnp.float32)
    ls2 = 0.1 * jax.random.normal(k4, (N2, D2), dtype=jnp.float32)
    out2 = mls_pallas(mu2, ls2, cos_func=False)
    jax.block_until_ready(out2)
    ref2 = mls_reference(mu2, ls2, cos_func=False)
    assert out2.shape == (N2, N2)
    assert jnp.allclose(out2, ref2, rtol=1e-4, atol=1e-4)

    # Multi-D-chunk (D padded 200 -> 256, 2 chunks) + multi-row-chunk path,
    # both branches.
    k5, k6 = jax.random.split(k4)
    N3, D3 = 40, 200
    mu3 = jax.random.normal(k5, (N3, D3), dtype=jnp.float32)
    ls3 = 0.1 * jax.random.normal(k6, (N3, D3), dtype=jnp.float32)
    out3 = mls_pallas(mu3, ls3, cos_func=False)
    jax.block_until_ready(out3)
    ref3 = mls_reference(mu3, ls3, cos_func=False)
    assert out3.shape == (N3, N3)
    assert jnp.allclose(out3, ref3, rtol=1e-4, atol=1e-4)
    out3c = mls_pallas(mu3, ls3, cos_func=True)
    jax.block_until_ready(out3c)
    ref3c = mls_reference(mu3, ls3, cos_func=True)
    assert jnp.allclose(out3c, ref3c, rtol=1e-4, atol=1e-4)

    print("KERNEL_OK")
</pallas_src>

<mosaic_0001>
module attributes {stable_mosaic.version = 11 : i64} {
  func.func @_mls_kernel(%arg0: i32, %arg1: i32, %arg2: memref<8x128xf32, #tpu.memory_space<vmem>>, %arg3: memref<128x128xf32, #tpu.memory_space<vmem>>, %arg4: memref<8x128xf32, #tpu.memory_space<vmem>>, %arg5: memref<128x128xf32, #tpu.memory_space<vmem>>, %arg6: memref<8x1xf32, #tpu.memory_space<vmem>>, %arg7: memref<1x128xf32, #tpu.memory_space<vmem>>, %arg8: memref<8x128xf32, #tpu.memory_space<vmem>>) attributes {dimension_semantics = [#tpu.dimension_semantics<parallel>, #tpu.dimension_semantics<parallel>], iteration_bounds = array<i64: 1, 1>, scalar_prefetch = 0 : i64, scratch_operands = 0 : i64, tpu.core_type = #tpu.core_type<tc>, window_params = [{transform_indices = @transform_0, window_bounds = array<i64: 8, 128>}, {transform_indices = @transform_1, window_bounds = array<i64: 128, 128>}, {transform_indices = @transform_2, window_bounds = array<i64: 8, 128>}, {transform_indices = @transform_3, window_bounds = array<i64: 128, 128>}, {transform_indices = @transform_4, window_bounds = array<i64: 8, 1>}, {transform_indices = @transform_5, window_bounds = array<i64: 1, 128>}, {transform_indices = @transform_6, window_bounds = array<i64: 8, 128>}]} {
    %c0_i32 = arith.constant 0 : i32
    %c1_i32 = arith.constant 1 : i32
    %0 = arith.muli %c0_i32, %c1_i32 : i32
    %c0_i32_0 = arith.constant 0 : i32
    %1 = arith.addi %c0_i32_0, %0 : i32
    %c8_i32 = arith.constant 8 : i32
    %2 = arith.muli %1, %c8_i32 : i32
    %3 = tpu.assume_multiple %2, 8 : i32
    %cst = arith.constant 0.000000e+00 : f32
    %4 = vector.broadcast %cst : f32 to vector<8x128xf32>
    %c0_i32_1 = arith.constant 0 : i32
    %c128_i32 = arith.constant 128 : i32
    %5 = arith.muli %c0_i32_1, %c128_i32 : i32
    %6 = tpu.assume_multiple %5, 128 : i32
    %7 = arith.index_cast %3 : i32 to index
    %8 = arith.index_cast %6 : i32 to index
    %9 = vector.load %arg2[%7, %8] : memref<8x128xf32, #tpu.memory_space<vmem>>, vector<8x128xf32>
    %10 = arith.index_cast %3 : i32 to index
    %11 = arith.index_cast %6 : i32 to index
    %12 = vector.load %arg4[%10, %11] : memref<8x128xf32, #tpu.memory_space<vmem>>, vector<8x128xf32>
    %c0 = arith.constant 0 : index
    %13 = arith.index_cast %6 : i32 to index
    %14 = vector.load %arg3[%c0, %13] : memref<128x128xf32, #tpu.memory_space<vmem>>, vector<128x128xf32>
    %c0_2 = arith.constant 0 : index
    %15 = arith.index_cast %6 : i32 to index
    %16 = vector.load %arg5[%c0_2, %15] : memref<128x128xf32, #tpu.memory_space<vmem>>, vector<128x128xf32>
    %17 = vector.shape_cast %12 : vector<8x128xf32> to vector<8x1x128xf32>
    %18 = vector.shape_cast %16 : vector<128x128xf32> to vector<1x128x128xf32>
    %19 = vector.broadcast %17 : vector<8x1x128xf32> to vector<8x128x128xf32>
    %20 = vector.broadcast %18 : vector<1x128x128xf32> to vector<8x128x128xf32>
    %21 = arith.addf %19, %20 : vector<8x128x128xf32>
    %cst_3 = arith.constant 1.000000e-10 : f32
    %22 = vector.broadcast %cst_3 : f32 to vector<8x128x128xf32>
    %23 = arith.addf %21, %22 : vector<8x128x128xf32>
    %24 = tpu.reciprocal %23 {approx = true} : vector<8x128x128xf32> -> vector<8x128x128xf32>
    %25 = arith.mulf %23, %24 : vector<8x128x128xf32>
    %cst_4 = arith.constant 2.000000e+00 : f32
    %26 = vector.broadcast %cst_4 : f32 to vector<8x128x128xf32>
    %27 = arith.subf %26, %25 : vector<8x128x128xf32>
    %28 = arith.mulf %24, %27 : vector<8x128x128xf32>
    %29 = math.log %21 : vector<8x128x128xf32>
    %30 = vector.shape_cast %9 : vector<8x128xf32> to vector<8x1x128xf32>
    %31 = vector.shape_cast %14 : vector<128x128xf32> to vector<1x128x128xf32>
    %32 = vector.broadcast %30 : vector<8x1x128xf32> to vector<8x128x128xf32>
    %33 = vector.broadcast %31 : vector<1x128x128xf32> to vector<8x128x128xf32>
    %34 = arith.subf %32, %33 : vector<8x128x128xf32>
    %35 = arith.mulf %34, %34 : vector<8x128x128xf32>
    %36 = arith.mulf %35, %28 : vector<8x128x128xf32>
    %37 = arith.addf %36, %29 : vector<8x128x128xf32>
    %cst_5 = arith.constant dense<0.000000e+00> : vector<8x128xf32>
    %38 = vector.multi_reduction <add>, %37, %cst_5 [2] : vector<8x128x128xf32> to vector<8x128xf32>
    %39 = arith.addf %4, %38 : vector<8x128xf32>
    %c1_i32_6 = arith.constant 1 : i32
    %cst_7 = arith.constant 0.000000e+00 : f32
    %40 = vector.broadcast %cst_7 : f32 to vector<8x128xf32>
    %41 = arith.subf %40, %39 : vector<8x128xf32>
    %42 = arith.index_cast %3 : i32 to index
    %c0_8 = arith.constant 0 : index
    %43 = vector.load %arg8[%42, %c0_8] : memref<8x128xf32, #tpu.memory_space<vmem>>, vector<8x128xf32>
    tpu.vector_store %arg8[%42, %c0_8], %41 {strides = array<i32>} : memref<8x128xf32, #tpu.memory_space<vmem>>, vector<8x128xf32>,
    %c1_i32_9 = arith.constant 1 : i32
    return
  }
  func.func @transform_0(%arg0: i32, %arg1: i32) -> (i32, i32) {
    %c0_i32 = arith.constant 0 : i32
    %c0_i32_0 = arith.constant 0 : i32
    return %arg0, %c0_i32 : i32, i32
  }
  func.func @transform_1(%arg0: i32, %arg1: i32) -> (i32, i32) {
    %c0_i32 = arith.constant 0 : i32
    %c0_i32_0 = arith.constant 0 : i32
    return %arg1, %c0_i32 : i32, i32
  }
  func.func @transform_2(%arg0: i32, %arg1: i32) -> (i32, i32) {
    %c0_i32 = arith.constant 0 : i32
    %c0_i32_0 = arith.constant 0 : i32
    return %arg0, %c0_i32 : i32, i32
  }
  func.func @transform_3(%arg0: i32, %arg1: i32) -> (i32, i32) {
    %c0_i32 = arith.constant 0 : i32
    %c0_i32_0 = arith.constant 0 : i32
    return %arg1, %c0_i32 : i32, i32
  }
  func.func @transform_4(%arg0: i32, %arg1: i32) -> (i32, i32) {
    %c0_i32 = arith.constant 0 : i32
    %c0_i32_0 = arith.constant 0 : i32
    return %arg0, %c0_i32 : i32, i32
  }
  func.func @transform_5(%arg0: i32, %arg1: i32) -> (i32, i32) {
    %c0_i32 = arith.constant 0 : i32
    %c0_i32_0 = arith.constant 0 : i32
    return %c0_i32, %arg1 : i32, i32
  }
  func.func @transform_6(%arg0: i32, %arg1: i32) -> (i32, i32) {
    %c0_i32 = arith.constant 0 : i32
    return %arg0, %arg1 : i32, i32
  }
}

</mosaic_0001>

<bundles_post_ra>
// kernel: tpu_custom_call.1
= control target key start
LH: loop header
LB: loop body
LE: loop exit
PB: predicated region body
PF: predicated region fallthrough
CT: control target
= control target key end

     0   :  { %11 = vsyncpa [#allocation3], 0  ;;  %s4921_s0 = inlined_call_operand.vmem [shape: f32[8,128], index: 0, kind: input, shape index: {}]   ;;  %s4922_s1 = inlined_call_operand.hbm [shape: f32[128,128], index: 1, kind: input, shape index: {}]   ;;  %s4923_s2 = inlined_call_operand.hbm [shape: f32[8,128], index: 2, kind: input, shape index: {}]   ;;  %s4924_s3 = inlined_call_operand.hbm [shape: f32[128,128], index: 3, kind: input, shape index: {}]   ;;  %s4925_s4 = inlined_call_operand.vmem [shape: f32[8,1], index: 4, kind: input, shape index: {}]   ;;  %s4926_s5 = inlined_call_operand.vmem [shape: f32[1,128], index: 5, kind: input, shape index: {}]   ;;  %s4927_s6 = inlined_call_operand.hbm [shape: f32[8,128], index: 6, kind: output, shape index: {}]  }
   0x1   :  { %12 = vsyncpa [#allocation6], 0  ;;  %s34_s23 = sshll.u32 %s4923_s2, 4  ;;  %s35_s23 = int_to_ptr.hbm [resolvable:$true] %s34_s23 }
   0x2   :  { %13 = vsyncpa [#allocation4], 0  ;;  %s3366_s24 = smov [#allocation5]   ;;  %s20_s4 = sshll.u32 %s4922_s1, 4  ;;  %s21_s4 = int_to_ptr.hbm [resolvable:$true] %s20_s4 }
   0x3   :  { %s36_s25 = sshll.u32 %s3366_s24, 4  ;;  %s3367_s5 = smov [#allocation2]   ;;  %s37_s25 = int_to_ptr.vmem [resolvable:$true] %s36_s25 }
   0x4   :  { %39 = dma.hbm_to_vmem [thread:$0]  %s35_s23, 128, %s37_s25, [#allocation6]  }
   0x5   :  { %s22_s28 = sshll.u32 %s3367_s5, 4  ;;  %s3368_s29 = smov 128   ;;  %s23_s28 = int_to_ptr.vmem [resolvable:$true] %s22_s28 }
   0x6   :  { %s3369_s30 = smov 8   ;;  %s44_s2 = sshll.u32 %s4924_s3, 4  ;;  %s45_s2 = int_to_ptr.hbm [resolvable:$true] %s44_s2 }
   0x7   :  { %28 = dma.hbm_to_vmem [thread:$0]  %s21_s4, 2048, %s23_s28, [#allocation3], %s3368_s29, %s3368_s29, %s3369_s30  }
   0x8   :  { %s3370_s9 = smov [#allocation7]  }
   0x9   :  { %s46_s10 = sshll.u32 %s3370_s9, 4  ;;  %s47_s10 = int_to_ptr.vmem [resolvable:$true] %s46_s10 }
   0xa   :  { %52 = dma.hbm_to_vmem [thread:$0]  %s45_s2, 2048, %s47_s10, [#allocation6], %s3368_s29, %s3368_s29, %s3369_s30  }
   0xb   :  { %3360 = dma.done.wait [#allocation3], 2048  }
   0xc   :  { %3361 = vsyncadd [#allocation3], 4294965248 }
   0xd   :  { %3362 = dma.done.wait [#allocation6], 2176  }
   0xe   :  { %3363 = vsyncadd [#allocation6], 4294965120  ;;  %v3419_v0 = vld [vmem:[%s4921_s0] sm:$0xff]  ;;  %v3425_v3 = vld [vmem:[#allocation7 + $0x20] sm:$0xff]  ;;  %vm2335_vm0 = vcmask 130112   ;;  %vm2339_vm1 = vcmask 195712  }
   0xf   :  { %v3421_v1 = vld [vmem:[#allocation5] sm:$0xff]  ;;  %v3431_v5 = vperm.slane %v3419_v0, 0  ;;  %v3433_v6 = vld [vmem:[#allocation7 + $0x10] sm:$0xff]  ;;  %v3435_v7 = vld [vmem:[#allocation2 + $0x10] sm:$0xff]  ;;  %vm2343_vm2 = vcmask 261312   ;;  %vm2347_vm3 = vcmask 326912  }
  0x10   :  { %v3423_v2 = vld [vmem:[#allocation2 + $0x20] sm:$0xff]  ;;  %v3428_v4 = vperm.slane %v3421_v1, 0  ;;  %v3437_v8 = vld [vmem:[#allocation7] sm:$0xff]  ;;  %v3449_v14 = vld [vmem:[#allocation7 + $0x28] sm:$0xff]  ;;  %vm2351_vm4 = vcmask 392512   ;;  %vm2355_vm5 = vcmask 458112  }
  0x11   :  { %v1182_v10 = vsub.f32 %v3431_v5, %v3423_v2  ;;  %v3445_v12 = vld [vmem:[#allocation2] sm:$0xff]  ;;  %v3447_v13 = vld [vmem:[#allocation2 + $0x28] sm:$0xff]  ;;  %v3455_v17 = vld [vmem:[#allocation2 + $0x18] sm:$0xff]  ;;  %v1180_v21 = vsub.f32 %v3431_v5, %v3435_v7  ;;  %vm2359_vm6 = vcmask 523712   ;;  %vm2363_vm7 = vcmask 589312   ;;  %s2633_s20 = sshll.u32 %s4927_s6, 4  ;;  %s2634_s20 = int_to_ptr.hbm [resolvable:$true] %s2633_s20 }
  0x12   :  { %v134_v9 = vadd.f32 %v3428_v4, %v3425_v3  ;;  %v132_v11 = vadd.f32 %v3428_v4, %v3433_v6  ;;  %v130_v15 = vadd.f32 %v3428_v4, %v3437_v8  ;;  %v135_v16 = vadd.f32 %v3428_v4, %v3449_v14  ;;  %v3457_v18 = vld [vmem:[#allocation7 + $0x18] sm:$0xff]  ;;  %v3461_v22 = vld [vmem:[#allocation2 + $0x8] sm:$0xff]  ;;  %v3463_v23 = vld [vmem:[#allocation7 + $0x8] sm:$0xff] }
  0x13   :  { %v1178_v25 = vsub.f32 %v3431_v5, %v3445_v12  ;;  %v1183_v26 = vsub.f32 %v3431_v5, %v3447_v13  ;;  %v3469_v27 = vld [vmem:[#allocation2 + $0x40] sm:$0xff]  ;;  %v3471_v28 = vld [vmem:[#allocation7 + $0x40] sm:$0xff]  ;;  %v3473_v29 = vmul.f32 %v1182_v10, %v1182_v10  ;;  %v133_v31 = vadd.f32 %v3428_v4, %v3457_v18  ;;  %v3489_v39 = vld [vmem:[#allocation2 + $0x38] sm:$0xff] }
  0x14   :  { %v262_v19 = vadd.f32 1e-10, %v134_v9  ;;  %2650 = vlog2.f32 %v134_v9  ;;  %v260_v20 = vadd.f32 1e-10, %v132_v11  ;;  %v258_v24 = vadd.f32 1e-10, %v130_v15 }
  0x15   :  { %2652 = vlog2.f32 %v132_v11  ;;  %4970 = vst [vmem:[#allocation12_spill] sm:$0xff] %v3469_v27  ;;  %v263_v30 = vadd.f32 1e-10, %v135_v16  ;;  %v1181_v32 = vsub.f32 %v3431_v5, %v3455_v17  ;;  %v131_v33 = vadd.f32 %v3428_v4, %v3463_v23  ;;  %v3483_v35 = vld [vmem:[#allocation7 + $0x38] sm:$0xff]  ;;  %v3491_v40 = vld [vmem:[#allocation7 + $0x30] sm:$0xff]  ;;  %v3497_v44 = vld [vmem:[#allocation2 + $0x30] sm:$0xff] }
  0x16   :  { %4971 = vst [vmem:[#allocation13_spill] sm:$0xff] %v3471_v28  ;;  %2654 = vrcp.f32 %v262_v19  ;;  %v1179_v34 = vsub.f32 %v3431_v5, %v3461_v22  ;;  %v261_v36 = vadd.f32 1e-10, %v133_v31  ;;  %v138_v37 = vadd.f32 %v3428_v4, %v3471_v28  ;;  %v3517_v61 = vld [vmem:[#allocation7 + $0x58] sm:$0xff] }
  0x17   :  { %2656 = vrcp.f32 %v260_v20  ;;  %v1186_v38 = vsub.f32 %v3431_v5, %v3469_v27  ;;  %v1308_v41 = vmul.f32 %v1180_v21, %v1180_v21  ;;  %v3493_v42 = vmul.f32 %v1178_v25, %v1178_v25  ;;  %4972 = vst [vmem:[#allocation14_spill] sm:$0xff] %v3497_v44 }
  0x18   :  { %2658 = vrcp.f32 %v258_v24  ;;  %v3495_v43 = vmul.f32 %v1183_v26, %v1183_v26  ;;  %v3499_v46 = vmul.f32 %v1181_v32, %v1181_v32  ;;  %v3501_v47 = vadd.f32 1e-10, %v131_v33  ;;  %4973 = vst [vmem:[#allocation15_spill] sm:$0xff] %v3517_v61 }
  0x19   :  { %2660 = vlog2.f32 %v130_v15  ;;  %v137_v48 = vadd.f32 %v3428_v4, %v3483_v35  ;;  %v3505_v50 = vmul.f32 %v1179_v34, %v1179_v34  ;;  %v1185_v51 = vsub.f32 %v3431_v5, %v3489_v39 }
  0x1a   :  { %v2651_v45 = vpop.eup %2650  ;;  %2662 = vrcp.f32 %v263_v30  ;;  %v3511_v52 = vadd.f32 %v3428_v4, %v3491_v40  ;;  %v266_v54 = vadd.f32 1e-10, %v138_v37  ;;  %v3513_v55 = vmul.f32 %v1186_v38, %v1186_v38 }
  0x1b   :  { %v2653_v49 = vpop.eup %2652  ;;  %2664 = vlog2.f32 %v135_v16  ;;  %v1184_v56 = vsub.f32 %v3431_v5, %v3497_v44  ;;  %v907_v59 = vmul.f32 0.6931472, %v2651_v45  ;;  %v265_v9 = vadd.f32 1e-10, %v137_v48 }
  0x1c   :  { %v2655_v53 = vpop.eup %2654  ;;  %2666 = vrcp.f32 %v261_v36  ;;  %v903_v60 = vmul.f32 0.6931472, %v2653_v49  ;;  %v3520_v10 = vmul.f32 %v1185_v51, %v1185_v51  ;;  %v3523_v21 = vadd.f32 1e-10, %v3511_v52 }
  0x1d   :  { %v2657_v57 = vpop.eup %2656  ;;  %v518_v58 = vmul.f32 %v2655_v53, %v262_v19  ;;  %2668 = vlog2.f32 %v133_v31  ;;  %v3525_v19 = vld [vmem:[#allocation2 + $0x58] sm:$0xff]  ;;  %v3527_v31 = vmul.f32 %v1184_v56, %v1184_v56  ;;  %vm2367_vm8 = vcmask 654912  }
  0x1e   :  { %v2659_v62 = vpop.eup %2658  ;;  %v516_v63 = vmul.f32 %v2657_v57, %v260_v20  ;;  %2670 = vrcp.f32 %v3501_v47  ;;  %4974 = vst [vmem:[#allocation16_spill] sm:$0xff] %v3525_v19  ;;  %v3531_v20 = vadd.f32 %v3428_v4, %v3517_v61  ;;  %vm2371_vm9 = vcmask 720512  }
  0x1f   :  { %v2661_v11 = vpop.eup %2660  ;;  %v646_v15 = vsub.f32 2.0, %v518_v58  ;;  %v514_v16 = vmul.f32 %v2659_v62, %v258_v24  ;;  %2672 = vlog2.f32 %v131_v33  ;;  %v3533_v24 = vld [vmem:[#allocation7 + $0x50] sm:$0xff]  ;;  %v1189_v58 = vsub.f32 %v3431_v5, %v3525_v19 }
  0x20   :  { %v2663_v25 = vpop.eup %2662  ;;  %v644_v26 = vsub.f32 2.0, %v516_v63  ;;  %2674 = vrcp.f32 %v266_v54  ;;  %v899_v51 = vmul.f32 0.6931472, %v2661_v11  ;;  %vm2375_vm10 = vcmask 786112  }
  0x21   :  { %v2665_v32 = vpop.eup %2664  ;;  %v774_v34 = vmul.f32 %v2655_v53, %v646_v15  ;;  %v642_v38 = vsub.f32 2.0, %v514_v16  ;;  %v519_v45 = vmul.f32 %v2663_v25, %v263_v30  ;;  %2676 = vlog2.f32 %v138_v37 }
  0x22   :  { %v2667_v33 = vpop.eup %2666  ;;  %v772_v49 = vmul.f32 %v2657_v57, %v644_v26  ;;  %2678 = vrcp.f32 %v265_v9  ;;  %v3539_v30 = vadd.f32 1e-10, %v3531_v20  ;;  %v140_v37 = vadd.f32 %v3428_v4, %v3533_v24 }
  0x23   :  { %v2669_v56 = vpop.eup %2668  ;;  %v1438_v63 = vmul.f32 %v3473_v29, %v774_v34  ;;  %v770_v27 = vmul.f32 %v2659_v62, %v642_v38  ;;  %v647_v61 = vsub.f32 2.0, %v519_v45  ;;  %v517_v28 = vmul.f32 %v2667_v33, %v261_v36 }
  0x24   :  { %v2671_v44 = vpop.eup %2670  ;;  %v1436_v53 = vmul.f32 %v1308_v41, %v772_v49  ;;  %2680 = vlog2.f32 %v137_v48  ;;  %v909_v62 = vmul.f32 0.6931472, %v2665_v32  ;;  %v3547_v49 = vld [vmem:[#allocation7 + $0x48] sm:$0xff]  ;;  %vm2379_vm11 = vcmask 851712  }
  0x25   :  { %v2673_v57 = vpop.eup %2672  ;;  %v1566_v11 = vadd.f32 %v1438_v63, %v907_v59  ;;  %v1434_v15 = vmul.f32 %v3493_v42, %v770_v27  ;;  %v775_v16 = vmul.f32 %v2663_v25, %v647_v61  ;;  %v645_v26 = vsub.f32 2.0, %v517_v28 }
  0x26   :  { %v2675_v19 = vpop.eup %2674  ;;  %v1564_v29 = vadd.f32 %v1436_v53, %v903_v60  ;;  %v515_v36 = vmul.f32 %v2671_v44, %v3501_v47  ;;  %2682 = vrcp.f32 %v3523_v21  ;;  %v905_v27 = vmul.f32 0.6931472, %v2669_v56  ;;  %v3552_v47 = vld [vmem:[#allocation2 + $0x50] sm:$0xff]  ;;  %v3560_v53 = vld [vmem:[#allocation2 + $0x48] sm:$0xff] }
  0x27   :  { %v2677_v41 = vpop.eup %2676  ;;  %1698 = vadd.xlane.f32.xlu2 %v1566_v11  ;;  %v1562_v48 = vadd.f32 %v1434_v15, %v899_v51  ;;  %v1439_v34 = vmul.f32 %v3495_v43, %v775_v16  ;;  %v773_v38 = vmul.f32 %v2667_v33, %v645_v26  ;;  %v522_v45 = vmul.f32 %v2675_v19, %v266_v54 }
  0x28   :  { %v2679_v59 = vpop.eup %2678  ;;  %1694 = vadd.xlane.f32.xlu1 %v1564_v29  ;;  %v643_v28 = vsub.f32 2.0, %v515_v36  ;;  %2684 = vlog2.f32 %v3511_v52  ;;  %v3550_v42 = vmul.f32 %v1189_v58, %v1189_v58  ;;  %v268_v43 = vadd.f32 1e-10, %v140_v37 }
  0x29   :  { %1690 = vadd.xlane.f32.xlu0 %v1562_v48  ;;  %v1437_v60 = vmul.f32 %v3499_v46, %v773_v38  ;;  %v650_v61 = vsub.f32 2.0, %v522_v45  ;;  %v521_v25 = vmul.f32 %v2679_v59, %v265_v9  ;;  %v901_v33 = vmul.f32 0.6931472, %v2673_v57  ;;  %v3562_v46 = vld [vmem:[#allocation7 + $0x70] sm:$0xff] }
  0x2a   :  { %v2681_v32 = vpop.eup %2680  ;;  %v771_v54 = vmul.f32 %v2671_v44, %v643_v28  ;;  %2686 = vrcp.f32 %v3539_v30  ;;  %v139_v51 = vadd.f32 %v3428_v4, %v3547_v49  ;;  %v1567_v56 = vadd.f32 %v1439_v34, %v909_v62 }
  0x2b   :  { %v778_v52 = vmul.f32 %v2675_v19, %v650_v61  ;;  %v649_v58 = vsub.f32 2.0, %v521_v25  ;;  %v1188_v63 = vsub.f32 %v3431_v5, %v3552_v47  ;;  %v1565_v11 = vadd.f32 %v1437_v60, %v905_v27  ;;  %v3567_v19 = vld [vmem:[#allocation2 + $0x70] sm:$0xff]  ;;  %v3580_v61 = vld [vmem:[#allocation2 + $0x68] sm:$0xff] }
  0x2c   :  { %v2683_v9 = vpop.eup %2682  ;;  %v1435_v44 = vmul.f32 %v3505_v50, %v771_v54  ;;  %2688 = vlog2.f32 %v3531_v20  ;;  %v267_v57 = vadd.f32 1e-10, %v139_v51  ;;  %v915_v15 = vmul.f32 0.6931472, %v2677_v41  ;;  %v3584_v54 = vld [vmem:[#allocation7 + $0x60] sm:$0xff] }
  0x2d   :  { %v777_v16 = vmul.f32 %v2679_v59, %v649_v58  ;;  %v520_v26 = vmul.f32 %v2683_v9, %v3523_v21  ;;  %2690 = vrcp.f32 %v268_v43  ;;  %v1442_v36 = vmul.f32 %v3513_v55, %v778_v52  ;;  %v3575_v21 = vld [vmem:[#allocation7 + $0x68] sm:$0xff] }
  0x2e   :  { %v2685_v29 = vpop.eup %2684  ;;  %v1563_v62 = vadd.f32 %v1435_v44, %v901_v33  ;;  %v1187_v48 = vsub.f32 %v3431_v5, %v3560_v53  ;;  %v144_v50 = vadd.f32 %v3428_v4, %v3562_v46  ;;  %v913_v20 = vmul.f32 0.6931472, %v2681_v32 }
  0x2f   :  { %1700 = vadd.xlane.f32.xlu2 %v1567_v56  ;;  %v1441_v41 = vmul.f32 %v3520_v10, %v777_v16  ;;  %v648_v34 = vsub.f32 2.0, %v520_v26  ;;  %2692 = vlog2.f32 %v140_v37  ;;  %v1316_v45 = vmul.f32 %v1188_v63, %v1188_v63  ;;  %v3591_v26 = vld [vmem:[#allocation2 + $0x60] sm:$0xff] }
  0x30   :  { %v2687_v38 = vpop.eup %2686  ;;  %1696 = vadd.xlane.f32.xlu1 %v1565_v11  ;;  %2694 = vrcp.f32 %v267_v57  ;;  %v272_v59 = vadd.f32 1e-10, %v144_v50  ;;  %v1192_v55 = vsub.f32 %v3431_v5, %v3567_v19  ;;  %v911_v28 = vmul.f32 0.6931472, %v2685_v29 }
  0x31   :  { %1692 = vadd.xlane.f32.xlu0 %v1563_v62  ;;  %v776_v27 = vmul.f32 %v2683_v9, %v648_v34  ;;  %v525_v60 = vmul.f32 %v2687_v38, %v3539_v30  ;;  %2696 = vlog2.f32 %v139_v51  ;;  %v1570_v37 = vadd.f32 %v1442_v36, %v915_v15  ;;  %v3587_v9 = vld [vmem:[#allocation7 + $0x78] sm:$0xff]  ;;  %v3598_v34 = vld [vmem:[#allocation2 + $0x78] sm:$0xff] }
  0x32   :  { %v2689_v10 = vpop.eup %2688  ;;  %v1315_v25 = vmul.f32 %v1187_v48, %v1187_v48  ;;  %2698 = vrcp.f32 %v272_v59  ;;  %v143_v32 = vadd.f32 %v3428_v4, %v3575_v21  ;;  %v1569_v56 = vadd.f32 %v1441_v41, %v913_v20  ;;  %4975 = vst [vmem:[#allocation17_spill] sm:$0xff] %v3587_v9 }
  0x33   :  { %v2691_v33 = vpop.eup %2690  ;;  %v1440_v52 = vmul.f32 %v3527_v31, %v776_v27  ;;  %v653_v58 = vsub.f32 2.0, %v525_v60  ;;  %v1320_v63 = vmul.f32 %v1192_v55, %v1192_v55  ;;  %2700 = vlog2.f32 %v144_v50 }
  0x34   :  { %v524_v30 = vmul.f32 %v2691_v33, %v268_v43  ;;  %v271_v51 = vadd.f32 1e-10, %v143_v32  ;;  %v1191_v11 = vsub.f32 %v3431_v5, %v3580_v61  ;;  %2702 = vlog2.f32 %v143_v32 }
  0x35   :  { %v2693_v44 = vpop.eup %2692  ;;  %v1568_v15 = vadd.f32 %v1440_v52, %v911_v28  ;;  %v781_v16 = vmul.f32 %v2687_v38, %v653_v58  ;;  %v142_v29 = vadd.f32 %v3428_v4, %v3584_v54  ;;  %v921_v62 = vmul.f32 0.6931472, %v2689_v10 }
  0x36   :  { %v2695_v31 = vpop.eup %2694  ;;  %v652_v36 = vsub.f32 2.0, %v524_v30  ;;  %2704 = vrcp.f32 %v271_v51  ;;  %v145_v43 = vadd.f32 %v3428_v4, %v3587_v9  ;;  %v919_v27 = vmul.f32 0.6931472, %v2693_v44 }
  0x37   :  { %v2697_v48 = vpop.eup %2696  ;;  %1706 = vadd.xlane.f32.xlu2 %v1570_v37  ;;  %v1445_v50 = vmul.f32 %v3550_v42, %v781_v16  ;;  %v523_v20 = vmul.f32 %v2695_v31, %v267_v57  ;;  %v270_v41 = vadd.f32 1e-10, %v142_v29  ;;  %2706 = vlog2.f32 %v142_v29 }
  0x38   :  { %v2699_v38 = vpop.eup %2698  ;;  %1704 = vadd.xlane.f32.xlu1 %v1569_v56  ;;  %v780_v55 = vmul.f32 %v2691_v33, %v652_v36  ;;  %v1190_v28 = vsub.f32 %v3431_v5, %v3591_v26  ;;  %v273_v60 = vadd.f32 1e-10, %v145_v43  ;;  %v1319_v32 = vmul.f32 %v1191_v11, %v1191_v11 }
  0x39   :  { %1702 = vadd.xlane.f32.xlu0 %v1568_v15  ;;  %v651_v10 = vsub.f32 2.0, %v523_v20  ;;  %v528_v4 = vmul.f32 %v2699_v38, %v272_v59  ;;  %2708 = vrcp.f32 %v270_v41  ;;  %v2701_v37 = vpop.eup %2700  ;;  %v917_v57 = vmul.f32 0.6931472, %v2697_v48 }
  0x3a   :  { %v1444_v42 = vmul.f32 %v1316_v45, %v780_v55  ;;  %2710 = vrcp.f32 %v273_v60  ;;  %v1193_v52 = vsub.f32 %v3431_v5, %v3598_v34  ;;  %v2703_v58 = vpop.eup %2702  ;;  %v1573_v56 = vadd.f32 %v1445_v50, %v921_v62 }
  0x3b   :  { %v779_v33 = vmul.f32 %v2695_v31, %v651_v10  ;;  %v656_v30 = vsub.f32 2.0, %v528_v4  ;;  %2712 = vlog2.f32 %v145_v43  ;;  %v1318_v29 = vmul.f32 %v1190_v28, %v1190_v28 }
  0x3c   :  { %v2705_v44 = vpop.eup %2704  ;;  %v1572_v16 = vadd.f32 %v1444_v42, %v919_v27  ;;  %v107_v15 = vrot.slane %v3421_v1, 1  ;;  %v1155_v59 = vrot.slane %v3419_v0, 1  ;;  %v927_v48 = vmul.f32 0.6931472, %v2701_v37 }
  0x3d   :  { %v2707_v11 = vpop.eup %2706  ;;  %v1443_v36 = vmul.f32 %v1315_v25, %v779_v33  ;;  %v784_v45 = vmul.f32 %v2699_v38, %v656_v30  ;;  %v527_v20 = vmul.f32 %v2705_v44, %v271_v51  ;;  %v925_v55 = vmul.f32 0.6931472, %v2703_v58 }
  0x3e   :  { %v1321_v9 = vmul.f32 %v1193_v52, %v1193_v52  ;;  %v3606_v5 = vperm.slane %v107_v15, 0  ;;  %v3608_v62 = vperm.slane %v1155_v59, 0  ;;  %v923_v28 = vmul.f32 0.6931472, %v2707_v11 }
  0x3f   :  { %v2709_v31 = vpop.eup %2708  ;;  %1712 = vadd.xlane.f32.xlu2 %v1573_v56  ;;  %v1571_v43 = vadd.f32 %v1443_v36, %v917_v57  ;;  %v1448_v50 = vmul.f32 %v1320_v63, %v784_v45  ;;  %v655_v27 = vsub.f32 2.0, %v527_v20  ;;  %vm4959_vm12 = vcmask 917312  }
  0x40   :  { %v2711_v10 = vpop.eup %2710  ;;  %1710 = vadd.xlane.f32.xlu1 %v1572_v16  ;;  %v526_v4 = vmul.f32 %v2709_v31, %v270_v41  ;;  %v147_v25 = vadd.f32 %v3606_v5, %v3463_v23  ;;  %v1195_v51 = vsub.f32 %v3608_v62, %v3461_v22  ;;  %v146_v38 = vadd.f32 %v3606_v5, %v3437_v8 }
  0x41   :  { %v2713_v37 = vpop.eup %2712  ;;  %1708 = vadd.xlane.f32.xlu0 %v1571_v43  ;;  %v1576_v42 = vadd.f32 %v1448_v50, %v927_v48  ;;  %v783_v52 = vmul.f32 %v2705_v44, %v655_v27  ;;  %v529_v57 = vmul.f32 %v2711_v10, %v273_v60  ;;  %v1194_v63 = vsub.f32 %v3608_v62, %v3445_v12 }
  0x42   :  { %v654_v58 = vsub.f32 2.0, %v526_v4  ;;  %v929_v56 = vmul.f32 0.6931472, %v2713_v37  ;;  %v275_v41 = vadd.f32 1e-10, %v147_v25  ;;  %2714 = vlog2.f32 %v147_v25 }
  0x43   :  { %v1447_v33 = vmul.f32 %v1319_v32, %v783_v52  ;;  %v657_v30 = vsub.f32 2.0, %v529_v57  ;;  %v3618_v16 = vmul.f32 %v1195_v51, %v1195_v51  ;;  %v274_v15 = vadd.f32 1e-10, %v146_v38 }
  0x44   :  { %v782_v59 = vmul.f32 %v2709_v31, %v654_v58  ;;  %2716 = vrcp.f32 %v275_v41  ;;  %v3620_v11 = vmul.f32 %v1194_v63, %v1194_v63  ;;  %v148_v44 = vadd.f32 %v3606_v5, %v3433_v6 }
  0x45   :  { %v1575_v60 = vadd.f32 %v1447_v33, %v925_v55  ;;  %v785_v36 = vmul.f32 %v2711_v10, %v657_v30  ;;  %2718 = vrcp.f32 %v274_v15  ;;  %v1196_v45 = vsub.f32 %v3608_v62, %v3435_v7 }
  0x46   :  { %v1446_v48 = vmul.f32 %v1318_v29, %v782_v59  ;;  %2720 = vlog2.f32 %v146_v38  ;;  %v276_v32 = vadd.f32 1e-10, %v148_v44  ;;  %v150_v20 = vadd.f32 %v3606_v5, %v3425_v3 }
  0x47   :  { %1718 = vadd.xlane.f32.xlu2 %v1576_v42  ;;  %v1449_v31 = vmul.f32 %v1321_v9, %v785_v36  ;;  %2722 = vlog2.f32 %v148_v44  ;;  %v3628_v43 = vmul.f32 %v1196_v45, %v1196_v45  ;;  %v1198_v6 = vsub.f32 %v3608_v62, %v3423_v2 }
  0x48   :  { %v2715_v55 = vpop.eup %2714  ;;  %1716 = vadd.xlane.f32.xlu1 %v1575_v60  ;;  %v1574_v50 = vadd.f32 %v1446_v48, %v923_v28  ;;  %2724 = vrcp.f32 %v276_v32  ;;  %v278_v27 = vadd.f32 1e-10, %v150_v20  ;;  %v149_v7 = vadd.f32 %v3606_v5, %v3457_v18 }
  0x49   :  { %v1577_v29 = vadd.f32 %v1449_v31, %v929_v56  ;;  %v933_v10 = vmul.f32 0.6931472, %v2715_v55  ;;  %2726 = vlog2.f32 %v150_v20  ;;  %v3634_v3 = vmul.f32 %v1198_v6, %v1198_v6 }
  0x4a   :  { %v2717_v9 = vpop.eup %2716  ;;  %1714 = vadd.xlane.f32.xlu0 %v1574_v50  ;;  %2728 = vrcp.f32 %v278_v27  ;;  %v277_v4 = vadd.f32 1e-10, %v149_v7  ;;  %v1197_v2 = vsub.f32 %v3608_v62, %v3455_v17  ;;  %v151_v28 = vadd.f32 %v3606_v5, %v3449_v14 }
  0x4b   :  { %v2719_v25 = vpop.eup %2718  ;;  %v531_v51 = vmul.f32 %v2717_v9, %v275_v41  ;;  %2730 = vlog2.f32 %v149_v7  ;;  %v1199_v38 = vsub.f32 %v3608_v62, %v3447_v13  ;;  %v153_v37 = vadd.f32 %v3606_v5, %v3483_v35 }
  0x4c   :  { %v2721_v42 = vpop.eup %2720  ;;  %v530_v52 = vmul.f32 %v2719_v25, %v274_v15  ;;  %2732 = vrcp.f32 %v277_v4  ;;  %v3644_v57 = vmul.f32 %v1197_v2, %v1197_v2  ;;  %v279_v63 = vadd.f32 1e-10, %v151_v28 }
  0x4d   :  { %v2723_v58 = vpop.eup %2722  ;;  %v659_v56 = vsub.f32 2.0, %v531_v51  ;;  %v931_v33 = vmul.f32 0.6931472, %v2721_v42  ;;  %2734 = vlog2.f32 %v151_v28  ;;  %v3646_v14 = vmul.f32 %v1199_v38, %v1199_v38 }
  0x4e   :  { %v2725_v41 = vpop.eup %2724  ;;  %v658_v30 = vsub.f32 2.0, %v530_v52  ;;  %v935_v59 = vmul.f32 0.6931472, %v2723_v58  ;;  %2736 = vrcp.f32 %v279_v63  ;;  %v281_v13 = vadd.f32 1e-10, %v153_v37 }
  0x4f   :  { %v2727_v44 = vpop.eup %2726  ;;  %v787_v60 = vmul.f32 %v2717_v9, %v659_v56  ;;  %v532_v35 = vmul.f32 %v2725_v41, %v276_v32  ;;  %2738 = vlog2.f32 %v153_v37  ;;  %v1201_v15 = vsub.f32 %v3608_v62, %v3489_v39 }
  0x50   :  { %v2729_v36 = vpop.eup %2728  ;;  %v786_v45 = vmul.f32 %v2719_v25, %v658_v30  ;;  %v939_v48 = vmul.f32 0.6931472, %v2727_v44  ;;  %2740 = vrcp.f32 %v281_v13  ;;  %v152_v20 = vadd.f32 %v3606_v5, %v3491_v40 }
  0x51   :  { %v2731_v31 = vpop.eup %2730  ;;  %v1451_v6 = vmul.f32 %v3618_v16, %v787_v60  ;;  %v660_v55 = vsub.f32 2.0, %v532_v35  ;;  %v534_v50 = vmul.f32 %v2729_v36, %v278_v27  ;;  %v3653_v7 = vmul.f32 %v1201_v15, %v1201_v15  ;;  %v4976_v16 = vld [vmem:[#allocation14_spill] sm:$0xff]  ;;  %v4977_v60 = vld [vmem:[#allocation13_spill] sm:$0xff] }
  0x52   :  { %v2733_v9 = vpop.eup %2732  ;;  %1720 = vadd.xlane.f32.xlu0 %v1577_v29  ;;  %v1450_v32 = vmul.f32 %v3620_v11, %v786_v45  ;;  %v937_v2 = vmul.f32 0.6931472, %v2731_v31  ;;  %v280_v39 = vadd.f32 1e-10, %v152_v20  ;;  %2742 = vlog2.f32 %v152_v20 }
  0x53   :  { %v2735_v28 = vpop.eup %2734  ;;  %v1579_v25 = vadd.f32 %v1451_v6, %v933_v10  ;;  %v788_v51 = vmul.f32 %v2725_v41, %v660_v55  ;;  %v662_v38 = vsub.f32 2.0, %v534_v50  ;;  %v533_v37 = vmul.f32 %v2733_v9, %v277_v4 }
  0x54   :  { %v2737_v40 = vpop.eup %2736  ;;  %v1578_v42 = vadd.f32 %v1450_v32, %v931_v33  ;;  %v941_v52 = vmul.f32 0.6931472, %v2735_v28  ;;  %2744 = vrcp.f32 %v280_v39  ;;  %v1200_v27 = vsub.f32 %v3608_v62, %v4976_v16  ;;  %v4978_v33 = vld [vmem:[#allocation12_spill] sm:$0xff] }
  0x55   :  { %v2739_v58 = vpop.eup %2738  ;;  %1724 = vadd.xlane.f32.xlu2 %v1579_v25  ;;  %v1452_v29 = vmul.f32 %v3628_v43, %v788_v51  ;;  %v790_v11 = vmul.f32 %v2729_v36, %v662_v38  ;;  %v661_v56 = vsub.f32 2.0, %v533_v37  ;;  %v535_v30 = vmul.f32 %v2737_v40, %v279_v63 }
  0x56   :  { %v2741_v44 = vpop.eup %2740  ;;  %1722 = vadd.xlane.f32.xlu1 %v1578_v42  ;;  %v945_v10 = vmul.f32 0.6931472, %v2739_v58  ;;  %v1328_v41 = vmul.f32 %v1200_v27, %v1200_v27  ;;  %v154_v4 = vadd.f32 %v3606_v5, %v4977_v60  ;;  %v1202_v35 = vsub.f32 %v3608_v62, %v4978_v33 }
  0x57   :  { %v1580_v15 = vadd.f32 %v1452_v29, %v935_v59  ;;  %v1454_v45 = vmul.f32 %v3634_v3, %v790_v11  ;;  %v789_v20 = vmul.f32 %v2733_v9, %v661_v56  ;;  %v663_v31 = vsub.f32 2.0, %v535_v30  ;;  %v4980_v56 = vld [vmem:[#allocation16_spill] sm:$0xff] }
  0x58   :  { %v2743_v6 = vpop.eup %2742  ;;  %v537_v43 = vmul.f32 %v2741_v44, %v281_v13  ;;  %v282_v36 = vadd.f32 1e-10, %v154_v4  ;;  %2746 = vlog2.f32 %v154_v4  ;;  %v3664_v63 = vmul.f32 %v1202_v35, %v1202_v35 }
  0x59   :  { %v1582_v55 = vadd.f32 %v1454_v45, %v939_v48  ;;  %v1453_v50 = vmul.f32 %v3644_v57, %v789_v20  ;;  %v791_v32 = vmul.f32 %v2737_v40, %v663_v31  ;;  %v943_v28 = vmul.f32 0.6931472, %v2743_v6 }
  0x5a   :  { %v2745_v25 = vpop.eup %2744  ;;  %1726 = vadd.xlane.f32.xlu0 %v1580_v15  ;;  %v665_v51 = vsub.f32 2.0, %v537_v43  ;;  %2748 = vrcp.f32 %v282_v36  ;;  %v156_v3 = vadd.f32 %v3606_v5, %v3533_v24  ;;  %v1204_v59 = vsub.f32 %v3608_v62, %v3552_v47 }
  0x5b   :  { %v1581_v13 = vadd.f32 %v1453_v50, %v937_v2  ;;  %v1455_v9 = vmul.f32 %v3646_v14, %v791_v32  ;;  %v536_v38 = vmul.f32 %v2745_v25, %v280_v39  ;;  %v155_v48 = vadd.f32 %v3606_v5, %v3547_v49  ;;  %v4979_v2 = vld [vmem:[#allocation15_spill] sm:$0xff] }
  0x5c   :  { %v793_v57 = vmul.f32 %v2741_v44, %v665_v51  ;;  %v284_v37 = vadd.f32 1e-10, %v156_v3  ;;  %2750 = vlog2.f32 %v156_v3  ;;  %v3674_v40 = vmul.f32 %v1204_v59, %v1204_v59 }
  0x5d   :  { %1730 = vadd.xlane.f32.xlu2 %v1582_v55  ;;  %v1583_v42 = vadd.f32 %v1455_v9, %v941_v52  ;;  %v664_v27 = vsub.f32 2.0, %v536_v38  ;;  %v283_v58 = vadd.f32 1e-10, %v155_v48  ;;  %2752 = vlog2.f32 %v155_v48 }
  0x5e   :  { %v2747_v24 = vpop.eup %2746  ;;  %1728 = vadd.xlane.f32.xlu1 %v1581_v13  ;;  %v1457_v47 = vmul.f32 %v3653_v7, %v793_v57  ;;  %2754 = vrcp.f32 %v284_v37  ;;  %v1203_v14 = vsub.f32 %v3608_v62, %v3560_v53  ;;  %v157_v39 = vadd.f32 %v3606_v5, %v4979_v2 }
  0x5f   :  { %v792_v29 = vmul.f32 %v2745_v25, %v664_v27  ;;  %v947_v11 = vmul.f32 0.6931472, %v2747_v24  ;;  %2756 = vrcp.f32 %v283_v58  ;;  %v1205_v52 = vsub.f32 %v3608_v62, %v4980_v56 }
  0x60   :  { %v2749_v30 = vpop.eup %2748  ;;  %v1585_v44 = vadd.f32 %v1457_v47, %v945_v10  ;;  %v1331_v60 = vmul.f32 %v1203_v14, %v1203_v14  ;;  %v285_v4 = vadd.f32 1e-10, %v157_v39  ;;  %2758 = vlog2.f32 %v157_v39 }
  0x61   :  { %v1456_v33 = vmul.f32 %v1328_v41, %v792_v29  ;;  %v538_v7 = vmul.f32 %v2749_v30, %v282_v36  ;;  %v3683_v35 = vmul.f32 %v1205_v52, %v1205_v52  ;;  %v159_v15 = vadd.f32 %v3606_v5, %v3575_v21 }
  0x62   :  { %v2751_v45 = vpop.eup %2750  ;;  %1732 = vadd.xlane.f32.xlu0 %v1583_v42  ;;  %2760 = vrcp.f32 %v285_v4  ;;  %v1207_v20 = vsub.f32 %v3608_v62, %v3580_v61  ;;  %v158_v31 = vadd.f32 %v3606_v5, %v3584_v54  ;;  %v1206_v10 = vsub.f32 %v3608_v62, %v3591_v26 }
  0x63   :  { %v2753_v6 = vpop.eup %2752  ;;  %v1584_v41 = vadd.f32 %v1456_v33, %v943_v28  ;;  %v666_v43 = vsub.f32 2.0, %v538_v7  ;;  %v951_v36 = vmul.f32 0.6931472, %v2751_v45  ;;  %v287_v55 = vadd.f32 1e-10, %v159_v15 }
  0x64   :  { %v2755_v50 = vpop.eup %2754  ;;  %v949_v32 = vmul.f32 0.6931472, %v2753_v6  ;;  %2762 = vlog2.f32 %v159_v15  ;;  %v3693_v21 = vmul.f32 %v1207_v20, %v1207_v20  ;;  %v286_v25 = vadd.f32 1e-10, %v158_v31 }
  0x65   :  { %v2757_v51 = vpop.eup %2756  ;;  %1736 = vadd.xlane.f32.xlu2 %v1585_v44  ;;  %v794_v3 = vmul.f32 %v2749_v30, %v666_v43  ;;  %v540_v59 = vmul.f32 %v2755_v50, %v284_v37  ;;  %2764 = vrcp.f32 %v287_v55  ;;  %v3695_v13 = vmul.f32 %v1206_v10, %v1206_v10 }
  0x66   :  { %v2759_v9 = vpop.eup %2758  ;;  %1734 = vadd.xlane.f32.xlu1 %v1584_v41  ;;  %v539_v38 = vmul.f32 %v2757_v51, %v283_v58  ;;  %2766 = vrcp.f32 %v286_v25  ;;  %v160_v28 = vadd.f32 %v3606_v5, %v3562_v46  ;;  %v1208_v48 = vsub.f32 %v3608_v62, %v3567_v19 }
  0x67   :  { %v1458_v57 = vmul.f32 %v3664_v63, %v794_v3  ;;  %v668_v42 = vsub.f32 2.0, %v540_v59  ;;  %v953_v27 = vmul.f32 0.6931472, %v2759_v9  ;;  %2768 = vlog2.f32 %v158_v31  ;;  %v4981_v63 = vld [vmem:[#allocation17_spill] sm:$0xff] }
  0x68   :  { %v2761_v24 = vpop.eup %2760  ;;  %v667_v37 = vsub.f32 2.0, %v539_v38  ;;  %v288_v47 = vadd.f32 1e-10, %v160_v28  ;;  %2770 = vlog2.f32 %v160_v28  ;;  %v3702_v14 = vmul.f32 %v1208_v48, %v1208_v48 }
  0x69   :  { %v1586_v2 = vadd.f32 %v1458_v57, %v947_v11  ;;  %v796_v58 = vmul.f32 %v2755_v50, %v668_v42  ;;  %v541_v39 = vmul.f32 %v2761_v24, %v285_v4  ;;  %v108_v29 = vrot.slane %v3421_v1, 2 }
  0x6a   :  { %v2763_v46 = vpop.eup %2762  ;;  %v795_v56 = vmul.f32 %v2757_v51, %v667_v37  ;;  %2772 = vrcp.f32 %v288_v47  ;;  %v1156_v19 = vrot.slane %v3419_v0, 2  ;;  %v161_v52 = vadd.f32 %v3606_v5, %v4981_v63 }
  0x6b   :  { %v2765_v30 = vpop.eup %2764  ;;  %1738 = vadd.xlane.f32.xlu0 %v1586_v2  ;;  %v1460_v44 = vmul.f32 %v3674_v40, %v796_v58  ;;  %v669_v33 = vsub.f32 2.0, %v541_v39  ;;  %v957_v7 = vmul.f32 0.6931472, %v2763_v46  ;;  %v3709_v15 = vperm.slane %v108_v29, 0  ;;  %v3739_v39 = vld [vmem:[#allocation7 + $0x10] sm:$0xff]  ;;  %v3743_v29 = vld [vmem:[#allocation2 + $0x10] sm:$0xff] }
  0x6c   :  { %v2767_v11 = vpop.eup %2766  ;;  %v1459_v4 = vmul.f32 %v1331_v60, %v795_v56  ;;  %v543_v45 = vmul.f32 %v2765_v30, %v287_v55  ;;  %v3711_v1 = vperm.slane %v1156_v19, 0  ;;  %v3713_v20 = vadd.f32 1e-10, %v161_v52 }
  0x6d   :  { %v2769_v31 = vpop.eup %2768  ;;  %v1588_v0 = vadd.f32 %v1460_v44, %v951_v36  ;;  %v797_v10 = vmul.f32 %v2761_v24, %v669_v33  ;;  %v542_v6 = vmul.f32 %v2767_v11, %v286_v25  ;;  %v162_v5 = vadd.f32 %v3709_v15, %v3437_v8 }
  0x6e   :  { %v2771_v41 = vpop.eup %2770  ;;  %v1587_v40 = vadd.f32 %v1459_v4, %v949_v32  ;;  %v671_v43 = vsub.f32 2.0, %v543_v45  ;;  %v955_v50 = vmul.f32 0.6931472, %v2769_v31  ;;  %v1210_v51 = vsub.f32 %v3711_v1, %v3445_v12  ;;  %v3753_v45 = vld [vmem:[#allocation7 + $0x20] sm:$0xff] }
  0x6f   :  { %1742 = vadd.xlane.f32.xlu2 %v1588_v0  ;;  %v1461_v60 = vmul.f32 %v3683_v35, %v797_v10  ;;  %v670_v55 = vsub.f32 2.0, %v542_v6  ;;  %v959_v3 = vmul.f32 0.6931472, %v2771_v41  ;;  %v290_v59 = vadd.f32 1e-10, %v162_v5  ;;  %v3757_v6 = vld [vmem:[#allocation2 + $0x20] sm:$0xff] }
  0x70   :  { %v2773_v9 = vpop.eup %2772  ;;  %1740 = vadd.xlane.f32.xlu1 %v1587_v40  ;;  %v799_v36 = vmul.f32 %v2765_v30, %v671_v43  ;;  %2774 = vlog2.f32 %v162_v5  ;;  %v3720_v25 = vmul.f32 %v1210_v51, %v1210_v51  ;;  %v1209_v8 = vsub.f32 %v3608_v62, %v3598_v34 }
  0x71   :  { %v1589_v32 = vadd.f32 %v1461_v60, %v953_v27  ;;  %v798_v38 = vmul.f32 %v2767_v11, %v670_v55  ;;  %v544_v28 = vmul.f32 %v2773_v9, %v288_v47  ;;  %2776 = vrcp.f32 %v290_v59  ;;  %v3763_v60 = vld [vmem:[#allocation7 + $0x30] sm:$0xff] }
  0x72   :  { %v1463_v12 = vmul.f32 %v3693_v21, %v799_v36  ;;  %2778 = vrcp.f32 %v3713_v20  ;;  %v3726_v35 = vmul.f32 %v1209_v8, %v1209_v8  ;;  %v163_v48 = vadd.f32 %v3709_v15, %v3463_v23  ;;  %v3769_v8 = vld [vmem:[#allocation7 + $0x28] sm:$0xff] }
  0x73   :  { %1744 = vadd.xlane.f32.xlu0 %v1589_v32  ;;  %v1462_v57 = vmul.f32 %v3695_v13, %v798_v38  ;;  %v672_v42 = vsub.f32 2.0, %v544_v28  ;;  %2780 = vlog2.f32 %v161_v52  ;;  %v1211_v62 = vsub.f32 %v3711_v1, %v3461_v22 }
  0x74   :  { %v1591_v27 = vadd.f32 %v1463_v12, %v957_v7  ;;  %v291_v24 = vadd.f32 1e-10, %v163_v48  ;;  %2782 = vlog2.f32 %v163_v48  ;;  %v165_v21 = vadd.f32 %v3709_v15, %v3457_v18 }
  0x75   :  { %v1590_v37 = vadd.f32 %v1462_v57, %v955_v50  ;;  %v800_v47 = vmul.f32 %v2773_v9, %v672_v42  ;;  %v3735_v2 = vmul.f32 %v1211_v62, %v1211_v62  ;;  %v1213_v23 = vsub.f32 %v3711_v1, %v3455_v17 }
  0x76   :  { %v2775_v58 = vpop.eup %2774  ;;  %2784 = vrcp.f32 %v291_v24  ;;  %v293_v13 = vadd.f32 1e-10, %v165_v21  ;;  %v164_v22 = vadd.f32 %v3739_v39, %v3709_v15  ;;  %v1212_v18 = vsub.f32 %v3711_v1, %v3743_v29 }
  0x77   :  { %v2777_v46 = vpop.eup %2776  ;;  %1748 = vadd.xlane.f32.xlu2 %v1591_v27  ;;  %v1464_v56 = vmul.f32 %v3702_v14, %v800_v47  ;;  %v963_v19 = vmul.f32 0.6931472, %v2775_v58  ;;  %2786 = vlog2.f32 %v165_v21  ;;  %v3748_v17 = vmul.f32 %v1213_v23, %v1213_v23 }
  0x78   :  { %v2779_v52 = vpop.eup %2778  ;;  %1746 = vadd.xlane.f32.xlu1 %v1590_v37  ;;  %v546_v30 = vmul.f32 %v2777_v46, %v290_v59  ;;  %2788 = vrcp.f32 %v293_v13  ;;  %v292_v44 = vadd.f32 1e-10, %v164_v22  ;;  %v3750_v33 = vmul.f32 %v1212_v18, %v1212_v18 }
  0x79   :  { %v2781_v7 = vpop.eup %2780  ;;  %v1592_v11 = vadd.f32 %v1464_v56, %v959_v3  ;;  %v545_v4 = vmul.f32 %v2779_v52, %v3713_v20  ;;  %2790 = vlog2.f32 %v164_v22  ;;  %v166_v14 = vadd.f32 %v3753_v45, %v3709_v15  ;;  %v3777_v56 = vld [vmem:[#allocation2 + $0x28] sm:$0xff] }
  0x7a   :  { %v2783_v31 = vpop.eup %2782  ;;  %v674_v0 = vsub.f32 2.0, %v546_v30  ;;  %v961_v10 = vmul.f32 0.6931472, %v2781_v7  ;;  %2792 = vrcp.f32 %v292_v44  ;;  %v1214_v5 = vsub.f32 %v3711_v1, %v3757_v6 }
  0x7b   :  { %1750 = vadd.xlane.f32.xlu0 %v1592_v11  ;;  %v673_v41 = vsub.f32 2.0, %v545_v4  ;;  %v965_v40 = vmul.f32 0.6931472, %v2783_v31  ;;  %v294_v43 = vadd.f32 1e-10, %v166_v14  ;;  %2794 = vlog2.f32 %v166_v14 }
  0x7c   :  { %v2785_v20 = vpop.eup %2784  ;;  %v802_v50 = vmul.f32 %v2777_v46, %v674_v0  ;;  %v3761_v51 = vmul.f32 %v1214_v5, %v1214_v5  ;;  %v168_v55 = vadd.f32 %v3763_v60, %v3709_v15  ;;  %v1216_v3 = vsub.f32 %v3711_v1, %v4976_v16 }
  0x7d   :  { %v2787_v59 = vpop.eup %2786  ;;  %v801_v9 = vmul.f32 %v2779_v52, %v673_v41  ;;  %v547_v36 = vmul.f32 %v2785_v20, %v291_v24  ;;  %2796 = vrcp.f32 %v294_v43  ;;  %v167_v32 = vadd.f32 %v3769_v8, %v3709_v15 }
  0x7e   :  { %v2789_v38 = vpop.eup %2788  ;;  %v1466_v28 = vmul.f32 %v3720_v25, %v802_v50  ;;  %v969_v12 = vmul.f32 0.6931472, %v2787_v59  ;;  %v296_v48 = vadd.f32 1e-10, %v168_v55  ;;  %2798 = vlog2.f32 %v168_v55  ;;  %v3787_v55 = vld [vmem:[#allocation2 + $0x38] sm:$0xff] }
  0x7f   :  { %v2791_v57 = vpop.eup %2790  ;;  %v1465_v42 = vmul.f32 %v3726_v35, %v801_v9  ;;  %v675_v62 = vsub.f32 2.0, %v547_v36  ;;  %v549_v16 = vmul.f32 %v2789_v38, %v293_v13  ;;  %v3775_v27 = vmul.f32 %v1216_v3, %v1216_v3  ;;  %v3781_v13 = vld [vmem:[#allocation7 + $0x38] sm:$0xff] }
  0x80   :  { %v2793_v24 = vpop.eup %2792  ;;  %v1594_v21 = vadd.f32 %v1466_v28, %v963_v19  ;;  %v967_v37 = vmul.f32 0.6931472, %v2791_v57  ;;  %2800 = vrcp.f32 %v296_v48  ;;  %v295_v47 = vadd.f32 1e-10, %v167_v32 }
  0x81   :  { %v2795_v23 = vpop.eup %2794  ;;  %v1593_v58 = vadd.f32 %v1465_v42, %v961_v10  ;;  %v803_v22 = vmul.f32 %v2785_v20, %v675_v62  ;;  %v677_v18 = vsub.f32 2.0, %v549_v16  ;;  %v548_v25 = vmul.f32 %v2793_v24, %v292_v44 }
  0x82   :  { %1754 = vadd.xlane.f32.xlu2 %v1594_v21  ;;  %v971_v46 = vmul.f32 0.6931472, %v2795_v23  ;;  %2802 = vrcp.f32 %v295_v47  ;;  %v1215_v35 = vsub.f32 %v3711_v1, %v3777_v56  ;;  %v169_v19 = vadd.f32 %v3781_v13, %v3709_v15 }
  0x83   :  { %v2797_v52 = vpop.eup %2796  ;;  %1752 = vadd.xlane.f32.xlu1 %v1593_v58  ;;  %v1467_v30 = vmul.f32 %v3735_v2, %v803_v22  ;;  %v805_v7 = vmul.f32 %v2789_v38, %v677_v18  ;;  %v676_v11 = vsub.f32 2.0, %v548_v25  ;;  %2804 = vlog2.f32 %v167_v32 }
  0x84   :  { %v2799_v44 = vpop.eup %2798  ;;  %v550_v4 = vmul.f32 %v2797_v52, %v294_v43  ;;  %v1343_v14 = vmul.f32 %v1215_v35, %v1215_v35  ;;  %v297_v31 = vadd.f32 1e-10, %v169_v19  ;;  %2806 = vlog2.f32 %v169_v19 }
  0x85   :  { %v1595_v0 = vadd.f32 %v1467_v30, %v965_v40  ;;  %v1469_v10 = vmul.f32 %v3748_v17, %v805_v7  ;;  %v804_v5 = vmul.f32 %v2793_v24, %v676_v11  ;;  %v975_v41 = vmul.f32 0.6931472, %v2799_v44  ;;  %v3814_v44 = vld [vmem:[#allocation2 + $0x50] sm:$0xff] }
  0x86   :  { %v2801_v20 = vpop.eup %2800  ;;  %v678_v50 = vsub.f32 2.0, %v550_v4  ;;  %2808 = vrcp.f32 %v297_v31  ;;  %v1217_v2 = vsub.f32 %v3711_v1, %v3787_v55  ;;  %v171_v3 = vadd.f32 %v3709_v15, %v3547_v49 }
  0x87   :  { %1756 = vadd.xlane.f32.xlu0 %v1595_v0  ;;  %v1597_v43 = vadd.f32 %v1469_v10, %v969_v12  ;;  %v1468_v59 = vmul.f32 %v3750_v33, %v804_v5  ;;  %v552_v40 = vmul.f32 %v2801_v20, %v296_v48  ;;  %v1219_v17 = vsub.f32 %v3711_v1, %v3560_v53  ;;  %v3799_v48 = vld [vmem:[#allocation7 + $0x40] sm:$0xff] }
  0x88   :  { %v2803_v9 = vpop.eup %2802  ;;  %v806_v36 = vmul.f32 %v2797_v52, %v678_v50  ;;  %v1345_v32 = vmul.f32 %v1217_v2, %v1217_v2  ;;  %v299_v38 = vadd.f32 1e-10, %v171_v3  ;;  %2810 = vlog2.f32 %v171_v3 }
  0x89   :  { %v2805_v28 = vpop.eup %2804  ;;  %v1596_v57 = vadd.f32 %v1468_v59, %v967_v37  ;;  %v680_v42 = vsub.f32 2.0, %v552_v40  ;;  %v551_v62 = vmul.f32 %v2803_v9, %v295_v47  ;;  %v3796_v16 = vmul.f32 %v1219_v17, %v1219_v17  ;;  %v3803_v37 = vld [vmem:[#allocation2 + $0x40] sm:$0xff]  ;;  %v3830_v17 = vld [vmem:[#allocation2 + $0x58] sm:$0xff] }
  0x8a   :  { %v2807_v49 = vpop.eup %2806  ;;  %1760 = vadd.xlane.f32.xlu2 %v1597_v43  ;;  %v1470_v12 = vmul.f32 %v3761_v51, %v806_v36  ;;  %v973_v33 = vmul.f32 0.6931472, %v2805_v28  ;;  %2812 = vrcp.f32 %v299_v38  ;;  %v170_v53 = vadd.f32 %v3799_v48, %v3709_v15  ;;  %v3807_v51 = vld [vmem:[#allocation7 + $0x50] sm:$0xff] }
  0x8b   :  { %1758 = vadd.xlane.f32.xlu1 %v1596_v57  ;;  %v808_v24 = vmul.f32 %v2801_v20, %v680_v42  ;;  %v679_v21 = vsub.f32 2.0, %v551_v62  ;;  %v977_v23 = vmul.f32 0.6931472, %v2807_v49  ;;  %v1218_v47 = vsub.f32 %v3711_v1, %v3803_v37 }
  0x8c   :  { %v2809_v58 = vpop.eup %2808  ;;  %v1598_v22 = vadd.f32 %v1470_v12, %v971_v46  ;;  %v298_v18 = vadd.f32 1e-10, %v170_v53  ;;  %2814 = vlog2.f32 %v170_v53  ;;  %v172_v25 = vadd.f32 %v3807_v51, %v3709_v15  ;;  %v3836_v53 = vld [vmem:[#allocation7 + $0x68] sm:$0xff] }
  0x8d   :  { %v1472_v35 = vmul.f32 %v3775_v27, %v808_v24  ;;  %v807_v19 = vmul.f32 %v2803_v9, %v679_v21  ;;  %v553_v52 = vmul.f32 %v2809_v58, %v297_v31  ;;  %v3812_v30 = vmul.f32 %v1218_v47, %v1218_v47 }
  0x8e   :  { %v2811_v7 = vpop.eup %2810  ;;  %2816 = vrcp.f32 %v298_v18  ;;  %v300_v11 = vadd.f32 1e-10, %v172_v25  ;;  %v1220_v46 = vsub.f32 %v3711_v1, %v3814_v44  ;;  %v174_v4 = vadd.f32 %v3709_v15, %v3584_v54 }
  0x8f   :  { %1762 = vadd.xlane.f32.xlu0 %v1598_v22  ;;  %v1600_v0 = vadd.f32 %v1472_v35, %v975_v41  ;;  %v1471_v10 = vmul.f32 %v1343_v14, %v807_v19  ;;  %v681_v5 = vsub.f32 2.0, %v553_v52  ;;  %v981_v27 = vmul.f32 0.6931472, %v2811_v7  ;;  %v3826_v14 = vld [vmem:[#allocation7 + $0x58] sm:$0xff] }
  0x90   :  { %v2813_v20 = vpop.eup %2812  ;;  %2818 = vrcp.f32 %v300_v11  ;;  %v3820_v31 = vmul.f32 %v1220_v46, %v1220_v46  ;;  %v302_v50 = vadd.f32 1e-10, %v174_v4  ;;  %v1222_v2 = vsub.f32 %v3711_v1, %v3591_v26 }
  0x91   :  { %v1599_v3 = vadd.f32 %v1471_v10, %v973_v33  ;;  %v809_v43 = vmul.f32 %v2809_v58, %v681_v5  ;;  %v555_v59 = vmul.f32 %v2813_v20, %v299_v38  ;;  %2820 = vlog2.f32 %v172_v25 }
  0x92   :  { %v2815_v40 = vpop.eup %2814  ;;  %1766 = vadd.xlane.f32.xlu2 %v1600_v0  ;;  %2822 = vrcp.f32 %v302_v50  ;;  %v3824_v54 = vmul.f32 %v1222_v2, %v1222_v2  ;;  %v173_v41 = vadd.f32 %v3826_v14, %v3709_v15  ;;  %v1221_v9 = vsub.f32 %v3711_v1, %v3830_v17 }
  0x93   :  { %1764 = vadd.xlane.f32.xlu1 %v1599_v3  ;;  %v1473_v26 = vmul.f32 %v1345_v32, %v809_v43  ;;  %v683_v36 = vsub.f32 2.0, %v555_v59  ;;  %v979_v38 = vmul.f32 0.6931472, %v2815_v40  ;;  %2824 = vlog2.f32 %v174_v4 }
  0x94   :  { %v2817_v28 = vpop.eup %2816  ;;  %v301_v57 = vadd.f32 1e-10, %v173_v41  ;;  %2826 = vlog2.f32 %v173_v41  ;;  %v3834_v42 = vmul.f32 %v1221_v9, %v1221_v9  ;;  %v2330_v62 = vlaneseq }
  0x95   :  { %v1601_v49 = vadd.f32 %v1473_v26, %v977_v23  ;;  %v811_v12 = vmul.f32 %v2813_v20, %v683_v36  ;;  %v554_v33 = vmul.f32 %v2817_v28, %v298_v18  ;;  %v175_v24 = vadd.f32 %v3836_v53, %v3709_v15 }
  0x96   :  { %v2819_v21 = vpop.eup %2818  ;;  %2828 = vrcp.f32 %v301_v57  ;;  %v3840_v32 = vand.u32 127, %v2330_v62  ;;  %v1223_v47 = vsub.f32 %v3711_v1, %v3580_v61  ;;  %v177_v58 = vadd.f32 %v3709_v15, %v4981_v63 }
  0x97   :  { %v2821_v22 = vpop.eup %2820  ;;  %1768 = vadd.xlane.f32.xlu0 %v1601_v49  ;;  %v1475_v23 = vmul.f32 %v3796_v16, %v811_v12  ;;  %v682_v18 = vsub.f32 2.0, %v554_v33  ;;  %v556_v25 = vmul.f32 %v2819_v21, %v300_v11  ;;  %v303_v35 = vadd.f32 1e-10, %v175_v24 }
  0x98   :  { %v2823_v19 = vpop.eup %2822  ;;  %v983_v52 = vmul.f32 0.6931472, %v2821_v22  ;;  %v3848_v7 = vadd.s32 4294967264, %v3840_v32  ;;  %v3851_v46 = vadd.s32 4294967280, %v3840_v32  ;;  %2830 = vlog2.f32 %v175_v24 }
  0x99   :  { %v2825_v61 = vpop.eup %2824  ;;  %v1603_v4 = vadd.f32 %v1475_v23, %v981_v27  ;;  %v810_v0 = vmul.f32 %v2817_v28, %v682_v18  ;;  %v684_v63 = vsub.f32 2.0, %v556_v25  ;;  %v558_v10 = vmul.f32 %v2823_v19, %v302_v50  ;;  %v3869_v18 = vld [vmem:[#allocation7 + $0x70] sm:$0xff] }
  0x9a   :  { %v2827_v5 = vpop.eup %2826  ;;  %v987_v20 = vmul.f32 0.6931472, %v2825_v61  ;;  %v1699_v16 = vpop.xlane.xlu2 %1698  ;;  %2832 = vrcp.f32 %v303_v35  ;;  %v3853_v11 = vmul.f32 %v1223_v47, %v1223_v47  ;;  %v305_v2 = vadd.f32 1e-10, %v177_v58 }
  0x9b   :  { %1772 = vadd.xlane.f32.xlu2 %v1603_v4  ;;  %v1474_v3 = vmul.f32 %v3812_v30, %v810_v0  ;;  %v812_v43 = vmul.f32 %v2819_v21, %v684_v63  ;;  %v686_v59 = vsub.f32 2.0, %v558_v10  ;;  %v985_v40 = vmul.f32 0.6931472, %v2827_v5  ;;  %v1695_v41 = vpop.xlane.xlu1 %1694 }
  0x9c   :  { %v2829_v9 = vpop.eup %2828  ;;  %v2078_v26 = vsub.f32 0.0, %v1699_v16  ;;  %v2076_v27 = vsub.f32 0.0, %v1695_v41  ;;  %v1691_v36 = vpop.xlane.xlu0 %1690  ;;  %2834 = vrcp.f32 %v305_v2  ;;  %v1225_v50 = vsub.f32 %v3711_v1, %v3598_v34 }
  0x9d   :  { %v1602_v28 = vadd.f32 %v1474_v3, %v979_v38  ;;  %v1476_v62 = vmul.f32 %v3820_v31, %v812_v43  ;;  %v814_v49 = vmul.f32 %v2823_v19, %v686_v59  ;;  %v557_v12 = vmul.f32 %v2829_v9, %v301_v57  ;;  %v3873_v19 = vld [vmem:[#allocation2 + $0x70] sm:$0xff] }
  0x9e   :  { %v2831_v33 = vpop.eup %2830  ;;  %v3860_v30 = vperm.slane %v2078_v26, %v3848_v7  ;;  %v3863_v24 = vperm.slane %v2076_v27, %v3851_v46  ;;  %v2074_v21 = vsub.f32 0.0, %v1691_v36  ;;  %2836 = vlog2.f32 %v177_v58 }
  0x9f   :  { %1770 = vadd.xlane.f32.xlu1 %v1602_v28  ;;  %v1604_v47 = vadd.f32 %v1476_v62, %v983_v52  ;;  %v1478_v22 = vmul.f32 %v3824_v54, %v814_v49  ;;  %v685_v23 = vsub.f32 2.0, %v557_v12  ;;  %v989_v34 = vmul.f32 0.6931472, %v2831_v33  ;;  %v3894_v12 = vld [vmem:[#allocation5] sm:$0xff] }
  0xa0   :  { %v2833_v38 = vpop.eup %2832  ;;  %v3867_v31 = vperm.slane %v2074_v21, %v3840_v32  ;;  %v1353_v57 = vmul.f32 %v1225_v50, %v1225_v50  ;;  %v176_v25 = vadd.f32 %v3869_v18, %v3709_v15  ;;  %v1224_v58 = vsub.f32 %v3711_v1, %v3873_v19  ;;  %v3900_v21 = vld [vmem:[%s4921_s0] sm:$0xff] }
  0xa1   :  { %1774 = vadd.xlane.f32.xlu0 %v1604_v47  ;;  %v1606_v52 = vadd.f32 %v1478_v22, %v987_v20  ;;  %v813_v54 = vmul.f32 %v2829_v9, %v685_v23  ;;  %v559_v61 = vmul.f32 %v2833_v38, %v303_v35  ;;  %v3878_v4 = vadd.s32 4294967256, %v3840_v32 }
  0xa2   :  { %v2835_v0 = vpop.eup %2834  ;;  %v304_v63 = vadd.f32 1e-10, %v176_v25  ;;  %2838 = vlog2.f32 %v176_v25  ;;  %v3880_v10 = vmul.f32 %v1224_v58, %v1224_v58  ;;  %v1701_v5 = vpop.xlane.xlu2 %1700  ;;  %v3883_v15 = vadd.s32 4294967272, %v3840_v32 }
  0xa3   :  { %1778 = vadd.xlane.f32.xlu2 %v1606_v52  ;;  %v1477_v16 = vmul.f32 %v3834_v42, %v813_v54  ;;  %v687_v1 = vsub.f32 2.0, %v559_v61  ;;  %v561_v3 = vmul.f32 %v2835_v0, %v305_v2  ;;  %v2079_v20 = vsub.f32 0.0, %v1701_v5  ;;  %v1697_v43 = vpop.xlane.xlu1 %1696 }
  0xa4   :  { %v2837_v35 = vpop.eup %2836  ;;  %2840 = vrcp.f32 %v304_v63  ;;  %v2077_v59 = vsub.f32 0.0, %v1697_v43  ;;  %v3887_v41 = vadd.s32 4294967288, %v3840_v32  ;;  %v1693_v9 = vpop.xlane.xlu0 %1692  ;;  %v109_v33 = vrot.slane %v3894_v12, 3 }
  0xa5   :  { %v1605_v26 = vadd.f32 %v1477_v16, %v985_v40  ;;  %v815_v27 = vmul.f32 %v2833_v38, %v687_v1  ;;  %v689_v36 = vsub.f32 2.0, %v561_v3  ;;  %v993_v50 = vmul.f32 0.6931472, %v2837_v35  ;;  %v3925_v35 = vld [vmem:[#allocation2] sm:$0xff] }
  0xa6   :  { %v3890_v28 = vperm.slane %v2079_v20, %v3878_v4  ;;  %v2342_v42 = vperm.slane %v2077_v59, %v3883_v15  ;;  %v2075_v49 = vsub.f32 0.0, %v1693_v9  ;;  %v1157_v47 = vrot.slane %v3900_v21, 3  ;;  %v3921_v20 = vld [vmem:[#allocation7] sm:$0xff] }
  0xa7   :  { %1776 = vadd.xlane.f32.xlu1 %v1605_v26  ;;  %v1479_v2 = vmul.f32 %v3853_v11, %v815_v27  ;;  %v817_v62 = vmul.f32 %v2835_v0, %v689_v36  ;;  %v3904_v22 = vadd.s32 4294967232, %v3840_v32  ;;  %v3907_v23 = vadd.s32 4294967240, %v3840_v32  ;;  %v3934_v26 = vld [vmem:[#allocation7 + $0x8] sm:$0xff] }
  0xa8   :  { %v2839_v40 = vpop.eup %2838  ;;  %v2334_v58 = vperm.slane %v2075_v49, %v3887_v41  ;;  %v3910_v54 = vperm.slane %v109_v33, 0  ;;  %v3912_v61 = vperm.slane %v1157_v47, 0  ;;  %v3915_v5 = vadd.s32 4294967248, %v3840_v32 }
  0xa9   :  { %4982 = vst [vmem:[#allocation14_spill] sm:$0xff] %v3904_v22  ;;  %v1607_v11 = vadd.f32 %v1479_v2, %v989_v34  ;;  %v1481_v38 = vmul.f32 %v1353_v57, %v817_v62  ;;  %v991_v25 = vmul.f32 0.6931472, %v2839_v40  ;;  %vm2387_vm13 = vcmask 982912  }
  0xaa   :  { %4983 = vst [vmem:[#allocation13_spill] sm:$0xff] %v3907_v23  ;;  %v2841_v52 = vpop.eup %2840  ;;  %v1707_v0 = vpop.xlane.xlu2 %1706  ;;  %v2336_v34 = vsel %vm2335_vm0, %v2334_v58, %v3867_v31  ;;  %v178_v43 = vadd.f32 %v3921_v20, %v3910_v54  ;;  %v1226_v59 = vsub.f32 %v3912_v61, %v3925_v35  ;;  %v179_v27 = vadd.f32 %v3934_v26, %v3910_v54 }
  0xab   :  { %4984 = vst [vmem:[#allocation12_spill] sm:$0xff] %v3915_v5  ;;  %1780 = vadd.xlane.f32.xlu0 %v1607_v11  ;;  %v1609_v16 = vadd.f32 %v1481_v38, %v993_v50  ;;  %v560_v1 = vmul.f32 %v2841_v52, %v304_v63  ;;  %v2082_v57 = vsub.f32 0.0, %v1707_v0  ;;  %v2340_v3 = vsel %vm2339_vm1, %v3863_v24, %v2336_v34  ;;  %v1705_v36 = vpop.xlane.xlu1 %1704 }
  0xac   :  { %v180_v63 = vadd.f32 %v3739_v39, %v3910_v54  ;;  %v2344_v31 = vsel %vm2343_vm2, %v2342_v42, %v2340_v3  ;;  %v1228_v24 = vsub.f32 %v3912_v61, %v3743_v29  ;;  %v306_v50 = vadd.f32 1e-10, %v178_v43  ;;  %v3942_v42 = vld [vmem:[#allocation2 + $0x8] sm:$0xff]  ;;  %v1703_v11 = vpop.xlane.xlu0 %1702  ;;  %v3957_v3 = vld [vmem:[#allocation7 + $0x18] sm:$0xff] }
  0xad   :  { %1784 = vadd.xlane.f32.xlu2 %v1609_v16  ;;  %v688_v9 = vsub.f32 2.0, %v560_v1  ;;  %2842 = vlog2.f32 %v178_v43  ;;  %v3938_v2 = vmul.f32 %v1226_v59, %v1226_v59  ;;  %v307_v33 = vadd.f32 1e-10, %v179_v27  ;;  %4985 = vst [vmem:[#allocation15_spill] sm:$0xff] %v3957_v3 }
  0xae   :  { %v308_v62 = vadd.f32 1e-10, %v180_v63  ;;  %2844 = vlog2.f32 %v180_v63  ;;  %v3940_v39 = vmul.f32 %v1228_v24, %v1228_v24  ;;  %v1227_v29 = vsub.f32 %v3912_v61, %v3942_v42 }
  0xaf   :  { %v816_v49 = vmul.f32 %v2841_v52, %v688_v9  ;;  %2846 = vrcp.f32 %v306_v50  ;;  %v3947_v40 = vperm.slane %v2082_v57, %v3904_v22  ;;  %v2081_v47 = vsub.f32 0.0, %v1705_v36 }
  0xb0   :  { %2848 = vrcp.f32 %v308_v62  ;;  %v2348_v58 = vsel %vm2347_vm3, %v3860_v30, %v2344_v31  ;;  %v3952_v52 = vmul.f32 %v1227_v29, %v1227_v29  ;;  %v2080_v34 = vsub.f32 0.0, %v1703_v11  ;;  %v3961_v30 = vld [vmem:[#allocation2 + $0x18] sm:$0xff] }
  0xb1   :  { %v1480_v38 = vmul.f32 %v3880_v10, %v816_v49  ;;  %2850 = vrcp.f32 %v307_v33  ;;  %v2358_v0 = vperm.slane %v2081_v47, %v3907_v23  ;;  %v2352_v16 = vsel %vm2351_vm4, %v3890_v28, %v2348_v58  ;;  %4986 = vst [vmem:[#allocation16_spill] sm:$0xff] %v3961_v30 }
  0xb2   :  { %2852 = vlog2.f32 %v179_v27  ;;  %v181_v10 = vadd.f32 %v3957_v3, %v3910_v54  ;;  %v1229_v43 = vsub.f32 %v3912_v61, %v3961_v30  ;;  %v183_v59 = vadd.f32 %v3769_v8, %v3910_v54 }
  0xb3   :  { %v1608_v1 = vadd.f32 %v1480_v38, %v991_v25  ;;  %v2843_v57 = vpop.eup %2842  ;;  %v1231_v28 = vsub.f32 %v3912_v61, %v3777_v56  ;;  %v2354_v9 = vperm.slane %v2080_v34, %v3915_v5  ;;  %v182_v31 = vadd.f32 %v3753_v45, %v3910_v54 }
  0xb4   :  { %v2845_v25 = vpop.eup %2844  ;;  %v995_v63 = vmul.f32 0.6931472, %v2843_v57  ;;  %v1230_v24 = vsub.f32 %v3912_v61, %v3757_v6  ;;  %v309_v49 = vadd.f32 1e-10, %v181_v10  ;;  %2854 = vlog2.f32 %v181_v10 }
  0xb5   :  { %1782 = vadd.xlane.f32.xlu1 %v1608_v1  ;;  %v2847_v27 = vpop.eup %2846  ;;  %v999_v36 = vmul.f32 0.6931472, %v2845_v25  ;;  %v3974_v29 = vmul.f32 %v1229_v43, %v1229_v43  ;;  %v2356_v56 = vsel %vm2355_vm5, %v2354_v9, %v2352_v16  ;;  %v311_v11 = vadd.f32 1e-10, %v183_v59  ;;  %v1711_v43 = vpop.xlane.xlu1 %1710 }
  0xb6   :  { %v2849_v8 = vpop.eup %2848  ;;  %v562_v47 = vmul.f32 %v2847_v27, %v306_v50  ;;  %2856 = vlog2.f32 %v183_v59  ;;  %v2360_v1 = vsel %vm2359_vm6, %v2358_v0, %v2356_v56  ;;  %v3978_v45 = vmul.f32 %v1231_v28, %v1231_v28  ;;  %v1713_v0 = vpop.xlane.xlu2 %1712 }
  0xb7   :  { %v2851_v38 = vpop.eup %2850  ;;  %v564_v58 = vmul.f32 %v2849_v8, %v308_v62  ;;  %2858 = vrcp.f32 %v309_v49  ;;  %v310_v10 = vadd.f32 1e-10, %v182_v31  ;;  %v3980_v50 = vmul.f32 %v1230_v24, %v1230_v24 }
  0xb8   :  { %v2853_v6 = vpop.eup %2852  ;;  %v690_v34 = vsub.f32 2.0, %v562_v47  ;;  %v563_v57 = vmul.f32 %v2851_v38, %v307_v33  ;;  %2860 = vrcp.f32 %v311_v11  ;;  %v3983_v62 = vadd.s32 4294967208, %v3840_v32 }
  0xb9   :  { %v692_v25 = vsub.f32 2.0, %v564_v58  ;;  %v997_v22 = vmul.f32 0.6931472, %v2853_v6  ;;  %2862 = vlog2.f32 %v182_v31  ;;  %v2085_v56 = vsub.f32 0.0, %v1713_v0 }
  0xba   :  { %v818_v16 = vmul.f32 %v2847_v27, %v690_v34  ;;  %v691_v59 = vsub.f32 2.0, %v563_v57  ;;  %2864 = vrcp.f32 %v310_v10  ;;  %4987 = vst [vmem:[#allocation17_spill] sm:$0xff] %v3983_v62  ;;  %v2855_v28 = vpop.eup %2854  ;;  %v3986_v33 = vadd.s32 4294967216, %v3840_v32 }
  0xbb   :  { %v820_v9 = vmul.f32 %v2849_v8, %v692_v25  ;;  %v2084_v47 = vsub.f32 0.0, %v1711_v43  ;;  %v1001_v24 = vmul.f32 0.6931472, %v2855_v28  ;;  %v3991_v57 = vperm.slane %v2085_v56, %v3983_v62  ;;  %v1709_v25 = vpop.xlane.xlu0 %1708 }
  0xbc   :  { %4988 = vst [vmem:[#allocation18_spill] sm:$0xff] %v3986_v33  ;;  %v2857_v30 = vpop.eup %2856  ;;  %v1482_v58 = vmul.f32 %v3938_v2, %v818_v16  ;;  %v819_v31 = vmul.f32 %v2851_v38, %v691_v59  ;;  %v2364_v2 = vsel %vm2363_vm7, %v3947_v40, %v2360_v1  ;;  %v184_v40 = vadd.f32 %v3763_v60, %v3910_v54 }
  0xbd   :  { %v2859_v27 = vpop.eup %2858  ;;  %v1484_v6 = vmul.f32 %v3940_v39, %v820_v9  ;;  %v1005_v34 = vmul.f32 0.6931472, %v2857_v30  ;;  %v2370_v8 = vperm.slane %v2084_v47, %v3986_v33  ;;  %v3998_v39 = vadd.s32 4294967224, %v3840_v32 }
  0xbe   :  { %v2861_v0 = vpop.eup %2860  ;;  %v1610_v3 = vadd.f32 %v1482_v58, %v995_v63  ;;  %v1483_v43 = vmul.f32 %v3952_v52, %v819_v31  ;;  %v565_v5 = vmul.f32 %v2859_v27, %v309_v49  ;;  %v2083_v49 = vsub.f32 0.0, %v1709_v25 }
  0xbf   :  { %v2863_v38 = vpop.eup %2862  ;;  %v1612_v16 = vadd.f32 %v1484_v6, %v999_v36  ;;  %v567_v59 = vmul.f32 %v2861_v0, %v311_v11  ;;  %4989 = vst [vmem:[#allocation19_spill] sm:$0xff] %v3998_v39  ;;  %v4002_v11 = vld [vmem:[#allocation2 + $0x30] sm:$0xff]  ;;  %v312_v58 = vadd.f32 1e-10, %v184_v40  ;;  %2866 = vlog2.f32 %v184_v40 }
  0xc0   :  { %v2865_v30 = vpop.eup %2864  ;;  %1786 = vadd.xlane.f32.xlu0 %v1610_v3  ;;  %v1611_v28 = vadd.f32 %v1483_v43, %v997_v22  ;;  %v693_v9 = vsub.f32 2.0, %v565_v5  ;;  %v1003_v56 = vmul.f32 0.6931472, %v2863_v38  ;;  %v1232_v1 = vsub.f32 %v3912_v61, %v4002_v11  ;;  %v1717_v38 = vpop.xlane.xlu1 %1716 }
  0xc1   :  { %1790 = vadd.xlane.f32.xlu2 %v1612_v16  ;;  %v695_v63 = vsub.f32 2.0, %v567_v59  ;;  %v566_v52 = vmul.f32 %v2865_v30, %v310_v10  ;;  %v186_v22 = vadd.f32 %v3799_v48, %v3910_v54  ;;  %v1234_v5 = vsub.f32 %v3912_v61, %v3803_v37 }
  0xc2   :  { %1788 = vadd.xlane.f32.xlu1 %v1611_v28  ;;  %v821_v36 = vmul.f32 %v2859_v27, %v693_v9  ;;  %v2366_v10 = vperm.slane %v2083_v49, %v3998_v39  ;;  %v4012_v31 = vmul.f32 %v1232_v1, %v1232_v1  ;;  %2868 = vrcp.f32 %v312_v58  ;;  %v1719_v28 = vpop.xlane.xlu2 %1718 }
  0xc3   :  { %v823_v3 = vmul.f32 %v2861_v0, %v695_v63  ;;  %v694_v47 = vsub.f32 2.0, %v566_v52  ;;  %v314_v27 = vadd.f32 1e-10, %v186_v22  ;;  %v4017_v0 = vmul.f32 %v1234_v5, %v1234_v5 }
  0xc4   :  { %v1485_v60 = vmul.f32 %v3974_v29, %v821_v36  ;;  %v2368_v43 = vsel %vm2367_vm8, %v2366_v10, %v2364_v2  ;;  %v185_v59 = vadd.f32 %v3781_v13, %v3910_v54  ;;  %v1233_v2 = vsub.f32 %v3912_v61, %v3787_v55  ;;  %v4039_v10 = vld [vmem:[#allocation7 + $0x48] sm:$0xff] }
  0xc5   :  { %v1487_v6 = vmul.f32 %v3978_v45, %v823_v3  ;;  %v822_v25 = vmul.f32 %v2865_v30, %v694_v47  ;;  %v2372_v37 = vsel %vm2371_vm9, %v2370_v8, %v2368_v43  ;;  %2870 = vrcp.f32 %v314_v27  ;;  %v1715_v45 = vpop.xlane.xlu0 %1714  ;;  %v2867_v63 = vpop.eup %2866 }
  0xc6   :  { %v1613_v48 = vadd.f32 %v1485_v60, %v1001_v24  ;;  %2872 = vlog2.f32 %v186_v22  ;;  %v4025_v24 = vadd.s32 4294967184, %v3840_v32  ;;  %v2088_v8 = vsub.f32 0.0, %v1719_v28 }
  0xc7   :  { %v1615_v16 = vadd.f32 %v1487_v6, %v1005_v34  ;;  %v1486_v29 = vmul.f32 %v3980_v50, %v822_v25  ;;  %v4028_v30 = vadd.s32 4294967192, %v3840_v32  ;;  %v313_v50 = vadd.f32 1e-10, %v185_v59  ;;  %v4043_v6 = vld [vmem:[#allocation2 + $0x48] sm:$0xff] }
  0xc8   :  { %1792 = vadd.xlane.f32.xlu0 %v1613_v48  ;;  %4990 = vst [vmem:[#allocation20_spill] sm:$0xff] %v4025_v24  ;;  %2874 = vlog2.f32 %v185_v59  ;;  %v2087_v9 = vsub.f32 0.0, %v1717_v38  ;;  %v4030_v13 = vmul.f32 %v1233_v2, %v1233_v2  ;;  %v2386_v52 = vperm.slane %v2088_v8, %v4025_v24  ;;  %v2869_v49 = vpop.eup %2868 }
  0xc9   :  { %4991 = vst [vmem:[#allocation21_spill] sm:$0xff] %v4028_v30  ;;  %1796 = vadd.xlane.f32.xlu2 %v1615_v16  ;;  %v1614_v34 = vadd.f32 %v1486_v29, %v1003_v56  ;;  %v4034_v55 = vadd.s32 4294967200, %v3840_v32  ;;  %v1007_v40 = vmul.f32 0.6931472, %v2867_v63  ;;  %2876 = vrcp.f32 %v313_v50 }
  0xca   :  { %v2382_v36 = vperm.slane %v2087_v9, %v4028_v30  ;;  %v2376_v56 = vsel %vm2375_vm10, %v3991_v57, %v2372_v37  ;;  %v568_v22 = vmul.f32 %v2869_v49, %v312_v58  ;;  %v2086_v5 = vsub.f32 0.0, %v1715_v45 }
  0xcb   :  { %4992 = vst [vmem:[#allocation22_spill] sm:$0xff] %v4034_v55  ;;  %1794 = vadd.xlane.f32.xlu1 %v1614_v34  ;;  %v2871_v1 = vpop.eup %2870  ;;  %v187_v60 = vadd.f32 %v4039_v10, %v3910_v54  ;;  %v1235_v25 = vsub.f32 %v3912_v61, %v4043_v6  ;;  %v189_v57 = vadd.f32 %v3826_v14, %v3910_v54  ;;  %vm2391_vm14 = vcmask 1048512  }
  0xcc   :  { %v2873_v3 = vpop.eup %2872  ;;  %v570_v47 = vmul.f32 %v2871_v1, %v314_v27  ;;  %v696_v43 = vsub.f32 2.0, %v568_v22  ;;  %v2378_v48 = vperm.slane %v2086_v5, %v4034_v55  ;;  %v1237_v27 = vsub.f32 %v3912_v61, %v3830_v17 }
  0xcd   :  { %v1011_v58 = vmul.f32 0.6931472, %v2873_v3  ;;  %v315_v16 = vadd.f32 1e-10, %v187_v60  ;;  %2878 = vlog2.f32 %v187_v60  ;;  %v4052_v29 = vmul.f32 %v1235_v25, %v1235_v25  ;;  %v1721_v63 = vpop.xlane.xlu0 %1720 }
  0xce   :  { %v2875_v37 = vpop.eup %2874  ;;  %v698_v38 = vsub.f32 2.0, %v570_v47  ;;  %v824_v59 = vmul.f32 %v2869_v49, %v696_v43  ;;  %v2380_v45 = vsel %vm2379_vm11, %v2378_v48, %v2376_v56  ;;  %v317_v2 = vadd.f32 1e-10, %v189_v57 }
  0xcf   :  { %v1009_v28 = vmul.f32 0.6931472, %v2875_v37  ;;  %v2877_v8 = vpop.eup %2876  ;;  %v2384_v34 = vsel %vm4959_vm12, %v2382_v36, %v2380_v45  ;;  %2880 = vrcp.f32 %v315_v16  ;;  %v4056_v9 = vmul.f32 %v1237_v27, %v1237_v27  ;;  %v1723_v36 = vpop.xlane.xlu1 %1722  ;;  %v4070_v37 = vld [vmem:[#allocation7 + $0x60] sm:$0xff]  ;;  %v4075_v45 = vld [vmem:[#allocation2 + $0x60] sm:$0xff] }
  0xd0   :  { %v826_v14 = vmul.f32 %v2871_v1, %v698_v38  ;;  %v1488_v17 = vmul.f32 %v4012_v31, %v824_v59  ;;  %v569_v22 = vmul.f32 %v2877_v8, %v313_v50  ;;  %2882 = vrcp.f32 %v317_v2  ;;  %v1725_v1 = vpop.xlane.xlu2 %1724 }
  0xd1   :  { %v188_v5 = vadd.f32 %v3807_v51, %v3910_v54  ;;  %2884 = vlog2.f32 %v189_v57  ;;  %v1236_v56 = vsub.f32 %v3912_v61, %v3814_v44  ;;  %v2388_v43 = vsel %vm2387_vm13, %v2386_v52, %v2384_v34 }
  0xd2   :  { %v1490_v49 = vmul.f32 %v4017_v0, %v826_v14  ;;  %v1616_v3 = vadd.f32 %v1488_v17, %v1007_v40  ;;  %v697_v47 = vsub.f32 2.0, %v569_v22  ;;  %v4068_v51 = vadd.s32 4294967176, %v3840_v32 }
  0xd3   :  { %v316_v60 = vadd.f32 1e-10, %v188_v5  ;;  %2886 = vlog2.f32 %v188_v5  ;;  %v2879_v25 = vpop.eup %2878  ;;  %v4064_v50 = vmul.f32 %v1236_v56, %v1236_v56  ;;  %v2089_v40 = vsub.f32 0.0, %v1721_v63 }
  0xd4   :  { %v1618_v31 = vadd.f32 %v1490_v49, %v1011_v58  ;;  %1798 = vadd.xlane.f32.xlu0 %v1616_v3  ;;  %v825_v0 = vmul.f32 %v2877_v8, %v697_v47  ;;  %v1013_v57 = vmul.f32 0.6931472, %v2879_v25  ;;  %v2091_v48 = vsub.f32 0.0, %v1725_v1 }
  0xd5   :  { %2888 = vrcp.f32 %v316_v60  ;;  %v2881_v44 = vpop.eup %2880  ;;  %v2090_v27 = vsub.f32 0.0, %v1723_v36  ;;  %v190_v58 = vadd.f32 %v4070_v37, %v3910_v54  ;;  %v1238_v8 = vsub.f32 %v3912_v61, %v4075_v45  ;;  %v1727_v25 = vpop.xlane.xlu0 %1726 }
  0xd6   :  { %1802 = vadd.xlane.f32.xlu2 %v1618_v31  ;;  %v2883_v38 = vpop.eup %2882  ;;  %v1489_v52 = vmul.f32 %v4030_v13, %v825_v0  ;;  %v571_v59 = vmul.f32 %v2881_v44, %v315_v16  ;;  %v192_v14 = vadd.f32 %v3869_v18, %v3910_v54  ;;  %v2390_v17 = vperm.slane %v2089_v40, %v4068_v51 }
  0xd7   :  { %v2885_v34 = vpop.eup %2884  ;;  %v573_v63 = vmul.f32 %v2883_v38, %v317_v2  ;;  %v2394_v22 = vperm.slane %v2091_v48, %v3887_v41  ;;  %v2393_v5 = vperm.slane %v2090_v27, %v3840_v32  ;;  %v318_v1 = vadd.f32 1e-10, %v190_v58 }
  0xd8   :  { %v1617_v56 = vadd.f32 %v1489_v52, %v1009_v28  ;;  %v699_v13 = vsub.f32 2.0, %v571_v59  ;;  %v1017_v16 = vmul.f32 0.6931472, %v2885_v34  ;;  %v4085_v47 = vsel %vm2391_vm14, %v2390_v17, %v2388_v43  ;;  %v1731_v52 = vpop.xlane.xlu2 %1730  ;;  %v1729_v59 = vpop.xlane.xlu1 %1728 }
  0xd9   :  { %v2887_v49 = vpop.eup %2886  ;;  %v701_v36 = vsub.f32 2.0, %v573_v63  ;;  %v2395_v18 = vsel %vm2335_vm0, %v2394_v22, %v2393_v5  ;;  %2890 = vrcp.f32 %v318_v1  ;;  %v4088_v0 = vmul.f32 %v1238_v8, %v1238_v8  ;;  %v4095_v63 = vld [vmem:[#allocation2 + $0x68] sm:$0xff] }
  0xda   :  { %v1015_v3 = vmul.f32 0.6931472, %v2887_v49  ;;  %1800 = vadd.xlane.f32.xlu1 %v1617_v56  ;;  %v827_v31 = vmul.f32 %v2881_v44, %v699_v13  ;;  %v320_v40 = vadd.f32 1e-10, %v192_v14  ;;  %2892 = vlog2.f32 %v190_v58  ;;  %v4102_v13 = vld [vmem:[#allocation7 + $0x78] sm:$0xff] }
  0xdb   :  { %v2889_v2 = vpop.eup %2888  ;;  %v829_v48 = vmul.f32 %v2883_v38, %v701_v36  ;;  %v1240_v27 = vsub.f32 %v3912_v61, %v3873_v19  ;;  %v191_v34 = vadd.f32 %v3836_v53, %v3910_v54  ;;  %v1239_v44 = vsub.f32 %v3912_v61, %v4095_v63 }
  0xdc   :  { %v572_v28 = vmul.f32 %v2889_v2, %v316_v60  ;;  %v1491_v43 = vmul.f32 %v4052_v29, %v827_v31  ;;  %2894 = vrcp.f32 %v320_v40  ;;  %v2092_v5 = vsub.f32 0.0, %v1727_v25 }
  0xdd   :  { %v1493_v38 = vmul.f32 %v4056_v9, %v829_v48  ;;  %2896 = vlog2.f32 %v192_v14  ;;  %v1368_v58 = vmul.f32 %v1240_v27, %v1240_v27  ;;  %v319_v19 = vadd.f32 1e-10, %v191_v34  ;;  %v4106_v14 = vld [vmem:[#allocation2 + $0x78] sm:$0xff] }
  0xde   :  { %v700_v60 = vsub.f32 2.0, %v572_v28  ;;  %v1619_v8 = vadd.f32 %v1491_v43, %v1013_v57  ;;  %2898 = vlog2.f32 %v191_v34  ;;  %v4100_v17 = vmul.f32 %v1239_v44, %v1239_v44  ;;  %v1733_v44 = vpop.xlane.xlu0 %1732 }
  0xdf   :  { %v1621_v29 = vadd.f32 %v1493_v38, %v1017_v16  ;;  %v2094_v49 = vsub.f32 0.0, %v1731_v52  ;;  %v2891_v53 = vpop.eup %2890  ;;  %2900 = vrcp.f32 %v319_v19  ;;  %v2093_v56 = vsub.f32 0.0, %v1729_v59 }
  0xe0   :  { %v828_v22 = vmul.f32 %v2889_v2, %v700_v60  ;;  %1804 = vadd.xlane.f32.xlu0 %v1619_v8  ;;  %v193_v9 = vadd.f32 %v4102_v13, %v3910_v54  ;;  %v1241_v57 = vsub.f32 %v3912_v61, %v4106_v14  ;;  %v2893_v36 = vpop.eup %2892  ;;  %v574_v25 = vmul.f32 %v2891_v53, %v318_v1 }
  0xe1   :  { %1808 = vadd.xlane.f32.xlu2 %v1621_v29  ;;  %v2396_v2 = vperm.slane %v2092_v5, %v3851_v46  ;;  %v2400_v31 = vperm.slane %v2094_v49, %v3848_v7  ;;  %v1019_v28 = vmul.f32 0.6931472, %v2893_v36  ;;  %v2398_v27 = vperm.slane %v2093_v56, %v3883_v15  ;;  %v1737_v49 = vpop.xlane.xlu2 %1736  ;;  %v1735_v56 = vpop.xlane.xlu1 %1734 }
  0xe2   :  { %v1492_v16 = vmul.f32 %v4064_v50, %v828_v22  ;;  %v2895_v48 = vpop.eup %2894  ;;  %v321_v52 = vadd.f32 1e-10, %v193_v9  ;;  %2902 = vlog2.f32 %v193_v9  ;;  %v702_v43 = vsub.f32 2.0, %v574_v25 }
  0xe3   :  { %v2897_v54 = vpop.eup %2896  ;;  %v576_v34 = vmul.f32 %v2895_v48, %v320_v40  ;;  %v2397_v61 = vsel %vm2339_vm1, %v2396_v2, %v2395_v18  ;;  %v1369_v60 = vmul.f32 %v1241_v57, %v1241_v57  ;;  %v110_v5 = vrot.slane %v3894_v12, 4 }
  0xe4   :  { %v1620_v59 = vadd.f32 %v1492_v16, %v1015_v3  ;;  %v2899_v38 = vpop.eup %2898  ;;  %v1023_v50 = vmul.f32 0.6931472, %v2897_v54  ;;  %v2399_v1 = vsel %vm2343_vm2, %v2398_v27, %v2397_v61  ;;  %2904 = vrcp.f32 %v321_v52 }
  0xe5   :  { %v830_v8 = vmul.f32 %v2891_v53, %v702_v43  ;;  %v704_v29 = vsub.f32 2.0, %v576_v34  ;;  %v1021_v22 = vmul.f32 0.6931472, %v2899_v38  ;;  %v2901_v3 = vpop.eup %2900  ;;  %v1158_v40 = vrot.slane %v3900_v21, 4 }
  0xe6   :  { %1806 = vadd.xlane.f32.xlu1 %v1620_v59  ;;  %v2095_v9 = vsub.f32 0.0, %v1733_v44  ;;  %v2401_v18 = vsel %vm2347_vm3, %v2400_v31, %v2399_v1  ;;  %v2097_v36 = vsub.f32 0.0, %v1737_v49  ;;  %v575_v2 = vmul.f32 %v2901_v3, %v319_v19 }
  0xe7   :  { %v1494_v16 = vmul.f32 %v4088_v0, %v830_v8  ;;  %v832_v25 = vmul.f32 %v2895_v48, %v704_v29  ;;  %v4120_v57 = vperm.slane %v110_v5, 0  ;;  %v4122_v27 = vperm.slane %v1158_v40, 0 }
  0xe8   :  { %v2903_v53 = vpop.eup %2902  ;;  %v2402_v12 = vperm.slane %v2095_v9, %v3878_v4  ;;  %v4126_v54 = vperm.slane %v2097_v36, %v3907_v23  ;;  %v2096_v59 = vsub.f32 0.0, %v1735_v56  ;;  %v703_v34 = vsub.f32 2.0, %v575_v2  ;;  %v4147_v56 = vld [vmem:[#allocation2 + $0x10] sm:$0xff]  ;;  %v1739_v36 = vpop.xlane.xlu0 %1738 }
  0xe9   :  { %v1622_v21 = vadd.f32 %v1494_v16, %v1019_v28  ;;  %v1496_v43 = vmul.f32 %v1368_v58, %v832_v25  ;;  %v1025_v31 = vmul.f32 0.6931472, %v2903_v53  ;;  %v195_v0 = vadd.f32 %v3934_v26, %v4120_v57 }
  0xea   :  { %v2905_v61 = vpop.eup %2904  ;;  %v1243_v19 = vsub.f32 %v4122_v27, %v3942_v42  ;;  %v194_v48 = vadd.f32 %v3921_v20, %v4120_v57  ;;  %v1242_v44 = vsub.f32 %v4122_v27, %v3925_v35  ;;  %v831_v1 = vmul.f32 %v2901_v3, %v703_v34  ;;  %v4993_v35 = vld [vmem:[#allocation12_spill] sm:$0xff] }
  0xeb   :  { %1810 = vadd.xlane.f32.xlu0 %v1622_v21  ;;  %v1624_v38 = vadd.f32 %v1496_v43, %v1023_v50  ;;  %v577_v28 = vmul.f32 %v2905_v61, %v321_v52  ;;  %v2403_v58 = vsel %vm2351_vm4, %v2402_v12, %v2401_v18  ;;  %v323_v8 = vadd.f32 1e-10, %v195_v0  ;;  %v4143_v50 = vld [vmem:[#allocation7 + $0x10] sm:$0xff]  ;;  %v4995_v43 = vld [vmem:[#allocation15_spill] sm:$0xff] }
  0xec   :  { %2906 = vlog2.f32 %v195_v0  ;;  %v4137_v29 = vmul.f32 %v1243_v19, %v1243_v19  ;;  %v322_v26 = vadd.f32 1e-10, %v194_v48  ;;  %v1495_v42 = vmul.f32 %v4100_v17, %v831_v1  ;;  %v4151_v17 = vld [vmem:[#allocation7 + $0x20] sm:$0xff]  ;;  %v1741_v1 = vpop.xlane.xlu1 %1740 }
  0xed   :  { %1814 = vadd.xlane.f32.xlu2 %v1624_v38  ;;  %v705_v5 = vsub.f32 2.0, %v577_v28  ;;  %2908 = vlog2.f32 %v194_v48  ;;  %v4140_v20 = vmul.f32 %v1242_v44, %v1242_v44  ;;  %v2404_v49 = vperm.slane %v2096_v59, %v4993_v35  ;;  %v4158_v59 = vld [vmem:[#allocation2 + $0x20] sm:$0xff] }
  0xee   :  { %2910 = vrcp.f32 %v323_v8  ;;  %v196_v52 = vadd.f32 %v4143_v50, %v4120_v57  ;;  %v1244_v3 = vsub.f32 %v4122_v27, %v4147_v56  ;;  %v1623_v40 = vadd.f32 %v1495_v42, %v1021_v22  ;;  %4994 = vst [vmem:[#allocation23_spill] sm:$0xff] %v4158_v59 }
  0xef   :  { %v833_v9 = vmul.f32 %v2905_v61, %v705_v5  ;;  %2912 = vrcp.f32 %v322_v26  ;;  %v198_v18 = vadd.f32 %v4151_v17, %v4120_v57  ;;  %v2405_v16 = vsel %vm2355_vm5, %v2404_v49, %v2403_v58  ;;  %v4996_v61 = vld [vmem:[#allocation16_spill] sm:$0xff]  ;;  %v1743_v49 = vpop.xlane.xlu2 %1742 }
  0xf0   :  { %v324_v25 = vadd.f32 1e-10, %v196_v52  ;;  %2914 = vlog2.f32 %v196_v52  ;;  %v4156_v2 = vmul.f32 %v1244_v3, %v1244_v3  ;;  %1812 = vadd.xlane.f32.xlu1 %v1623_v40  ;;  %v1246_v22 = vsub.f32 %v4122_v27, %v4158_v59  ;;  %v4182_v59 = vld [vmem:[#allocation2 + $0x28] sm:$0xff] }
  0xf1   :  { %v1497_v53 = vmul.f32 %v1369_v60, %v833_v9  ;;  %v326_v12 = vadd.f32 1e-10, %v198_v18  ;;  %2916 = vlog2.f32 %v198_v18  ;;  %v197_v34 = vadd.f32 %v4995_v43, %v4120_v57  ;;  %v4997_v9 = vld [vmem:[#allocation14_spill] sm:$0xff]  ;;  %4999 = vst [vmem:[#allocation16_spill] sm:$0xff] %v4182_v59 }
  0xf2   :  { %v2907_v21 = vpop.eup %2906  ;;  %2918 = vrcp.f32 %v324_v25  ;;  %v1245_v0 = vsub.f32 %v4122_v27, %v4996_v61  ;;  %v2098_v19 = vsub.f32 0.0, %v1739_v36  ;;  %v4166_v60 = vmul.f32 %v1246_v22, %v1246_v22 }
  0xf3   :  { %v2909_v48 = vpop.eup %2908  ;;  %v1625_v44 = vadd.f32 %v1497_v53, %v1025_v31  ;;  %v1029_v38 = vmul.f32 0.6931472, %v2907_v21  ;;  %2920 = vrcp.f32 %v326_v12  ;;  %v325_v42 = vadd.f32 1e-10, %v197_v34  ;;  %v4173_v21 = vld [vmem:[#allocation7 + $0x28] sm:$0xff] }
  0xf4   :  { %v2911_v28 = vpop.eup %2910  ;;  %v1027_v58 = vmul.f32 0.6931472, %v2909_v48  ;;  %2922 = vlog2.f32 %v197_v34  ;;  %v4168_v5 = vmul.f32 %v1245_v0, %v1245_v0  ;;  %v2407_v40 = vsel %vm2359_vm6, %v4126_v54, %v2405_v16  ;;  %4998 = vst [vmem:[#allocation15_spill] sm:$0xff] %v4173_v21 }
  0xf5   :  { %v2913_v52 = vpop.eup %2912  ;;  %1816 = vadd.xlane.f32.xlu0 %v1625_v44  ;;  %v579_v3 = vmul.f32 %v2911_v28, %v323_v8  ;;  %v2408_v31 = vperm.slane %v2098_v19, %v4997_v9  ;;  %v2100_v18 = vsub.f32 0.0, %v1743_v49  ;;  %2924 = vrcp.f32 %v325_v42 }
  0xf6   :  { %v2915_v36 = vpop.eup %2914  ;;  %v578_v53 = vmul.f32 %v2913_v52, %v322_v26  ;;  %v2099_v22 = vsub.f32 0.0, %v1741_v1  ;;  %v199_v43 = vadd.f32 %v4173_v21, %v4120_v57  ;;  %vm2610_vm15 = vcmask 1041409  }
  0xf7   :  { %v2917_v34 = vpop.eup %2916  ;;  %v707_v61 = vsub.f32 2.0, %v579_v3  ;;  %v1031_v0 = vmul.f32 0.6931472, %v2915_v36  ;;  %v2409_v8 = vsel %vm2363_vm7, %v2408_v31, %v2407_v40  ;;  %v4179_v48 = vperm.slane %v2100_v18, %v3986_v33 }
  0xf8   :  { %v2919_v54 = vpop.eup %2918  ;;  %v706_v16 = vsub.f32 2.0, %v578_v53  ;;  %v1035_v19 = vmul.f32 0.6931472, %v2917_v34  ;;  %v2410_v26 = vperm.slane %v2099_v22, %v3998_v39  ;;  %v327_v44 = vadd.f32 1e-10, %v199_v43 }
  0xf9   :  { %v2921_v1 = vpop.eup %2920  ;;  %v835_v49 = vmul.f32 %v2911_v28, %v707_v61  ;;  %v580_v9 = vmul.f32 %v2919_v54, %v324_v25  ;;  %2926 = vlog2.f32 %v199_v43  ;;  %v1247_v3 = vsub.f32 %v4122_v27, %v4182_v59  ;;  %v4191_v61 = vld [vmem:[#allocation7 + $0x38] sm:$0xff] }
  0xfa   :  { %v2923_v36 = vpop.eup %2922  ;;  %v834_v40 = vmul.f32 %v2913_v52, %v706_v16  ;;  %v582_v31 = vmul.f32 %v2921_v1, %v326_v12  ;;  %v2411_v18 = vsel %vm2367_vm8, %v2410_v26, %v2409_v8  ;;  %2928 = vrcp.f32 %v327_v44  ;;  %5000 = vst [vmem:[#allocation24_spill] sm:$0xff] %v4191_v61  ;;  %v4195_v52 = vld [vmem:[#allocation2 + $0x38] sm:$0xff] }
  0xfb   :  { %v1499_v53 = vmul.f32 %v4137_v29, %v835_v49  ;;  %v708_v34 = vsub.f32 2.0, %v580_v9  ;;  %v1033_v22 = vmul.f32 0.6931472, %v2923_v36  ;;  %v4188_v33 = vmul.f32 %v1247_v3, %v1247_v3  ;;  %v2925_v28 = vpop.eup %2924  ;;  %v4199_v16 = vld [vmem:[#allocation7 + $0x30] sm:$0xff]  ;;  %v1745_v36 = vpop.xlane.xlu0 %1744 }
  0xfc   :  { %v1498_v25 = vmul.f32 %v4140_v20, %v834_v40  ;;  %v710_v43 = vsub.f32 2.0, %v582_v31  ;;  %v201_v59 = vadd.f32 %v4191_v61, %v4120_v57  ;;  %v1249_v12 = vsub.f32 %v4122_v27, %v4195_v52 }
  0xfd   :  { %v1627_v8 = vadd.f32 %v1499_v53, %v1029_v38  ;;  %v836_v29 = vmul.f32 %v2919_v54, %v708_v34  ;;  %v581_v9 = vmul.f32 %v2925_v28, %v325_v42  ;;  %v200_v26 = vadd.f32 %v4199_v16, %v4120_v57 }
  0xfe   :  { %v1626_v20 = vadd.f32 %v1498_v25, %v1027_v58  ;;  %v838_v49 = vmul.f32 %v2921_v1, %v710_v43  ;;  %v329_v3 = vadd.f32 1e-10, %v201_v59  ;;  %2930 = vlog2.f32 %v201_v59  ;;  %v1747_v25 = vpop.xlane.xlu1 %1746 }
  0xff   :  { %v2927_v40 = vpop.eup %2926  ;;  %1820 = vadd.xlane.f32.xlu2 %v1627_v8  ;;  %v1500_v31 = vmul.f32 %v4156_v2, %v836_v29  ;;  %v709_v61 = vsub.f32 2.0, %v581_v9  ;;  %v4204_v21 = vmul.f32 %v1249_v12, %v1249_v12  ;;  %v328_v38 = vadd.f32 1e-10, %v200_v26  ;;  %v1749_v8 = vpop.xlane.xlu2 %1748 }
 0x100   :  { %v2929_v54 = vpop.eup %2928  ;;  %1818 = vadd.xlane.f32.xlu1 %v1626_v20  ;;  %v1502_v42 = vmul.f32 %v4166_v60, %v838_v49  ;;  %v1037_v53 = vmul.f32 0.6931472, %v2927_v40  ;;  %2932 = vrcp.f32 %v329_v3  ;;  %v1248_v58 = vsub.f32 %v4122_v27, %v4002_v11 }
 0x101   :  { %v1628_v1 = vadd.f32 %v1500_v31, %v1031_v0  ;;  %v837_v59 = vmul.f32 %v2925_v28, %v709_v61  ;;  %v583_v34 = vmul.f32 %v2929_v54, %v327_v44  ;;  %2934 = vrcp.f32 %v328_v38  ;;  %v4215_v28 = vld [vmem:[#allocation7 + $0x40] sm:$0xff]  ;;  %v4219_v61 = vld [vmem:[#allocation2 + $0x40] sm:$0xff] }
 0x102   :  { %v1630_v43 = vadd.f32 %v1502_v42, %v1035_v19  ;;  %2936 = vlog2.f32 %v200_v26  ;;  %v4209_v2 = vmul.f32 %v1248_v58, %v1248_v58  ;;  %v2101_v12 = vsub.f32 0.0, %v1745_v36 }
 0x103   :  { %1822 = vadd.xlane.f32.xlu0 %v1628_v1  ;;  %v1501_v29 = vmul.f32 %v4168_v5, %v837_v59  ;;  %v711_v60 = vsub.f32 2.0, %v583_v34  ;;  %v2413_v9 = vsel %vm2371_vm9, %v4179_v48, %v2411_v18  ;;  %v2103_v20 = vsub.f32 0.0, %v1749_v8 }
 0x104   :  { %v2931_v11 = vpop.eup %2930  ;;  %v2414_v0 = vperm.slane %v2101_v12, %v3983_v62  ;;  %v2102_v44 = vsub.f32 0.0, %v1747_v25  ;;  %v202_v19 = vadd.f32 %v4215_v28, %v4120_v57  ;;  %v1250_v26 = vsub.f32 %v4122_v27, %v4219_v61  ;;  %v4229_v25 = vld [vmem:[#allocation7 + $0x50] sm:$0xff] }
 0x105   :  { %v1629_v5 = vadd.f32 %v1501_v29, %v1033_v22  ;;  %v839_v49 = vmul.f32 %v2929_v54, %v711_v60  ;;  %v1041_v36 = vmul.f32 0.6931472, %v2931_v11  ;;  %v2418_v48 = vperm.slane %v2103_v20, %v4028_v30  ;;  %v4234_v29 = vld [vmem:[#allocation2 + $0x50] sm:$0xff] }
 0x106   :  { %v2933_v18 = vpop.eup %2932  ;;  %v2415_v40 = vsel %vm2375_vm10, %v2414_v0, %v2413_v9  ;;  %v2416_v31 = vperm.slane %v2102_v44, %v4034_v55  ;;  %v330_v42 = vadd.f32 1e-10, %v202_v19  ;;  %2938 = vlog2.f32 %v202_v19 }
 0x107   :  { %v2935_v58 = vpop.eup %2934  ;;  %1826 = vadd.xlane.f32.xlu2 %v1630_v43  ;;  %v1503_v1 = vmul.f32 %v4188_v33, %v839_v49  ;;  %v585_v59 = vmul.f32 %v2933_v18, %v329_v3  ;;  %v4227_v34 = vmul.f32 %v1250_v26, %v1250_v26  ;;  %v204_v22 = vadd.f32 %v4229_v25, %v4120_v57  ;;  %v1751_v33 = vpop.xlane.xlu0 %1750 }
 0x108   :  { %v2937_v54 = vpop.eup %2936  ;;  %1824 = vadd.xlane.f32.xlu1 %v1629_v5  ;;  %v584_v12 = vmul.f32 %v2935_v58, %v328_v38  ;;  %v2417_v8 = vsel %vm2379_vm11, %v2416_v31, %v2415_v40  ;;  %2940 = vrcp.f32 %v330_v42  ;;  %v1252_v43 = vsub.f32 %v4122_v27, %v4234_v29  ;;  %v1753_v31 = vpop.xlane.xlu1 %1752 }
 0x109   :  { %v1631_v3 = vadd.f32 %v1503_v1, %v1037_v53  ;;  %v713_v60 = vsub.f32 2.0, %v585_v59  ;;  %v1039_v9 = vmul.f32 0.6931472, %v2937_v54  ;;  %v332_v20 = vadd.f32 1e-10, %v204_v22 }
 0x10a   :  { %v712_v11 = vsub.f32 2.0, %v584_v12  ;;  %2942 = vlog2.f32 %v204_v22  ;;  %v4238_v0 = vmul.f32 %v1252_v43, %v1252_v43  ;;  %v203_v38 = vadd.f32 %v4039_v10, %v4120_v57 }
 0x10b   :  { %1828 = vadd.xlane.f32.xlu0 %v1631_v3  ;;  %v841_v44 = vmul.f32 %v2933_v18, %v713_v60  ;;  %2944 = vrcp.f32 %v332_v20  ;;  %v1251_v19 = vsub.f32 %v4122_v27, %v4043_v6  ;;  %v2104_v26 = vsub.f32 0.0, %v1751_v33  ;;  %v1755_v18 = vpop.xlane.xlu2 %1754  ;;  %v4254_v60 = vld [vmem:[#allocation7 + $0x58] sm:$0xff] }
 0x10c   :  { %v2939_v5 = vpop.eup %2938  ;;  %v840_v49 = vmul.f32 %v2935_v58, %v712_v11  ;;  %v331_v53 = vadd.f32 1e-10, %v203_v38  ;;  %2946 = vlog2.f32 %v203_v38  ;;  %v2419_v40 = vsel %vm4959_vm12, %v2418_v48, %v2417_v8  ;;  %v4258_v38 = vld [vmem:[#allocation2 + $0x58] sm:$0xff] }
 0x10d   :  { %v1505_v1 = vmul.f32 %v4204_v21, %v841_v44  ;;  %v1043_v59 = vmul.f32 0.6931472, %v2939_v5  ;;  %v4246_v22 = vmul.f32 %v1251_v19, %v1251_v19  ;;  %v2420_v10 = vperm.slane %v2104_v26, %v4025_v24 }
 0x10e   :  { %v2941_v54 = vpop.eup %2940  ;;  %v1504_v12 = vmul.f32 %v4209_v2, %v840_v49  ;;  %2948 = vrcp.f32 %v331_v53  ;;  %v2106_v6 = vsub.f32 0.0, %v1755_v18  ;;  %v2105_v48 = vsub.f32 0.0, %v1753_v31 }
 0x10f   :  { %v1633_v58 = vadd.f32 %v1505_v1, %v1041_v36  ;;  %v586_v43 = vmul.f32 %v2941_v54, %v330_v42  ;;  %v2421_v33 = vsel %vm2387_vm13, %v2420_v10, %v2419_v40  ;;  %v205_v11 = vadd.f32 %v4254_v60, %v4120_v57 }
 0x110   :  { %v2943_v8 = vpop.eup %2942  ;;  %v1632_v3 = vadd.f32 %v1504_v12, %v1039_v9  ;;  %v4252_v21 = vperm.slane %v2106_v6, %v3840_v32  ;;  %v1253_v2 = vsub.f32 %v4122_v27, %v4258_v38  ;;  %v2422_v19 = vperm.slane %v2105_v48, %v4068_v51  ;;  %v4263_v9 = vld [vmem:[#allocation7 + $0x68] sm:$0xff]  ;;  %v1757_v6 = vpop.xlane.xlu0 %1756 }
 0x111   :  { %v2945_v36 = vpop.eup %2944  ;;  %1832 = vadd.xlane.f32.xlu2 %v1633_v58  ;;  %v714_v42 = vsub.f32 2.0, %v586_v43  ;;  %v1047_v44 = vmul.f32 0.6931472, %v2943_v8  ;;  %v207_v26 = vadd.f32 %v4263_v9, %v4120_v57  ;;  %v333_v40 = vadd.f32 1e-10, %v205_v11 }
 0x112   :  { %v2947_v5 = vpop.eup %2946  ;;  %1830 = vadd.xlane.f32.xlu1 %v1632_v3  ;;  %v588_v49 = vmul.f32 %v2945_v36, %v332_v20  ;;  %2950 = vlog2.f32 %v205_v11  ;;  %v4267_v31 = vmul.f32 %v1253_v2, %v1253_v2  ;;  %v2423_v18 = vsel %vm2391_vm14, %v2422_v19, %v2421_v33 }
 0x113   :  { %v842_v1 = vmul.f32 %v2941_v54, %v714_v42  ;;  %v1045_v10 = vmul.f32 0.6931472, %v2947_v5  ;;  %v335_v12 = vadd.f32 1e-10, %v207_v26  ;;  %v4272_v48 = vsel %vm2610_vm15, %v2423_v18, %v4085_v47  ;;  %v1759_v47 = vpop.xlane.xlu1 %1758 }
 0x114   :  { %v2949_v58 = vpop.eup %2948  ;;  %v716_v43 = vsub.f32 2.0, %v588_v49  ;;  %5001 = vst [vmem:[#allocation25_spill] sm:$0xff] %v4272_v48  ;;  %2952 = vrcp.f32 %v333_v40  ;;  %v1255_v20 = vsub.f32 %v4122_v27, %v4095_v63  ;;  %v206_v54 = vadd.f32 %v4070_v37, %v4120_v57  ;;  %v1761_v63 = vpop.xlane.xlu2 %1760 }
 0x115   :  { %v1506_v8 = vmul.f32 %v4227_v34, %v842_v1  ;;  %v587_v3 = vmul.f32 %v2949_v58, %v331_v53  ;;  %2954 = vrcp.f32 %v335_v12  ;;  %v1254_v2 = vsub.f32 %v4122_v27, %v4075_v45 }
 0x116   :  { %v844_v33 = vmul.f32 %v2945_v36, %v716_v43  ;;  %2956 = vlog2.f32 %v207_v26  ;;  %v4279_v11 = vmul.f32 %v1255_v20, %v1255_v20  ;;  %v334_v5 = vadd.f32 1e-10, %v206_v54 }
 0x117   :  { %v1634_v42 = vadd.f32 %v1506_v8, %v1043_v59  ;;  %v715_v19 = vsub.f32 2.0, %v587_v3  ;;  %2958 = vlog2.f32 %v206_v54  ;;  %v4284_v53 = vmul.f32 %v1254_v2, %v1254_v2  ;;  %v4288_v8 = vld [vmem:[#allocation7 + $0x70] sm:$0xff] }
 0x118   :  { %v2951_v49 = vpop.eup %2950  ;;  %v1508_v34 = vmul.f32 %v4238_v0, %v844_v33  ;;  %v2107_v1 = vsub.f32 0.0, %v1757_v6  ;;  %v2109_v37 = vsub.f32 0.0, %v1761_v63  ;;  %2960 = vrcp.f32 %v334_v5  ;;  %v4294_v33 = vld [vmem:[#allocation2 + $0x70] sm:$0xff] }
 0x119   :  { %1834 = vadd.xlane.f32.xlu0 %v1634_v42  ;;  %v843_v36 = vmul.f32 %v2949_v58, %v715_v19  ;;  %v1049_v26 = vmul.f32 0.6931472, %v2951_v49  ;;  %v2108_v18 = vsub.f32 0.0, %v1759_v47  ;;  %v208_v0 = vadd.f32 %v4288_v8, %v4120_v57 }
 0x11a   :  { %v2953_v43 = vpop.eup %2952  ;;  %v1636_v45 = vadd.f32 %v1508_v34, %v1047_v44  ;;  %v2425_v59 = vperm.slane %v2107_v1, %v3887_v41  ;;  %v2429_v20 = vperm.slane %v2109_v37, %v3883_v15  ;;  %v1256_v44 = vsub.f32 %v4122_v27, %v4294_v33  ;;  %v1763_v1 = vpop.xlane.xlu0 %1762 }
 0x11b   :  { %v2955_v3 = vpop.eup %2954  ;;  %v1507_v6 = vmul.f32 %v4246_v22, %v843_v36  ;;  %v589_v54 = vmul.f32 %v2953_v43, %v333_v40  ;;  %v2427_v58 = vperm.slane %v2108_v18, %v3851_v46  ;;  %v336_v19 = vadd.f32 1e-10, %v208_v0 }
 0x11c   :  { %v2957_v2 = vpop.eup %2956  ;;  %1838 = vadd.xlane.f32.xlu2 %v1636_v45  ;;  %v591_v47 = vmul.f32 %v2955_v3, %v335_v12  ;;  %v2426_v42 = vsel %vm2335_vm0, %v2425_v59, %v4252_v21  ;;  %2962 = vlog2.f32 %v208_v0  ;;  %v4301_v18 = vmul.f32 %v1256_v44, %v1256_v44  ;;  %v4303_v45 = vld [vmem:[#allocation5] sm:$0xff] }
 0x11d   :  { %v2959_v63 = vpop.eup %2958  ;;  %v1635_v49 = vadd.f32 %v1507_v6, %v1045_v10  ;;  %v717_v34 = vsub.f32 2.0, %v589_v54  ;;  %v1053_v22 = vmul.f32 0.6931472, %v2957_v2  ;;  %v2428_v40 = vsel %vm2339_vm1, %v2427_v58, %v2426_v42  ;;  %v4309_v10 = vld [vmem:[%s4921_s0] sm:$0xff] }
 0x11e   :  { %v719_v37 = vsub.f32 2.0, %v591_v47  ;;  %v1051_v36 = vmul.f32 0.6931472, %v2959_v63  ;;  %2964 = vrcp.f32 %v336_v19  ;;  %v2961_v48 = vpop.eup %2960  ;;  %v111_v21 = vrot.slane %v4303_v45, 5  ;;  %5002 = vst [vmem:[#allocation26_spill] sm:$0xff] %v4309_v10 }
 0x11f   :  { %1836 = vadd.xlane.f32.xlu1 %v1635_v49  ;;  %v845_v12 = vmul.f32 %v2953_v43, %v717_v34  ;;  %v1159_v59 = vrot.slane %v4309_v10, 5  ;;  %v209_v0 = vadd.f32 %v4102_v13, %v4120_v57  ;;  %v590_v54 = vmul.f32 %v2961_v48, %v334_v5  ;;  %v4324_v5 = vld [vmem:[#allocation7] sm:$0xff] }
 0x120   :  { %v847_v6 = vmul.f32 %v2955_v3, %v719_v37  ;;  %v1257_v58 = vsub.f32 %v4122_v27, %v4106_v14  ;;  %v2110_v43 = vsub.f32 0.0, %v1763_v1  ;;  %v4317_v2 = vperm.slane %v111_v21, 0  ;;  %v4328_v27 = vld [vmem:[#allocation2] sm:$0xff]  ;;  %v1765_v3 = vpop.xlane.xlu1 %1764  ;;  %v1767_v21 = vpop.xlane.xlu2 %1766 }
 0x121   :  { %v1509_v44 = vmul.f32 %v4267_v31, %v845_v12  ;;  %v4319_v47 = vperm.slane %v1159_v59, 0  ;;  %v337_v42 = vadd.f32 1e-10, %v209_v0  ;;  %v718_v34 = vsub.f32 2.0, %v590_v54 }
 0x122   :  { %v2963_v63 = vpop.eup %2962  ;;  %v1511_v49 = vmul.f32 %v4279_v11, %v847_v6  ;;  %2966 = vlog2.f32 %v209_v0  ;;  %v4322_v10 = vmul.f32 %v1257_v58, %v1257_v58  ;;  %v210_v14 = vadd.f32 %v4324_v5, %v4317_v2 }
 0x123   :  { %v1637_v13 = vadd.f32 %v1509_v44, %v1049_v26  ;;  %v1055_v57 = vmul.f32 0.6931472, %v2963_v63  ;;  %v1258_v31 = vsub.f32 %v4319_v47, %v4328_v27  ;;  %v846_v11 = vmul.f32 %v2961_v48, %v718_v34  ;;  %v4337_v48 = vld [vmem:[#allocation7 + $0x8] sm:$0xff] }
 0x124   :  { %v2965_v1 = vpop.eup %2964  ;;  %v1639_v37 = vadd.f32 %v1511_v49, %v1053_v22  ;;  %2968 = vrcp.f32 %v337_v42  ;;  %v2430_v12 = vsel %vm2343_vm2, %v2429_v20, %v2428_v40  ;;  %v338_v59 = vadd.f32 1e-10, %v210_v14  ;;  %v4341_v22 = vld [vmem:[#allocation2 + $0x8] sm:$0xff] }
 0x125   :  { %1840 = vadd.xlane.f32.xlu0 %v1637_v13  ;;  %v592_v26 = vmul.f32 %v2965_v1, %v336_v19  ;;  %2970 = vlog2.f32 %v210_v14  ;;  %v4333_v0 = vmul.f32 %v1258_v31, %v1258_v31  ;;  %v1510_v6 = vmul.f32 %v4284_v53, %v846_v11  ;;  %5003 = vst [vmem:[#allocation27_spill] sm:$0xff] %v4341_v22 }
 0x126   :  { %1844 = vadd.xlane.f32.xlu2 %v1639_v37  ;;  %v2431_v54 = vperm.slane %v2110_v43, %v3848_v7  ;;  %v2112_v58 = vsub.f32 0.0, %v1767_v21  ;;  %v2111_v44 = vsub.f32 0.0, %v1765_v3  ;;  %2972 = vrcp.f32 %v338_v59  ;;  %v4351_v21 = vld [vmem:[#allocation7 + $0x18] sm:$0xff] }
 0x127   :  { %v720_v63 = vsub.f32 2.0, %v592_v26  ;;  %v211_v20 = vadd.f32 %v4337_v48, %v4317_v2  ;;  %v1259_v19 = vsub.f32 %v4319_v47, %v4341_v22  ;;  %v1638_v49 = vadd.f32 %v1510_v6, %v1051_v36  ;;  %5004 = vst [vmem:[#allocation28_spill] sm:$0xff] %v4351_v21 }
 0x128   :  { %v2967_v40 = vpop.eup %2966  ;;  %v2432_v53 = vsel %vm2347_vm3, %v2431_v54, %v2430_v12  ;;  %v2435_v43 = vperm.slane %v2112_v58, %v4993_v35  ;;  %v2433_v34 = vperm.slane %v2111_v44, %v3878_v4  ;;  %v213_v36 = vadd.f32 %v4351_v21, %v4317_v2  ;;  %v4355_v12 = vld [vmem:[#allocation2 + $0x18] sm:$0xff]  ;;  %v1769_v44 = vpop.xlane.xlu0 %1768 }
 0x129   :  { %v848_v13 = vmul.f32 %v2965_v1, %v720_v63  ;;  %v1057_v14 = vmul.f32 0.6931472, %v2967_v40  ;;  %v339_v31 = vadd.f32 1e-10, %v211_v20  ;;  %2974 = vlog2.f32 %v211_v20  ;;  %1842 = vadd.xlane.f32.xlu1 %v1638_v49  ;;  %5005 = vst [vmem:[#allocation29_spill] sm:$0xff] %v4355_v12  ;;  %v1771_v21 = vpop.xlane.xlu1 %1770 }
 0x12a   :  { %v2969_v3 = vpop.eup %2968  ;;  %v2434_v37 = vsel %vm2351_vm4, %v2433_v34, %v2432_v53  ;;  %v4349_v11 = vmul.f32 %v1259_v19, %v1259_v19  ;;  %v1261_v26 = vsub.f32 %v4319_v47, %v4355_v12  ;;  %v212_v58 = vadd.f32 %v4143_v50, %v4317_v2 }
 0x12b   :  { %v2971_v1 = vpop.eup %2970  ;;  %v1512_v6 = vmul.f32 %v4301_v18, %v848_v13  ;;  %v593_v54 = vmul.f32 %v2969_v3, %v337_v42  ;;  %2976 = vrcp.f32 %v339_v31  ;;  %v341_v20 = vadd.f32 1e-10, %v213_v36  ;;  %v1773_v13 = vpop.xlane.xlu2 %1772 }
 0x12c   :  { %v1059_v63 = vmul.f32 0.6931472, %v2971_v1  ;;  %2978 = vlog2.f32 %v213_v36  ;;  %v4362_v19 = vmul.f32 %v1261_v26, %v1261_v26  ;;  %v2973_v40 = vpop.eup %2972  ;;  %v340_v34 = vadd.f32 1e-10, %v212_v58 }
 0x12d   :  { %v1640_v49 = vadd.f32 %v1512_v6, %v1055_v57  ;;  %v721_v53 = vsub.f32 2.0, %v593_v54  ;;  %2980 = vlog2.f32 %v212_v58  ;;  %v594_v12 = vmul.f32 %v2973_v40, %v338_v59 }
 0x12e   :  { %2982 = vrcp.f32 %v341_v20  ;;  %v1260_v18 = vsub.f32 %v4319_v47, %v4147_v56  ;;  %v2113_v42 = vsub.f32 0.0, %v1769_v44  ;;  %v2436_v36 = vsel %vm2355_vm5, %v2435_v43, %v2434_v37  ;;  %v5006_v37 = vld [vmem:[#allocation23_spill] sm:$0xff] }
 0x12f   :  { %v2975_v50 = vpop.eup %2974  ;;  %1846 = vadd.xlane.f32.xlu0 %v1640_v49  ;;  %v849_v1 = vmul.f32 %v2969_v3, %v721_v53  ;;  %2984 = vrcp.f32 %v340_v34  ;;  %v2115_v26 = vsub.f32 0.0, %v1773_v13  ;;  %v722_v35 = vsub.f32 2.0, %v594_v12 }
 0x130   :  { %v1061_v57 = vmul.f32 0.6931472, %v2975_v50  ;;  %v1388_v6 = vmul.f32 %v1260_v18, %v1260_v18  ;;  %v2437_v54 = vperm.slane %v2113_v42, %v3907_v23  ;;  %v2114_v44 = vsub.f32 0.0, %v1771_v21  ;;  %v5007_v50 = vld [vmem:[#allocation14_spill] sm:$0xff] }
 0x131   :  { %v2977_v59 = vpop.eup %2976  ;;  %v1513_v58 = vmul.f32 %v4322_v10, %v849_v1  ;;  %v2441_v56 = vperm.slane %v2115_v26, %v3998_v39  ;;  %v214_v22 = vadd.f32 %v4151_v17, %v4317_v2  ;;  %v850_v3 = vmul.f32 %v2973_v40, %v722_v35 }
 0x132   :  { %v2979_v49 = vpop.eup %2978  ;;  %v595_v53 = vmul.f32 %v2977_v59, %v339_v31  ;;  %v2438_v43 = vsel %vm2359_vm6, %v2437_v54, %v2436_v36  ;;  %v1262_v12 = vsub.f32 %v4319_v47, %v5006_v37  ;;  %v2439_v23 = vperm.slane %v2114_v44, %v5007_v50  ;;  %v1775_v44 = vpop.xlane.xlu0 %1774 }
 0x133   :  { %v2981_v18 = vpop.eup %2980  ;;  %v1641_v13 = vadd.f32 %v1513_v58, %v1057_v14  ;;  %v1065_v42 = vmul.f32 0.6931472, %v2979_v49  ;;  %v342_v10 = vadd.f32 1e-10, %v214_v22  ;;  %v1514_v21 = vmul.f32 %v4333_v0, %v850_v3  ;;  %v4382_v0 = vld [vmem:[#allocation2 + $0x30] sm:$0xff] }
 0x134   :  { %v2983_v1 = vpop.eup %2982  ;;  %v723_v26 = vsub.f32 2.0, %v595_v53  ;;  %v1063_v39 = vmul.f32 0.6931472, %v2981_v18  ;;  %2986 = vlog2.f32 %v214_v22  ;;  %v2440_v31 = vsel %vm2363_vm7, %v2439_v23, %v2438_v43  ;;  %5008 = vst [vmem:[#allocation23_spill] sm:$0xff] %v4382_v0  ;;  %v5010_v23 = vld [vmem:[#allocation16_spill] sm:$0xff] }
 0x135   :  { %v2985_v17 = vpop.eup %2984  ;;  %1848 = vadd.xlane.f32.xlu1 %v1641_v13  ;;  %v597_v35 = vmul.f32 %v2983_v1, %v341_v20  ;;  %2988 = vrcp.f32 %v342_v10  ;;  %v4378_v40 = vmul.f32 %v1262_v12, %v1262_v12  ;;  %v1642_v36 = vadd.f32 %v1514_v21, %v1059_v63  ;;  %v5009_v20 = vld [vmem:[#allocation15_spill] sm:$0xff] }
 0x136   :  { %v851_v14 = vmul.f32 %v2977_v59, %v723_v26  ;;  %v596_v54 = vmul.f32 %v2985_v17, %v340_v34  ;;  %v216_v58 = vadd.f32 %v4199_v16, %v4317_v2  ;;  %v1264_v22 = vsub.f32 %v4319_v47, %v4382_v0  ;;  %v1779_v16 = vpop.xlane.xlu2 %1778 }
 0x137   :  { %v725_v49 = vsub.f32 2.0, %v597_v35  ;;  %v215_v3 = vadd.f32 %v5009_v20, %v4317_v2  ;;  %v1263_v53 = vsub.f32 %v4319_v47, %v5010_v23  ;;  %1850 = vadd.xlane.f32.xlu2 %v1642_v36  ;;  %v1777_v35 = vpop.xlane.xlu1 %1776  ;;  %v5012_v23 = vld [vmem:[#allocation24_spill] sm:$0xff]  ;;  %vm2612_vm15 = vcmask 1042434  }
 0x138   :  { %v1515_v63 = vmul.f32 %v4349_v11, %v851_v14  ;;  %v724_v34 = vsub.f32 2.0, %v596_v54  ;;  %v344_v59 = vadd.f32 1e-10, %v216_v58  ;;  %2990 = vlog2.f32 %v216_v58 }
 0x139   :  { %v853_v43 = vmul.f32 %v2983_v1, %v725_v49  ;;  %v4391_v37 = vmul.f32 %v1264_v22, %v1264_v22  ;;  %v343_v12 = vadd.f32 1e-10, %v215_v3  ;;  %2992 = vlog2.f32 %v215_v3  ;;  %v5011_v3 = vld [vmem:[#allocation18_spill] sm:$0xff] }
 0x13a   :  { %v2987_v18 = vpop.eup %2986  ;;  %v1643_v13 = vadd.f32 %v1515_v63, %v1061_v57  ;;  %v852_v21 = vmul.f32 %v2985_v17, %v724_v34  ;;  %2994 = vrcp.f32 %v344_v59  ;;  %v4393_v26 = vmul.f32 %v1263_v53, %v1263_v53 }
 0x13b   :  { %v2989_v20 = vpop.eup %2988  ;;  %v1517_v36 = vmul.f32 %v4362_v19, %v853_v43  ;;  %v1067_v11 = vmul.f32 0.6931472, %v2987_v18  ;;  %2996 = vrcp.f32 %v343_v12  ;;  %v2116_v14 = vsub.f32 0.0, %v1775_v44 }
 0x13c   :  { %1852 = vadd.xlane.f32.xlu0 %v1643_v13  ;;  %v1516_v54 = vmul.f32 %v1388_v6, %v852_v21  ;;  %v598_v1 = vmul.f32 %v2989_v20, %v342_v10  ;;  %v2442_v58 = vsel %vm2367_vm8, %v2441_v56, %v2440_v31  ;;  %v2118_v49 = vsub.f32 0.0, %v1779_v16  ;;  %v1781_v13 = vpop.xlane.xlu0 %1780 }
 0x13d   :  { %v1645_v22 = vadd.f32 %v1517_v36, %v1065_v42  ;;  %v2443_v57 = vperm.slane %v2116_v14, %v5011_v3  ;;  %v2117_v17 = vsub.f32 0.0, %v1777_v35  ;;  %v217_v53 = vadd.f32 %v5012_v23, %v4317_v2  ;;  %v4408_v36 = vld [vmem:[#allocation7 + $0x48] sm:$0xff] }
 0x13e   :  { %v2991_v63 = vpop.eup %2990  ;;  %v1644_v34 = vadd.f32 %v1516_v54, %v1063_v39  ;;  %v726_v0 = vsub.f32 2.0, %v598_v1  ;;  %v2447_v19 = vperm.slane %v2118_v49, %v4034_v55  ;;  %v1265_v44 = vsub.f32 %v4319_v47, %v4195_v52 }
 0x13f   :  { %v2993_v6 = vpop.eup %2992  ;;  %v1071_v10 = vmul.f32 0.6931472, %v2991_v63  ;;  %v2444_v56 = vsel %vm2371_vm9, %v2443_v57, %v2442_v58  ;;  %v2445_v42 = vperm.slane %v2117_v17, %v3983_v62  ;;  %v345_v31 = vadd.f32 1e-10, %v217_v53  ;;  %1856 = vadd.xlane.f32.xlu2 %v1645_v22  ;;  %v4413_v58 = vld [vmem:[#allocation2 + $0x48] sm:$0xff] }
 0x140   :  { %v2995_v16 = vpop.eup %2994  ;;  %1854 = vadd.xlane.f32.xlu1 %v1644_v34  ;;  %v854_v43 = vmul.f32 %v2989_v20, %v726_v0  ;;  %v1069_v18 = vmul.f32 0.6931472, %v2993_v6  ;;  %2998 = vlog2.f32 %v217_v53  ;;  %v4405_v39 = vmul.f32 %v1265_v44, %v1265_v44  ;;  %v1783_v44 = vpop.xlane.xlu1 %1782 }
 0x141   :  { %v2997_v21 = vpop.eup %2996  ;;  %v600_v35 = vmul.f32 %v2995_v16, %v344_v59  ;;  %v2446_v52 = vsel %vm2375_vm10, %v2445_v42, %v2444_v56  ;;  %3000 = vrcp.f32 %v345_v31  ;;  %v219_v14 = vadd.f32 %v4408_v36, %v4317_v2  ;;  %v1785_v59 = vpop.xlane.xlu2 %1784 }
 0x142   :  { %v1518_v54 = vmul.f32 %v4378_v40, %v854_v43  ;;  %v599_v1 = vmul.f32 %v2997_v21, %v343_v12  ;;  %v1267_v0 = vsub.f32 %v4319_v47, %v4413_v58  ;;  %v218_v20 = vadd.f32 %v4215_v28, %v4317_v2 }
 0x143   :  { %v728_v49 = vsub.f32 2.0, %v600_v35  ;;  %v347_v22 = vadd.f32 1e-10, %v219_v14  ;;  %3002 = vlog2.f32 %v219_v14  ;;  %v1266_v57 = vsub.f32 %v4319_v47, %v4219_v61 }
 0x144   :  { %v1646_v17 = vadd.f32 %v1518_v54, %v1067_v11  ;;  %v727_v23 = vsub.f32 2.0, %v599_v1  ;;  %v4421_v53 = vmul.f32 %v1267_v0, %v1267_v0  ;;  %v346_v40 = vadd.f32 1e-10, %v218_v20 }
 0x145   :  { %v856_v12 = vmul.f32 %v2995_v16, %v728_v49  ;;  %3004 = vrcp.f32 %v347_v22  ;;  %v4423_v63 = vmul.f32 %v1266_v57, %v1266_v57  ;;  %v2119_v34 = vsub.f32 0.0, %v1781_v13 }
 0x146   :  { %v2999_v6 = vpop.eup %2998  ;;  %1858 = vadd.xlane.f32.xlu0 %v1646_v17  ;;  %v855_v28 = vmul.f32 %v2997_v21, %v727_v23  ;;  %3006 = vrcp.f32 %v346_v40  ;;  %v2448_v56 = vsel %vm2379_vm11, %v2447_v19, %v2446_v52  ;;  %v2121_v42 = vsub.f32 0.0, %v1785_v59 }
 0x147   :  { %v3001_v43 = vpop.eup %3000  ;;  %v1520_v61 = vmul.f32 %v4391_v37, %v856_v12  ;;  %v1073_v11 = vmul.f32 0.6931472, %v2999_v6  ;;  %3008 = vlog2.f32 %v218_v20  ;;  %v2449_v35 = vperm.slane %v2119_v34, %v4028_v30 }
 0x148   :  { %v1519_v16 = vmul.f32 %v4393_v26, %v855_v28  ;;  %v601_v14 = vmul.f32 %v3001_v43, %v345_v31  ;;  %v2453_v13 = vperm.slane %v2121_v42, %v4068_v51  ;;  %v2120_v54 = vsub.f32 0.0, %v1783_v44  ;;  %v1787_v26 = vpop.xlane.xlu0 %1786 }
 0x149   :  { %v3003_v1 = vpop.eup %3002  ;;  %v1648_v0 = vadd.f32 %v1520_v61, %v1071_v10  ;;  %v2450_v21 = vsel %vm4959_vm12, %v2449_v35, %v2448_v56  ;;  %v220_v19 = vadd.f32 %v4229_v25, %v4317_v2  ;;  %v1268_v37 = vsub.f32 %v4319_v47, %v4234_v29  ;;  %v3225_v10 = vld [vmem:[#allocation7 + $0x60] sm:$0xff]  ;;  %v1791_v6 = vpop.xlane.xlu2 %1790 }
 0x14a   :  { %v1647_v52 = vadd.f32 %v1519_v16, %v1069_v18  ;;  %v729_v20 = vsub.f32 2.0, %v601_v14  ;;  %v1077_v59 = vmul.f32 0.6931472, %v3003_v1  ;;  %v2451_v49 = vperm.slane %v2120_v54, %v4025_v24  ;;  %v3226_v18 = vld [vmem:[#allocation2 + $0x60] sm:$0xff] }
 0x14b   :  { %v3005_v31 = vpop.eup %3004  ;;  %1862 = vadd.xlane.f32.xlu2 %v1648_v0  ;;  %v348_v57 = vadd.f32 1e-10, %v220_v19  ;;  %3010 = vlog2.f32 %v220_v19  ;;  %v4436_v17 = vmul.f32 %v1268_v37, %v1268_v37  ;;  %v222_v23 = vadd.f32 %v3225_v10, %v4317_v2 }
 0x14c   :  { %v3007_v12 = vpop.eup %3006  ;;  %1860 = vadd.xlane.f32.xlu1 %v1647_v52  ;;  %v857_v25 = vmul.f32 %v3001_v43, %v729_v20  ;;  %v603_v34 = vmul.f32 %v3005_v31, %v347_v22  ;;  %v2452_v29 = vsel %vm2387_vm13, %v2451_v49, %v2450_v21  ;;  %v1270_v44 = vsub.f32 %v4319_v47, %v3226_v18  ;;  %v1789_v21 = vpop.xlane.xlu1 %1788 }
 0x14d   :  { %v3009_v28 = vpop.eup %3008  ;;  %v602_v56 = vmul.f32 %v3007_v12, %v346_v40  ;;  %v4442_v42 = vsel %vm2391_vm14, %v2453_v13, %v2452_v29  ;;  %3012 = vrcp.f32 %v348_v57  ;;  %v350_v61 = vadd.f32 1e-10, %v222_v23  ;;  %v3227_v29 = vld [vmem:[#allocation2 + $0x68] sm:$0xff] }
 0x14e   :  { %v1521_v35 = vmul.f32 %v4405_v39, %v857_v25  ;;  %v731_v16 = vsub.f32 2.0, %v603_v34  ;;  %v1075_v14 = vmul.f32 0.6931472, %v3009_v28  ;;  %3014 = vlog2.f32 %v222_v23 }
 0x14f   :  { %v730_v43 = vsub.f32 2.0, %v602_v56  ;;  %3016 = vrcp.f32 %v350_v61  ;;  %v4445_v22 = vmul.f32 %v1270_v44, %v1270_v44  ;;  %v221_v54 = vadd.f32 %v4254_v60, %v4317_v2 }
 0x150   :  { %v1649_v1 = vadd.f32 %v1521_v35, %v1073_v11  ;;  %v859_v0 = vmul.f32 %v3005_v31, %v731_v16  ;;  %v1269_v40 = vsub.f32 %v4319_v47, %v4258_v38  ;;  %v2122_v13 = vsub.f32 0.0, %v1787_v26  ;;  %v1793_v18 = vpop.xlane.xlu0 %1792 }
 0x151   :  { %v3011_v19 = vpop.eup %3010  ;;  %v858_v37 = vmul.f32 %v3007_v12, %v730_v43  ;;  %v349_v39 = vadd.f32 1e-10, %v221_v54  ;;  %3018 = vlog2.f32 %v221_v54  ;;  %v2124_v52 = vsub.f32 0.0, %v1791_v6 }
 0x152   :  { %1864 = vadd.xlane.f32.xlu0 %v1649_v1  ;;  %v1523_v20 = vmul.f32 %v4421_v53, %v859_v0  ;;  %v1079_v49 = vmul.f32 0.6931472, %v3011_v19  ;;  %v4452_v10 = vmul.f32 %v1269_v40, %v1269_v40  ;;  %v2455_v60 = vperm.slane %v2122_v13, %v3840_v32  ;;  %v3229_v19 = vld [vmem:[#allocation2 + $0x78] sm:$0xff] }
 0x153   :  { %v3013_v11 = vpop.eup %3012  ;;  %v1522_v31 = vmul.f32 %v4423_v63, %v858_v37  ;;  %3020 = vrcp.f32 %v349_v39  ;;  %v2458_v38 = vperm.slane %v2124_v52, %v3851_v46  ;;  %v2123_v26 = vsub.f32 0.0, %v1789_v21  ;;  %v3228_v63 = vld [vmem:[#allocation7 + $0x78] sm:$0xff] }
 0x154   :  { %v3015_v23 = vpop.eup %3014  ;;  %v1651_v12 = vadd.f32 %v1523_v20, %v1077_v59  ;;  %v604_v25 = vmul.f32 %v3013_v11, %v348_v57  ;;  %v223_v34 = vadd.f32 %v4263_v9, %v4317_v2  ;;  %v1271_v53 = vsub.f32 %v4319_v47, %v3227_v29  ;;  %v1797_v57 = vpop.xlane.xlu2 %1796 }
 0x155   :  { %v3017_v44 = vpop.eup %3016  ;;  %v1650_v6 = vadd.f32 %v1522_v31, %v1075_v14  ;;  %v1083_v28 = vmul.f32 0.6931472, %v3015_v23  ;;  %v2456_v56 = vperm.slane %v2123_v26, %v3887_v41  ;;  %v225_v35 = vadd.f32 %v3228_v63, %v4317_v2 }
 0x156   :  { %1868 = vadd.xlane.f32.xlu2 %v1651_v12  ;;  %v732_v16 = vsub.f32 2.0, %v604_v25  ;;  %v606_v43 = vmul.f32 %v3017_v44, %v350_v61  ;;  %v351_v59 = vadd.f32 1e-10, %v223_v34  ;;  %3022 = vlog2.f32 %v223_v34  ;;  %v1795_v25 = vpop.xlane.xlu1 %1794 }
 0x157   :  { %v3019_v54 = vpop.eup %3018  ;;  %1866 = vadd.xlane.f32.xlu1 %v1650_v6  ;;  %v2457_v9 = vsel %vm2335_vm0, %v2456_v56, %v2455_v60  ;;  %v4463_v1 = vmul.f32 %v1271_v53, %v1271_v53  ;;  %v353_v0 = vadd.f32 1e-10, %v225_v35  ;;  %3024 = vlog2.f32 %v225_v35 }
 0x158   :  { %v860_v14 = vmul.f32 %v3013_v11, %v732_v16  ;;  %v734_v40 = vsub.f32 2.0, %v606_v43  ;;  %v1081_v13 = vmul.f32 0.6931472, %v3019_v54  ;;  %3026 = vrcp.f32 %v351_v59  ;;  %v1799_v35 = vpop.xlane.xlu0 %1798 }
 0x159   :  { %v3021_v21 = vpop.eup %3020  ;;  %3028 = vrcp.f32 %v353_v0  ;;  %v1273_v61 = vsub.f32 %v4319_v47, %v3229_v19  ;;  %v224_v37 = vadd.f32 %v4288_v8, %v4317_v2  ;;  %v1272_v52 = vsub.f32 %v4319_v47, %v4294_v33 }
 0x15a   :  { %v1524_v20 = vmul.f32 %v4436_v17, %v860_v14  ;;  %v862_v60 = vmul.f32 %v3017_v44, %v734_v40  ;;  %v605_v31 = vmul.f32 %v3021_v21, %v349_v39  ;;  %v2125_v26 = vsub.f32 0.0, %v1793_v18  ;;  %v5013_v14 = vld [vmem:[#allocation26_spill] sm:$0xff] }
 0x15b   :  { %v1401_v11 = vmul.f32 %v1273_v61, %v1273_v61  ;;  %v352_v23 = vadd.f32 1e-10, %v224_v37  ;;  %3030 = vlog2.f32 %v224_v37  ;;  %v4471_v12 = vmul.f32 %v1272_v52, %v1272_v52 }
 0x15c   :  { %v3023_v34 = vpop.eup %3022  ;;  %v1652_v29 = vadd.f32 %v1524_v20, %v1079_v49  ;;  %v1526_v53 = vmul.f32 %v4445_v22, %v862_v60  ;;  %v733_v6 = vsub.f32 2.0, %v605_v31  ;;  %v2459_v8 = vsel %vm2339_vm1, %v2458_v38, %v2457_v9  ;;  %v1803_v40 = vpop.xlane.xlu2 %1802 }
 0x15d   :  { %v3025_v2 = vpop.eup %3024  ;;  %v1085_v33 = vmul.f32 0.6931472, %v3023_v34  ;;  %3032 = vrcp.f32 %v352_v23  ;;  %v2460_v47 = vperm.slane %v2125_v26, %v3883_v15  ;;  %v2127_v17 = vsub.f32 0.0, %v1797_v57 }
 0x15e   :  { %v3027_v39 = vpop.eup %3026  ;;  %1870 = vadd.xlane.f32.xlu0 %v1652_v29  ;;  %v1654_v18 = vadd.f32 %v1526_v53, %v1083_v28  ;;  %v861_v44 = vmul.f32 %v3021_v21, %v733_v6  ;;  %v1089_v56 = vmul.f32 0.6931472, %v3025_v2  ;;  %v2126_v63 = vsub.f32 0.0, %v1795_v25  ;;  %v4489_v25 = vld [vmem:[#allocation7 + $0x10] sm:$0xff] }
 0x15f   :  { %v3029_v16 = vpop.eup %3028  ;;  %v607_v49 = vmul.f32 %v3027_v39, %v351_v59  ;;  %v2461_v22 = vsel %vm2343_vm2, %v2460_v47, %v2459_v8  ;;  %v2464_v43 = vperm.slane %v2127_v17, %v3878_v4  ;;  %v112_v38 = vrot.slane %v4303_v45, 6 }
 0x160   :  { %1874 = vadd.xlane.f32.xlu2 %v1654_v18  ;;  %v1525_v54 = vmul.f32 %v4452_v10, %v861_v44  ;;  %v609_v9 = vmul.f32 %v3029_v16, %v353_v0  ;;  %v2462_v57 = vperm.slane %v2126_v63, %v3848_v7  ;;  %v1160_v28 = vrot.slane %v5013_v14, 6  ;;  %v1801_v63 = vpop.xlane.xlu1 %1800  ;;  %v5016_v14 = vld [vmem:[#allocation28_spill] sm:$0xff] }
 0x161   :  { %v3031_v21 = vpop.eup %3030  ;;  %v735_v19 = vsub.f32 2.0, %v607_v49  ;;  %v4482_v61 = vperm.slane %v112_v38, 0  ;;  %v2128_v59 = vsub.f32 0.0, %v1799_v35  ;;  %v2130_v37 = vsub.f32 0.0, %v1803_v40  ;;  %v5015_v49 = vld [vmem:[#allocation12_spill] sm:$0xff]  ;;  %v5017_v40 = vld [vmem:[#allocation29_spill] sm:$0xff] }
 0x162   :  { %v1653_v52 = vadd.f32 %v1525_v54, %v1081_v13  ;;  %v737_v20 = vsub.f32 2.0, %v609_v9  ;;  %v1087_v60 = vmul.f32 0.6931472, %v3031_v21  ;;  %v2463_v45 = vsel %vm2347_vm3, %v2462_v57, %v2461_v22 }
 0x163   :  { %v3033_v31 = vpop.eup %3032  ;;  %v863_v26 = vmul.f32 %v3027_v39, %v735_v19  ;;  %v226_v10 = vadd.f32 %v4324_v5, %v4482_v61  ;;  %v4487_v0 = vperm.slane %v1160_v28, 0  ;;  %v228_v34 = vadd.f32 %v4489_v25, %v4482_v61 }
 0x164   :  { %1872 = vadd.xlane.f32.xlu1 %v1653_v52  ;;  %v865_v29 = vmul.f32 %v3029_v16, %v737_v20  ;;  %v608_v53 = vmul.f32 %v3033_v31, %v352_v23  ;;  %v227_v13 = vadd.f32 %v4337_v48, %v4482_v61  ;;  %v2465_v6 = vsel %vm2351_vm4, %v2464_v43, %v2463_v45  ;;  %v4501_v23 = vld [vmem:[#allocation2 + $0x10] sm:$0xff]  ;;  %v5018_v20 = vld [vmem:[#allocation13_spill] sm:$0xff] }
 0x165   :  { %v1527_v8 = vmul.f32 %v4463_v1, %v863_v26  ;;  %v354_v2 = vadd.f32 1e-10, %v226_v10  ;;  %3034 = vlog2.f32 %v226_v10  ;;  %v1274_v5 = vsub.f32 %v4487_v0, %v4328_v27  ;;  %v4520_v45 = vld [vmem:[#allocation7 + $0x28] sm:$0xff] }
 0x166   :  { %v1529_v47 = vmul.f32 %v1401_v11, %v865_v29  ;;  %v736_v17 = vsub.f32 2.0, %v608_v53  ;;  %v356_v39 = vadd.f32 1e-10, %v228_v34  ;;  %3036 = vlog2.f32 %v228_v34  ;;  %v5014_v11 = vld [vmem:[#allocation27_spill] sm:$0xff] }
 0x167   :  { %v1655_v18 = vadd.f32 %v1527_v8, %v1085_v33  ;;  %3038 = vrcp.f32 %v354_v2  ;;  %v4499_v44 = vmul.f32 %v1274_v5, %v1274_v5  ;;  %v1276_v48 = vsub.f32 %v4487_v0, %v4501_v23  ;;  %v4527_v5 = vld [vmem:[#allocation2 + $0x28] sm:$0xff] }
 0x168   :  { %v1657_v1 = vadd.f32 %v1529_v47, %v1089_v56  ;;  %v864_v35 = vmul.f32 %v3033_v31, %v736_v17  ;;  %3040 = vrcp.f32 %v356_v39  ;;  %v355_v16 = vadd.f32 1e-10, %v227_v13  ;;  %v4531_v17 = vld [vmem:[#allocation7 + $0x20] sm:$0xff] }
 0x169   :  { %1876 = vadd.xlane.f32.xlu0 %v1655_v18  ;;  %v4505_v27 = vmul.f32 %v1276_v48, %v1276_v48  ;;  %3042 = vlog2.f32 %v227_v13  ;;  %v1275_v33 = vsub.f32 %v4487_v0, %v5014_v11  ;;  %v2466_v22 = vperm.slane %v2128_v59, %v5015_v49  ;;  %v1805_v48 = vpop.xlane.xlu0 %1804 }
 0x16a   :  { %1880 = vadd.xlane.f32.xlu2 %v1657_v1  ;;  %v1528_v43 = vmul.f32 %v4471_v12, %v864_v35  ;;  %3044 = vrcp.f32 %v355_v16  ;;  %v2470_v38 = vperm.slane %v2130_v37, %v5007_v50  ;;  %v2129_v54 = vsub.f32 0.0, %v1801_v63  ;;  %v4535_v35 = vld [vmem:[#allocation2 + $0x20] sm:$0xff] }
 0x16b   :  { %v3035_v56 = vpop.eup %3034  ;;  %v4512_v9 = vmul.f32 %v1275_v33, %v1275_v33  ;;  %v2467_v57 = vsel %vm2355_vm5, %v2466_v22, %v2465_v6  ;;  %v229_v28 = vadd.f32 %v5016_v14, %v4482_v61  ;;  %v1277_v21 = vsub.f32 %v4487_v0, %v5017_v40  ;;  %v1809_v14 = vpop.xlane.xlu2 %1808 }
 0x16c   :  { %v3037_v19 = vpop.eup %3036  ;;  %v1656_v59 = vadd.f32 %v1528_v43, %v1087_v60  ;;  %v1091_v52 = vmul.f32 0.6931472, %v3035_v56  ;;  %v2468_v12 = vperm.slane %v2129_v54, %v5018_v20  ;;  %v231_v37 = vadd.f32 %v4520_v45, %v4482_v61 }
 0x16d   :  { %v3039_v31 = vpop.eup %3038  ;;  %v1095_v26 = vmul.f32 0.6931472, %v3037_v19  ;;  %v357_v10 = vadd.f32 1e-10, %v229_v28  ;;  %3046 = vlog2.f32 %v229_v28  ;;  %v4524_v34 = vmul.f32 %v1277_v21, %v1277_v21  ;;  %v1807_v28 = vpop.xlane.xlu1 %1806 }
 0x16e   :  { %v3041_v29 = vpop.eup %3040  ;;  %1878 = vadd.xlane.f32.xlu1 %v1656_v59  ;;  %v610_v53 = vmul.f32 %v3039_v31, %v354_v2  ;;  %v2469_v13 = vsel %vm2359_vm6, %v2468_v12, %v2467_v57  ;;  %v359_v60 = vadd.f32 1e-10, %v231_v37  ;;  %3048 = vlog2.f32 %v231_v37 }
 0x16f   :  { %v3043_v6 = vpop.eup %3042  ;;  %v612_v8 = vmul.f32 %v3041_v29, %v356_v39  ;;  %3050 = vrcp.f32 %v357_v10  ;;  %v1279_v47 = vsub.f32 %v4487_v0, %v4527_v5  ;;  %v230_v18 = vadd.f32 %v4531_v17, %v4482_v61 }
 0x170   :  { %v3045_v63 = vpop.eup %3044  ;;  %v738_v2 = vsub.f32 2.0, %v610_v53  ;;  %v1093_v1 = vmul.f32 0.6931472, %v3043_v6  ;;  %3052 = vrcp.f32 %v359_v60  ;;  %v1278_v39 = vsub.f32 %v4487_v0, %v4535_v35 }
 0x171   :  { %v740_v11 = vsub.f32 2.0, %v612_v8  ;;  %v611_v33 = vmul.f32 %v3045_v63, %v355_v16  ;;  %v1407_v22 = vmul.f32 %v1279_v47, %v1279_v47  ;;  %v358_v43 = vadd.f32 1e-10, %v230_v18  ;;  %v5019_v16 = vld [vmem:[#allocation19_spill] sm:$0xff] }
 0x172   :  { %v866_v54 = vmul.f32 %v3039_v31, %v738_v2  ;;  %3054 = vlog2.f32 %v230_v18  ;;  %v4539_v56 = vmul.f32 %v1278_v39, %v1278_v39  ;;  %v2131_v57 = vsub.f32 0.0, %v1805_v48 }
 0x173   :  { %v3047_v40 = vpop.eup %3046  ;;  %v868_v21 = vmul.f32 %v3041_v29, %v740_v11  ;;  %v739_v19 = vsub.f32 2.0, %v611_v33  ;;  %3056 = vrcp.f32 %v358_v43  ;;  %v2471_v59 = vsel %vm2363_vm7, %v2470_v38, %v2469_v13 }
 0x174   :  { %v3049_v12 = vpop.eup %3048  ;;  %v1530_v37 = vmul.f32 %v4499_v44, %v866_v54  ;;  %v1097_v53 = vmul.f32 0.6931472, %v3047_v40  ;;  %v2472_v6 = vperm.slane %v2131_v57, %v5019_v16  ;;  %v2133_v8 = vsub.f32 0.0, %v1809_v14 }
 0x175   :  { %v3051_v31 = vpop.eup %3050  ;;  %v1532_v47 = vmul.f32 %v4505_v27, %v868_v21  ;;  %v867_v18 = vmul.f32 %v3045_v63, %v739_v19  ;;  %v1101_v48 = vmul.f32 0.6931472, %v3049_v12  ;;  %v2132_v2 = vsub.f32 0.0, %v1807_v28  ;;  %v4549_v27 = vld [vmem:[#allocation7 + $0x30] sm:$0xff]  ;;  %v4555_v28 = vld [vmem:[#allocation7 + $0x40] sm:$0xff] }
 0x176   :  { %v3053_v39 = vpop.eup %3052  ;;  %v1658_v50 = vadd.f32 %v1530_v37, %v1091_v52  ;;  %v613_v29 = vmul.f32 %v3051_v31, %v357_v10  ;;  %v2473_v11 = vsel %vm2367_vm8, %v2472_v6, %v2471_v59  ;;  %v2476_v38 = vperm.slane %v2133_v8, %v3983_v62  ;;  %v5020_v52 = vld [vmem:[#allocation23_spill] sm:$0xff] }
 0x177   :  { %v1660_v13 = vadd.f32 %v1532_v47, %v1095_v26  ;;  %v1531_v44 = vmul.f32 %v4512_v9, %v867_v18  ;;  %v615_v33 = vmul.f32 %v3053_v39, %v359_v60  ;;  %v2474_v54 = vperm.slane %v2132_v2, %v5011_v3  ;;  %v1811_v47 = vpop.xlane.xlu0 %1810 }
 0x178   :  { %v3055_v57 = vpop.eup %3054  ;;  %1882 = vadd.xlane.f32.xlu0 %v1658_v50  ;;  %v741_v14 = vsub.f32 2.0, %v613_v29  ;;  %v232_v63 = vadd.f32 %v4549_v27, %v4482_v61  ;;  %v1280_v10 = vsub.f32 %v4487_v0, %v5020_v52  ;;  %v234_v26 = vadd.f32 %v4555_v28, %v4482_v61 }
 0x179   :  { %v3057_v9 = vpop.eup %3056  ;;  %1886 = vadd.xlane.f32.xlu2 %v1660_v13  ;;  %v1659_v60 = vadd.f32 %v1531_v44, %v1093_v1  ;;  %v743_v40 = vsub.f32 2.0, %v615_v33  ;;  %v1099_v21 = vmul.f32 0.6931472, %v3055_v57  ;;  %v2475_v50 = vsel %vm2371_vm9, %v2474_v54, %v2473_v11  ;;  %v4563_v1 = vld [vmem:[#allocation2 + $0x40] sm:$0xff]  ;;  %v4571_v13 = vld [vmem:[#allocation2 + $0x38] sm:$0xff]  ;;  %v1813_v44 = vpop.xlane.xlu1 %1812 }
 0x17a   :  { %v869_v19 = vmul.f32 %v3051_v31, %v741_v14  ;;  %v614_v59 = vmul.f32 %v3057_v9, %v358_v43  ;;  %v360_v12 = vadd.f32 1e-10, %v232_v63  ;;  %3058 = vlog2.f32 %v232_v63  ;;  %v1815_v31 = vpop.xlane.xlu2 %1814  ;;  %v4567_v11 = vld [vmem:[#allocation7 + $0x38] sm:$0xff] }
 0x17b   :  { %1884 = vadd.xlane.f32.xlu1 %v1659_v60  ;;  %v871_v37 = vmul.f32 %v3053_v39, %v743_v40  ;;  %v4560_v6 = vmul.f32 %v1280_v10, %v1280_v10  ;;  %v362_v8 = vadd.f32 1e-10, %v234_v26  ;;  %3060 = vlog2.f32 %v234_v26 }
 0x17c   :  { %v1533_v18 = vmul.f32 %v4524_v34, %v869_v19  ;;  %v742_v2 = vsub.f32 2.0, %v614_v59  ;;  %3062 = vrcp.f32 %v360_v12  ;;  %v1282_v29 = vsub.f32 %v4487_v0, %v4563_v1 }
 0x17d   :  { %v1535_v43 = vmul.f32 %v1407_v22, %v871_v37  ;;  %3064 = vrcp.f32 %v362_v8  ;;  %v233_v39 = vadd.f32 %v4567_v11, %v4482_v61  ;;  %v1281_v34 = vsub.f32 %v4487_v0, %v4571_v13 }
 0x17e   :  { %v1661_v33 = vadd.f32 %v1533_v18, %v1097_v53  ;;  %v870_v54 = vmul.f32 %v3057_v9, %v742_v2  ;;  %v4575_v57 = vmul.f32 %v1282_v29, %v1282_v29  ;;  %v2134_v14 = vsub.f32 0.0, %v1811_v47 }
 0x17f   :  { %v1663_v63 = vadd.f32 %v1535_v43, %v1101_v48  ;;  %v361_v52 = vadd.f32 1e-10, %v233_v39  ;;  %3066 = vlog2.f32 %v233_v39  ;;  %v4577_v22 = vmul.f32 %v1281_v34, %v1281_v34  ;;  %v4589_v34 = vld [vmem:[#allocation7 + $0x58] sm:$0xff] }
 0x180   :  { %v3059_v10 = vpop.eup %3058  ;;  %1888 = vadd.xlane.f32.xlu0 %v1661_v33  ;;  %v1534_v26 = vmul.f32 %v4539_v56, %v870_v54  ;;  %v2477_v60 = vsel %vm2375_vm10, %v2476_v38, %v2475_v50  ;;  %v2478_v40 = vperm.slane %v2134_v14, %v4034_v55  ;;  %v2136_v19 = vsub.f32 0.0, %v1815_v31  ;;  %5021 = vst [vmem:[#allocation15_spill] sm:$0xff] %v4589_v34  ;;  %v4598_v14 = vld [vmem:[#allocation7 + $0x50] sm:$0xff] }
 0x181   :  { %v3061_v59 = vpop.eup %3060  ;;  %1892 = vadd.xlane.f32.xlu2 %v1663_v63  ;;  %v1103_v53 = vmul.f32 0.6931472, %v3059_v10  ;;  %3068 = vrcp.f32 %v361_v52  ;;  %v2135_v9 = vsub.f32 0.0, %v1813_v44  ;;  %v235_v48 = vadd.f32 %v4408_v36, %v4482_v61 }
 0x182   :  { %v3063_v37 = vpop.eup %3062  ;;  %v1662_v47 = vadd.f32 %v1534_v26, %v1099_v21  ;;  %v1107_v18 = vmul.f32 0.6931472, %v3061_v59  ;;  %v2479_v2 = vsel %vm2379_vm11, %v2478_v40, %v2477_v60  ;;  %v2482_v56 = vperm.slane %v2136_v19, %v4025_v24  ;;  %v4593_v21 = vld [vmem:[#allocation2 + $0x58] sm:$0xff]  ;;  %v1821_v40 = vpop.xlane.xlu2 %1820 }
 0x183   :  { %v3065_v29 = vpop.eup %3064  ;;  %v616_v38 = vmul.f32 %v3063_v37, %v360_v12  ;;  %v2480_v50 = vperm.slane %v2135_v9, %v4028_v30  ;;  %v363_v31 = vadd.f32 1e-10, %v235_v48  ;;  %3070 = vlog2.f32 %v235_v48  ;;  %5022 = vst [vmem:[#allocation16_spill] sm:$0xff] %v4593_v21  ;;  %v5023_v30 = vld [vmem:[#allocation25_spill] sm:$0xff] }
 0x184   :  { %1890 = vadd.xlane.f32.xlu1 %v1662_v47  ;;  %v618_v43 = vmul.f32 %v3065_v29, %v362_v8  ;;  %v1283_v39 = vsub.f32 %v4487_v0, %v4413_v58  ;;  %v237_v36 = vadd.f32 %v4589_v34, %v4482_v61  ;;  %v1285_v44 = vsub.f32 %v4487_v0, %v4593_v21  ;;  %v1817_v8 = vpop.xlane.xlu0 %1816  ;;  %v1819_v47 = vpop.xlane.xlu1 %1818 }
 0x185   :  { %v3067_v12 = vpop.eup %3066  ;;  %v744_v33 = vsub.f32 2.0, %v616_v38  ;;  %v2481_v54 = vsel %vm4959_vm12, %v2480_v50, %v2479_v2  ;;  %3072 = vrcp.f32 %v363_v31  ;;  %v236_v58 = vadd.f32 %v4598_v14, %v4482_v61  ;;  %v4606_v50 = vld [vmem:[#allocation2 + $0x50] sm:$0xff] }
 0x186   :  { %v746_v63 = vsub.f32 2.0, %v618_v43  ;;  %v1105_v10 = vmul.f32 0.6931472, %v3067_v12  ;;  %v4602_v26 = vmul.f32 %v1283_v39, %v1283_v39  ;;  %v365_v60 = vadd.f32 1e-10, %v237_v36 }
 0x187   :  { %v3069_v19 = vpop.eup %3068  ;;  %v872_v59 = vmul.f32 %v3063_v37, %v744_v33  ;;  %3074 = vlog2.f32 %v237_v36  ;;  %v4604_v9 = vmul.f32 %v1285_v44, %v1285_v44  ;;  %v364_v48 = vadd.f32 1e-10, %v236_v58 }
 0x188   :  { %v874_v2 = vmul.f32 %v3065_v29, %v746_v63  ;;  %v617_v38 = vmul.f32 %v3069_v19, %v361_v52  ;;  %3076 = vrcp.f32 %v365_v60  ;;  %v1284_v43 = vsub.f32 %v4487_v0, %v4606_v50 }
 0x189   :  { %v3071_v12 = vpop.eup %3070  ;;  %v1536_v39 = vmul.f32 %v4560_v6, %v872_v59  ;;  %3078 = vrcp.f32 %v364_v48  ;;  %vm2614_vm12 = vcmask 1043459   ;;  %v2137_v63 = vsub.f32 0.0, %v1817_v8 }
 0x18a   :  { %v1538_v37 = vmul.f32 %v4575_v57, %v874_v2  ;;  %v745_v36 = vsub.f32 2.0, %v617_v38  ;;  %v1109_v44 = vmul.f32 0.6931472, %v3071_v12  ;;  %3080 = vlog2.f32 %v236_v58  ;;  %v3245_v38 = vld [vmem:[#allocation5] sm:$0xff] }
 0x18b   :  { %v3073_v33 = vpop.eup %3072  ;;  %v1664_v29 = vadd.f32 %v1536_v39, %v1103_v53  ;;  %v1412_v52 = vmul.f32 %v1284_v43, %v1284_v43  ;;  %v2483_v24 = vsel %vm2387_vm13, %v2482_v56, %v2481_v54  ;;  %v2613_v6 = vsel %vm2612_vm15, %v4442_v42, %v5023_v30 }
 0x18c   :  { %v1666_v21 = vadd.f32 %v1538_v37, %v1107_v18  ;;  %v873_v34 = vmul.f32 %v3069_v19, %v745_v36  ;;  %v619_v55 = vmul.f32 %v3073_v33, %v363_v31  ;;  %v2484_v62 = vperm.slane %v2137_v63, %v4068_v51  ;;  %v3246_v18 = vld [vmem:[%s4921_s0] sm:$0xff]  ;;  %s3371_s0 = smov [#allocation8]  }
 0x18d   :  { %v3075_v59 = vpop.eup %3074  ;;  %1894 = vadd.xlane.f32.xlu0 %v1664_v29  ;;  %v2139_v57 = vsub.f32 0.0, %v1821_v40  ;;  %v2138_v2 = vsub.f32 0.0, %v1819_v47  ;;  %v113_v58 = vrot.slane %v3245_v38, 7  ;;  %v1161_v31 = vrot.slane %v3246_v18, 7  ;;  %v1823_v47 = vpop.xlane.xlu0 %1822  ;;  %s2631_s17 = sshll.u32 %s3371_s0, 4  ;;  %s2632_s17 = int_to_ptr.vmem [resolvable:$true] %s2631_s17 }
 0x18e   :  { %v3077_v12 = vpop.eup %3076  ;;  %1898 = vadd.xlane.f32.xlu2 %v1666_v21  ;;  %v1537_v53 = vmul.f32 %v4577_v22, %v873_v34  ;;  %v747_v8 = vsub.f32 2.0, %v619_v55  ;;  %v1113_v56 = vmul.f32 0.6931472, %v3075_v59  ;;  %v2485_v54 = vsel %vm2391_vm14, %v2484_v62, %v2483_v24  ;;  %v1827_v34 = vpop.xlane.xlu2 %1826 }
 0x18f   :  { %v3079_v30 = vpop.eup %3078  ;;  %v621_v42 = vmul.f32 %v3077_v12, %v365_v60  ;;  %v2487_v40 = vperm.slane %v2139_v57, %v3887_v41  ;;  %v2486_v19 = vperm.slane %v2138_v2, %v3840_v32  ;;  %v4624_v55 = vsel %vm2614_vm12, %v2485_v54, %v2613_v6  ;;  %v1825_v62 = vpop.xlane.xlu1 %1824  ;;  %v3248_v2 = vld [vmem:[#allocation7 + $0x8] sm:$0xff] }
 0x190   :  { %v3081_v43 = vpop.eup %3080  ;;  %v1665_v21 = vadd.f32 %v1537_v53, %v1105_v10  ;;  %v875_v39 = vmul.f32 %v3073_v33, %v747_v8  ;;  %v620_v22 = vmul.f32 %v3079_v30, %v364_v48  ;;  %v4627_v60 = vperm.slane %v113_v58, 0  ;;  %v3247_v48 = vld [vmem:[#allocation7] sm:$0xff]  ;;  %v3249_v8 = vld [vmem:[#allocation2] sm:$0xff] }
 0x191   :  { %v749_v37 = vsub.f32 2.0, %v621_v42  ;;  %v1111_v36 = vmul.f32 0.6931472, %v3081_v43  ;;  %v2488_v29 = vsel %vm2335_vm0, %v2487_v40, %v2486_v19  ;;  %v4630_v59 = vperm.slane %v1161_v31, 0 }
 0x192   :  { %1896 = vadd.xlane.f32.xlu1 %v1665_v21  ;;  %v1539_v24 = vmul.f32 %v4602_v26, %v875_v39  ;;  %v748_v63 = vsub.f32 2.0, %v620_v22  ;;  %v2140_v10 = vsub.f32 0.0, %v1823_v47  ;;  %v242_v6 = vadd.f32 %v3247_v48, %v4627_v60 }
 0x193   :  { %v877_v33 = vmul.f32 %v3077_v12, %v749_v37  ;;  %v244_v57 = vadd.f32 %v4489_v25, %v4627_v60  ;;  %v243_v38 = vadd.f32 %v3248_v2, %v4627_v60  ;;  %v1290_v18 = vsub.f32 %v4630_v59, %v3249_v8  ;;  %v3252_v37 = vld [vmem:[#allocation2 + $0x18] sm:$0xff] }
 0x194   :  { %v1667_v58 = vadd.f32 %v1539_v24, %v1109_v44  ;;  %v876_v53 = vmul.f32 %v3079_v30, %v748_v63  ;;  %v1292_v26 = vsub.f32 %v4630_v59, %v4501_v23  ;;  %v370_v12 = vadd.f32 1e-10, %v242_v6  ;;  %v3250_v30 = vld [vmem:[#allocation2 + $0x8] sm:$0xff] }
 0x195   :  { %v1541_v31 = vmul.f32 %v4604_v9, %v877_v33  ;;  %3082 = vlog2.f32 %v242_v6  ;;  %v372_v42 = vadd.f32 1e-10, %v244_v57  ;;  %v4640_v40 = vmul.f32 %v1290_v18, %v1290_v18  ;;  %v1829_v24 = vpop.xlane.xlu0 %1828 }
 0x196   :  { %1900 = vadd.xlane.f32.xlu0 %v1667_v58  ;;  %v1540_v54 = vmul.f32 %v1412_v52, %v876_v53  ;;  %3084 = vlog2.f32 %v244_v57  ;;  %v371_v44 = vadd.f32 1e-10, %v243_v38  ;;  %v1291_v19 = vsub.f32 %v4630_v59, %v3250_v30  ;;  %v3251_v52 = vld [vmem:[#allocation7 + $0x18] sm:$0xff]  ;;  %v4651_v63 = vpop.xlane.xlu2 %1832 }
 0x197   :  { %v1669_v25 = vadd.f32 %v1541_v31, %v1113_v56  ;;  %3086 = vrcp.f32 %v370_v12  ;;  %v2489_v23 = vperm.slane %v2140_v10, %v3851_v46  ;;  %v2142_v43 = vsub.f32 0.0, %v1827_v34  ;;  %v1831_v6 = vpop.xlane.xlu1 %1830 }
 0x198   :  { %v1668_v47 = vadd.f32 %v1540_v54, %v1111_v36  ;;  %3088 = vrcp.f32 %v372_v42  ;;  %v4644_v9 = vmul.f32 %v1292_v26, %v1292_v26  ;;  %v2141_v21 = vsub.f32 0.0, %v1825_v62 }
 0x199   :  { %1904 = vadd.xlane.f32.xlu2 %v1669_v25  ;;  %3090 = vrcp.f32 %v371_v44  ;;  %v245_v39 = vadd.f32 %v3251_v52, %v4627_v60  ;;  %v4647_v56 = vmul.f32 %v1291_v19, %v1291_v19  ;;  %v2490_v22 = vsel %vm2339_vm1, %v2489_v23, %v2488_v29 }
 0x19a   :  { %1902 = vadd.xlane.f32.xlu1 %v1668_v47  ;;  %3092 = vlog2.f32 %v243_v38  ;;  %v1293_v36 = vsub.f32 %v4630_v59, %v3252_v37  ;;  %v2493_v10 = vperm.slane %v2142_v43, %v3848_v7  ;;  %v2491_v62 = vperm.slane %v2141_v21, %v3883_v15 }
 0x19b   :  { %v3083_v34 = vpop.eup %3082  ;;  %v373_v33 = vadd.f32 1e-10, %v245_v39  ;;  %v247_v48 = vadd.f32 %v4520_v45, %v4627_v60  ;;  %3094 = vlog2.f32 %v245_v39  ;;  %v246_v38 = vadd.f32 %v4531_v17, %v4627_v60 }
 0x19c   :  { %v3085_v57 = vpop.eup %3084  ;;  %v1123_v2 = vmul.f32 0.6931472, %v3083_v34  ;;  %v4657_v29 = vmul.f32 %v1293_v36, %v1293_v36  ;;  %v2492_v53 = vsel %vm2343_vm2, %v2491_v62, %v2490_v22  ;;  %v1295_v18 = vsub.f32 %v4630_v59, %v4527_v5 }
 0x19d   :  { %v3087_v58 = vpop.eup %3086  ;;  %3096 = vrcp.f32 %v373_v33  ;;  %v375_v8 = vadd.f32 1e-10, %v247_v48  ;;  %v1127_v45 = vmul.f32 0.6931472, %v3085_v57  ;;  %v374_v54 = vadd.f32 1e-10, %v246_v38 }
 0x19e   :  { %v3089_v26 = vpop.eup %3088  ;;  %v626_v31 = vmul.f32 %v3087_v58, %v370_v12  ;;  %3098 = vlog2.f32 %v247_v48  ;;  %v1294_v19 = vsub.f32 %v4630_v59, %v4535_v35  ;;  %v2143_v17 = vsub.f32 0.0, %v1829_v24 }
 0x19f   :  { %v3091_v25 = vpop.eup %3090  ;;  %v628_v30 = vmul.f32 %v3089_v26, %v372_v42  ;;  %3100 = vrcp.f32 %v375_v8  ;;  %v2494_v21 = vsel %vm2347_vm3, %v2493_v10, %v2492_v53  ;;  %v1423_v39 = vmul.f32 %v1295_v18, %v1295_v18  ;;  %v4673_v18 = vpop.xlane.xlu2 %1838 }
 0x1a0   :  { %v3093_v47 = vpop.eup %3092  ;;  %v754_v23 = vsub.f32 2.0, %v626_v31  ;;  %v627_v43 = vmul.f32 %v3091_v25, %v371_v44  ;;  %3102 = vrcp.f32 %v374_v54  ;;  %v1422_v36 = vmul.f32 %v1294_v19, %v1294_v19 }
 0x1a1   :  { %v756_v52 = vsub.f32 2.0, %v628_v30  ;;  %v1125_v5 = vmul.f32 0.6931472, %v3093_v47  ;;  %3104 = vlog2.f32 %v246_v38  ;;  %v3095_v12 = vpop.eup %3094  ;;  %v2495_v42 = vperm.slane %v2143_v17, %v3878_v4 }
 0x1a2   :  { %v882_v22 = vmul.f32 %v3087_v58, %v754_v23  ;;  %v755_v37 = vsub.f32 2.0, %v627_v43  ;;  %v2145_v35 = vsub.f32 0.0, %v4651_v63  ;;  %v2144_v24 = vsub.f32 0.0, %v1831_v6  ;;  %v1835_v58 = vpop.xlane.xlu0 %1834  ;;  %v4677_v6 = vpop.xlane.xlu1 %1836 }
 0x1a3   :  { %v3097_v34 = vpop.eup %3096  ;;  %v884_v62 = vmul.f32 %v3089_v26, %v756_v52  ;;  %v248_v44 = vadd.f32 %v4549_v27, %v4627_v60  ;;  %v2496_v38 = vsel %vm2351_vm4, %v2495_v42, %v2494_v21  ;;  %v1129_v26 = vmul.f32 0.6931472, %v3095_v12 }
 0x1a4   :  { %v3099_v48 = vpop.eup %3098  ;;  %v1546_v10 = vmul.f32 %v4640_v40, %v882_v22  ;;  %v883_v57 = vmul.f32 %v3091_v25, %v755_v37  ;;  %v629_v53 = vmul.f32 %v3097_v34, %v373_v33  ;;  %v2497_v63 = vperm.slane %v2144_v24, %v5015_v49 }
 0x1a5   :  { %v3101_v31 = vpop.eup %3100  ;;  %v1548_v30 = vmul.f32 %v4644_v9, %v884_v62  ;;  %v1133_v19 = vmul.f32 0.6931472, %v3099_v48  ;;  %v376_v52 = vadd.f32 1e-10, %v248_v44  ;;  %v2499_v37 = vperm.slane %v2145_v35, %v5018_v20 }
 0x1a6   :  { %v3103_v27 = vpop.eup %3102  ;;  %v1674_v17 = vadd.f32 %v1546_v10, %v1123_v2  ;;  %v1547_v40 = vmul.f32 %v4647_v56, %v883_v57  ;;  %v757_v25 = vsub.f32 2.0, %v629_v53  ;;  %v631_v33 = vmul.f32 %v3101_v31, %v375_v8  ;;  %v3253_v2 = vld [vmem:[#allocation2 + $0x30] sm:$0xff] }
 0x1a7   :  { %v3105_v47 = vpop.eup %3104  ;;  %v1676_v23 = vadd.f32 %v1548_v30, %v1127_v45  ;;  %v630_v43 = vmul.f32 %v3103_v27, %v374_v54  ;;  %v2498_v21 = vsel %vm2355_vm5, %v2497_v63, %v2496_v38  ;;  %3106 = vrcp.f32 %v376_v52  ;;  %v4693_v63 = vpop.xlane.xlu2 %1844 }
 0x1a8   :  { %1914 = vadd.xlane.f32.xlu0 %v1674_v17  ;;  %v1675_v9 = vadd.f32 %v1547_v40, %v1125_v5  ;;  %v885_v12 = vmul.f32 %v3097_v34, %v757_v25  ;;  %v759_v22 = vsub.f32 2.0, %v631_v33  ;;  %v1296_v56 = vsub.f32 %v4630_v59, %v3253_v2  ;;  %v4707_v2 = vld [vmem:[#allocation7 + $0x60] sm:$0xff] }
 0x1a9   :  { %1918 = vadd.xlane.f32.xlu2 %v1676_v23  ;;  %v758_v42 = vsub.f32 2.0, %v630_v43  ;;  %v250_v8 = vadd.f32 %v4555_v28, %v4627_v60  ;;  %v1131_v62 = vmul.f32 0.6931472, %v3105_v47  ;;  %3108 = vlog2.f32 %v248_v44 }
 0x1aa   :  { %1916 = vadd.xlane.f32.xlu1 %v1675_v9  ;;  %v1549_v45 = vmul.f32 %v4657_v29, %v885_v12  ;;  %v887_v54 = vmul.f32 %v3101_v31, %v759_v22  ;;  %v1298_v35 = vsub.f32 %v4630_v59, %v4563_v1  ;;  %v1424_v10 = vmul.f32 %v1296_v56, %v1296_v56  ;;  %v1841_v30 = vpop.xlane.xlu0 %1840 }
 0x1ab   :  { %v886_v5 = vmul.f32 %v3103_v27, %v758_v42  ;;  %v378_v34 = vadd.f32 1e-10, %v250_v8  ;;  %3110 = vlog2.f32 %v250_v8  ;;  %v249_v57 = vadd.f32 %v4567_v11, %v4627_v60  ;;  %v5024_v27 = vld [vmem:[#allocation14_spill] sm:$0xff] }
 0x1ac   :  { %v1677_v24 = vadd.f32 %v1549_v45, %v1129_v26  ;;  %v1551_v48 = vmul.f32 %v1423_v39, %v887_v54  ;;  %v1297_v28 = vsub.f32 %v4630_v59, %v4571_v13  ;;  %v2146_v29 = vsub.f32 0.0, %v1835_v58 }
 0x1ad   :  { %v1550_v53 = vmul.f32 %v1422_v36, %v886_v5  ;;  %3112 = vrcp.f32 %v378_v34  ;;  %v377_v44 = vadd.f32 1e-10, %v249_v57  ;;  %v2500_v31 = vsel %vm2359_vm6, %v2499_v37, %v2498_v21  ;;  %v3107_v1 = vpop.eup %3106  ;;  %v4697_v36 = vpop.xlane.xlu1 %1842  ;;  %v3255_v21 = vld [vmem:[#allocation2 + $0x48] sm:$0xff] }
 0x1ae   :  { %v1679_v38 = vadd.f32 %v1551_v48, %v1133_v19  ;;  %3114 = vlog2.f32 %v249_v57  ;;  %v1426_v26 = vmul.f32 %v1298_v35, %v1298_v35  ;;  %v2501_v17 = vperm.slane %v2146_v29, %v5024_v27  ;;  %v3254_v19 = vld [vmem:[#allocation7 + $0x48] sm:$0xff] }
 0x1af   :  { %v1678_v39 = vadd.f32 %v1550_v53, %v1131_v62  ;;  %v2148_v11 = vsub.f32 0.0, %v4673_v18  ;;  %v3109_v40 = vpop.eup %3108  ;;  %v632_v13 = vmul.f32 %v3107_v1, %v376_v52  ;;  %3116 = vrcp.f32 %v377_v44 }
 0x1b0   :  { %1920 = vadd.xlane.f32.xlu0 %v1677_v24  ;;  %v2147_v58 = vsub.f32 0.0, %v4677_v6  ;;  %v251_v25 = vadd.f32 %v3254_v19, %v4627_v60  ;;  %v1135_v47 = vmul.f32 0.6931472, %v3109_v40  ;;  %v1425_v23 = vmul.f32 %v1297_v28, %v1297_v28  ;;  %v4712_v24 = vld [vmem:[#allocation2 + $0x60] sm:$0xff] }
 0x1b1   :  { %v3111_v33 = vpop.eup %3110  ;;  %1924 = vadd.xlane.f32.xlu2 %v1679_v38  ;;  %v2502_v43 = vsel %vm2363_vm7, %v2501_v17, %v2500_v31  ;;  %v1299_v18 = vsub.f32 %v4630_v59, %v3255_v21  ;;  %v760_v9 = vsub.f32 2.0, %v632_v13  ;;  %v2505_v12 = vperm.slane %v2148_v11, %v5011_v3  ;;  %v4723_v13 = vpop.xlane.xlu2 %1850 }
 0x1b2   :  { %1922 = vadd.xlane.f32.xlu1 %v1678_v39  ;;  %v2503_v52 = vperm.slane %v2147_v58, %v5019_v16  ;;  %v379_v22 = vadd.f32 1e-10, %v251_v25  ;;  %v1139_v37 = vmul.f32 0.6931472, %v3111_v33  ;;  %3118 = vlog2.f32 %v251_v25  ;;  %v4721_v40 = vpop.xlane.xlu0 %1846 }
 0x1b3   :  { %v3113_v6 = vpop.eup %3112  ;;  %v4705_v42 = vmul.f32 %v1299_v18, %v1299_v18  ;;  %v238_v56 = vadd.f32 %v4707_v2, %v4482_v61  ;;  %v888_v45 = vmul.f32 %v3107_v1, %v760_v9  ;;  %v1286_v48 = vsub.f32 %v4487_v0, %v4712_v24 }
 0x1b4   :  { %v3115_v8 = vpop.eup %3114  ;;  %v634_v54 = vmul.f32 %v3113_v6, %v378_v34  ;;  %v2504_v62 = vsel %vm2367_vm8, %v2503_v52, %v2502_v43  ;;  %3120 = vrcp.f32 %v379_v22  ;;  %v252_v29 = vadd.f32 %v4598_v14, %v4627_v60  ;;  %v5025_v14 = vld [vmem:[#allocation17_spill] sm:$0xff] }
 0x1b5   :  { %v1137_v5 = vmul.f32 0.6931472, %v3115_v8  ;;  %v366_v35 = vadd.f32 1e-10, %v238_v56  ;;  %3122 = vlog2.f32 %v238_v56  ;;  %v3117_v57 = vpop.eup %3116  ;;  %v1552_v53 = vmul.f32 %v1424_v10, %v888_v45  ;;  %v5026_v56 = vld [vmem:[#allocation21_spill] sm:$0xff] }
 0x1b6   :  { %v762_v28 = vsub.f32 2.0, %v634_v54  ;;  %v1300_v34 = vsub.f32 %v4630_v59, %v4606_v50  ;;  %v633_v38 = vmul.f32 %v3117_v57, %v377_v44  ;;  %v2149_v31 = vsub.f32 0.0, %v1841_v30  ;;  %v4727_v44 = vpop.xlane.xlu1 %1848  ;;  %v5028_v54 = vld [vmem:[#allocation15_spill] sm:$0xff] }
 0x1b7   :  { %3124 = vrcp.f32 %v366_v35  ;;  %v2506_v1 = vsel %vm2371_vm9, %v2505_v12, %v2504_v62  ;;  %v1680_v39 = vadd.f32 %v1552_v53, %v1135_v47  ;;  %v380_v11 = vadd.f32 1e-10, %v252_v29 }
 0x1b8   :  { %v890_v17 = vmul.f32 %v3113_v6, %v762_v28  ;;  %3126 = vlog2.f32 %v252_v29  ;;  %v3119_v10 = vpop.eup %3118  ;;  %v761_v58 = vsub.f32 2.0, %v633_v38  ;;  %v1414_v19 = vmul.f32 %v1286_v48, %v1286_v48  ;;  %v5029_v28 = vld [vmem:[#allocation16_spill] sm:$0xff] }
 0x1b9   :  { %v2507_v25 = vperm.slane %v2149_v31, %v5025_v14  ;;  %v2151_v50 = vsub.f32 0.0, %v4693_v63  ;;  %1926 = vadd.xlane.f32.xlu0 %v1680_v39  ;;  %3128 = vrcp.f32 %v380_v11  ;;  %v4729_v47 = vmul.f32 %v1300_v34, %v1300_v34  ;;  %v5027_v63 = vld [vmem:[#allocation22_spill] sm:$0xff]  ;;  %v4739_v29 = vld [vmem:[#allocation7 + $0x68] sm:$0xff] }
 0x1ba   :  { %v3121_v30 = vpop.eup %3120  ;;  %v1554_v33 = vmul.f32 %v1426_v26, %v890_v17  ;;  %v2150_v43 = vsub.f32 0.0, %v4697_v36  ;;  %v889_v18 = vmul.f32 %v3117_v57, %v761_v58  ;;  %v1141_v12 = vmul.f32 0.6931472, %v3119_v10 }
 0x1bb   :  { %v3123_v21 = vpop.eup %3122  ;;  %v635_v9 = vmul.f32 %v3121_v30, %v379_v22  ;;  %v2508_v52 = vsel %vm2375_vm10, %v2507_v25, %v2506_v1  ;;  %v2511_v8 = vperm.slane %v2151_v50, %v5026_v56  ;;  %v253_v62 = vadd.f32 %v5028_v54, %v4627_v60  ;;  %v4744_v25 = vld [vmem:[#allocation2 + $0x68] sm:$0xff] }
 0x1bc   :  { %v1682_v6 = vadd.f32 %v1554_v33, %v1139_v37  ;;  %v2509_v45 = vperm.slane %v2150_v43, %v5027_v63  ;;  %v1553_v48 = vmul.f32 %v1425_v23, %v889_v18  ;;  %v1301_v36 = vsub.f32 %v4630_v59, %v5029_v28  ;;  %v4753_v18 = vpop.xlane.xlu0 %1852 }
 0x1bd   :  { %v3125_v26 = vpop.eup %3124  ;;  %v763_v53 = vsub.f32 2.0, %v635_v9  ;;  %v239_v22 = vadd.f32 %v4739_v29, %v4482_v61  ;;  %v381_v38 = vadd.f32 1e-10, %v253_v62  ;;  %3130 = vlog2.f32 %v253_v62  ;;  %v4755_v9 = vpop.xlane.xlu2 %1856 }
 0x1be   :  { %v3127_v57 = vpop.eup %3126  ;;  %1930 = vadd.xlane.f32.xlu2 %v1682_v6  ;;  %v622_v37 = vmul.f32 %v3125_v26, %v366_v35  ;;  %v2510_v34 = vsel %vm2379_vm11, %v2509_v45, %v2508_v52  ;;  %v1681_v31 = vadd.f32 %v1553_v48, %v1137_v5  ;;  %v1115_v39 = vmul.f32 0.6931472, %v3123_v21 }
 0x1bf   :  { %v891_v1 = vmul.f32 %v3121_v30, %v763_v53  ;;  %v1143_v23 = vmul.f32 0.6931472, %v3127_v57  ;;  %v3129_v17 = vpop.eup %3128  ;;  %3132 = vrcp.f32 %v381_v38  ;;  %v367_v58 = vadd.f32 1e-10, %v239_v22 }
 0x1c0   :  { %v750_v10 = vsub.f32 2.0, %v622_v37  ;;  %v1287_v50 = vsub.f32 %v4487_v0, %v4744_v25  ;;  %1928 = vadd.xlane.f32.xlu1 %v1681_v31  ;;  %v636_v33 = vmul.f32 %v3129_v17, %v380_v11  ;;  %3134 = vlog2.f32 %v239_v22  ;;  %v5031_v22 = vld [vmem:[#allocation20_spill] sm:$0xff] }
 0x1c1   :  { %v1555_v35 = vmul.f32 %v4705_v42, %v891_v1  ;;  %v254_v5 = vadd.f32 %v4707_v2, %v4627_v60  ;;  %v1429_v43 = vmul.f32 %v1301_v36, %v1301_v36  ;;  %3136 = vrcp.f32 %v367_v58  ;;  %v4757_v42 = vpop.xlane.xlu1 %1854 }
 0x1c2   :  { %v878_v30 = vmul.f32 %v3125_v26, %v750_v10  ;;  %v1302_v21 = vsub.f32 %v4630_v59, %v4712_v24  ;;  %v764_v6 = vsub.f32 2.0, %v636_v33  ;;  %v1415_v62 = vmul.f32 %v1287_v50, %v1287_v50 }
 0x1c3   :  { %v1683_v52 = vadd.f32 %v1555_v35, %v1141_v12  ;;  %v382_v45 = vadd.f32 1e-10, %v254_v5  ;;  %3138 = vlog2.f32 %v254_v5  ;;  %v3131_v11 = vpop.eup %3130  ;;  %v2152_v2 = vsub.f32 0.0, %v4721_v40 }
 0x1c4   :  { %v1542_v54 = vmul.f32 %v1414_v19, %v878_v30  ;;  %vm5030_vm12 = vcmask 917312   ;;  %v892_v48 = vmul.f32 %v3129_v17, %v764_v6  ;;  %v4761_v24 = vmul.f32 %v1302_v21, %v1302_v21  ;;  %v3261_v30 = vld [vmem:[#allocation2 + $0x70] sm:$0xff] }
 0x1c5   :  { %v2512_v26 = vsel %vm5030_vm12, %v2511_v8, %v2510_v34  ;;  %1932 = vadd.xlane.f32.xlu0 %v1683_v52  ;;  %3140 = vrcp.f32 %v382_v45  ;;  %v2154_v53 = vsub.f32 0.0, %v4723_v13  ;;  %v3133_v12 = vpop.eup %3132  ;;  %v1145_v36 = vmul.f32 0.6931472, %v3131_v11  ;;  %v4767_v8 = vld [vmem:[#allocation7 + $0x70] sm:$0xff]  ;;  %v4776_v52 = vpop.xlane.xlu0 %1858 }
 0x1c6   :  { %v1670_v28 = vadd.f32 %v1542_v54, %v1115_v39  ;;  %v2513_v57 = vperm.slane %v2152_v2, %v5031_v22  ;;  %v2153_v37 = vsub.f32 0.0, %v4727_v44  ;;  %v3135_v19 = vpop.eup %3134  ;;  %v1556_v31 = vmul.f32 %v4729_v47, %v892_v48  ;;  %v4778_v6 = vpop.xlane.xlu2 %1862 }
 0x1c7   :  { %v637_v40 = vmul.f32 %v3133_v12, %v381_v38  ;;  %vm2616_vm15 = vcmask 1044484   ;;  %v240_v34 = vadd.f32 %v4767_v8, %v4482_v61  ;;  %v3137_v1 = vpop.eup %3136  ;;  %v1117_v13 = vmul.f32 0.6931472, %v3135_v19  ;;  %v3263_v19 = vld [vmem:[#allocation2 + $0x78] sm:$0xff] }
 0x1c8   :  { %1906 = vadd.xlane.f32.xlu2 %v1670_v28  ;;  %v2514_v39 = vsel %vm2387_vm13, %v2513_v57, %v2512_v26  ;;  %v2517_v17 = vperm.slane %v2154_v53, %v3840_v32  ;;  %v2515_v10 = vperm.slane %v2153_v37, %v4068_v51  ;;  %v1684_v50 = vadd.f32 %v1556_v31, %v1143_v23  ;;  %v3262_v28 = vld [vmem:[#allocation7 + $0x78] sm:$0xff] }
 0x1c9   :  { %v3139_v44 = vpop.eup %3138  ;;  %v765_v35 = vsub.f32 2.0, %v637_v40  ;;  %v623_v47 = vmul.f32 %v3137_v1, %v367_v58  ;;  %v368_v38 = vadd.f32 1e-10, %v240_v34  ;;  %3142 = vlog2.f32 %v240_v34  ;;  %v4784_v58 = vpop.xlane.xlu1 %1860 }
 0x1ca   :  { %v1147_v33 = vmul.f32 0.6931472, %v3139_v44  ;;  %v2516_v5 = vsel %vm2391_vm14, %v2515_v10, %v2514_v39  ;;  %v1288_v21 = vsub.f32 %v4487_v0, %v3261_v30  ;;  %1934 = vadd.xlane.f32.xlu1 %v1684_v50  ;;  %v255_v48 = vadd.f32 %v4739_v29, %v4627_v60 }
 0x1cb   :  { %v3141_v11 = vpop.eup %3140  ;;  %v893_v54 = vmul.f32 %v3133_v12, %v765_v35  ;;  %v751_v2 = vsub.f32 2.0, %v623_v47  ;;  %v4782_v23 = vsel %vm2616_vm15, %v2516_v5, %v4624_v55  ;;  %3144 = vrcp.f32 %v368_v38 }
 0x1cc   :  { %v638_v26 = vmul.f32 %v3141_v11, %v382_v45  ;;  %v1303_v53 = vsub.f32 %v4630_v59, %v4744_v25  ;;  %v241_v57 = vadd.f32 %v3262_v28, %v4482_v61  ;;  %v1289_v31 = vsub.f32 %v4487_v0, %v3263_v19 }
 0x1cd   :  { %v1557_v37 = vmul.f32 %v1429_v43, %v893_v54  ;;  %v879_v12 = vmul.f32 %v3137_v1, %v751_v2  ;;  %v2155_v55 = vsub.f32 0.0, %v4753_v18  ;;  %v1416_v34 = vmul.f32 %v1288_v21, %v1288_v21  ;;  %v1865_v5 = vpop.xlane.xlu0 %1864 }
 0x1ce   :  { %v766_v40 = vsub.f32 2.0, %v638_v26  ;;  %v383_v39 = vadd.f32 1e-10, %v255_v48  ;;  %3146 = vlog2.f32 %v255_v48  ;;  %v369_v29 = vadd.f32 1e-10, %v241_v57  ;;  %v1869_v21 = vpop.xlane.xlu2 %1868 }
 0x1cf   :  { %v1685_v45 = vadd.f32 %v1557_v37, %v1145_v36  ;;  %v1543_v10 = vmul.f32 %v1415_v62, %v879_v12  ;;  %3148 = vlog2.f32 %v241_v57  ;;  %v3143_v44 = vpop.eup %3142  ;;  %v4793_v50 = vmul.f32 %v1303_v53, %v1303_v53 }
 0x1d0   :  { %v894_v25 = vmul.f32 %v3141_v11, %v766_v40  ;;  %3150 = vrcp.f32 %v383_v39  ;;  %v2518_v61 = vperm.slane %v2155_v55, %v3887_v41  ;;  %v4796_v18 = vmul.f32 %v1289_v31, %v1289_v31 }
 0x1d1   :  { %v3145_v43 = vpop.eup %3144  ;;  %1936 = vadd.xlane.f32.xlu0 %v1685_v45  ;;  %v1671_v0 = vadd.f32 %v1543_v10, %v1117_v13  ;;  %3152 = vrcp.f32 %v369_v29  ;;  %v2157_v1 = vsub.f32 0.0, %v4755_v9  ;;  %v2156_v47 = vsub.f32 0.0, %v4757_v42  ;;  %v1867_v26 = vpop.xlane.xlu1 %1866 }
 0x1d2   :  { %v1558_v36 = vmul.f32 %v4761_v24, %v894_v25  ;;  %v624_v62 = vmul.f32 %v3145_v43, %v368_v38  ;;  %v2519_v35 = vsel %vm2335_vm0, %v2518_v61, %v2517_v17  ;;  %v1119_v11 = vmul.f32 0.6931472, %v3143_v44 }
 0x1d3   :  { %1908 = vadd.xlane.f32.xlu1 %v1671_v0  ;;  %v256_v54 = vadd.f32 %v4767_v8, %v4627_v60  ;;  %v1304_v13 = vsub.f32 %v4630_v59, %v3261_v30  ;;  %v257_v2 = vadd.f32 %v3262_v28, %v4627_v60  ;;  %v2522_v38 = vperm.slane %v2157_v1, %v3883_v15 }
 0x1d4   :  { %v3147_v9 = vpop.eup %3146  ;;  %v1686_v48 = vadd.f32 %v1558_v36, %v1147_v33  ;;  %v752_v24 = vsub.f32 2.0, %v624_v62  ;;  %v2520_v17 = vperm.slane %v2156_v47, %v3851_v46  ;;  %v1305_v37 = vsub.f32 %v4630_v59, %v3263_v19 }
 0x1d5   :  { %v3149_v42 = vpop.eup %3148  ;;  %v1149_v53 = vmul.f32 0.6931472, %v3147_v9  ;;  %v384_v57 = vadd.f32 1e-10, %v256_v54  ;;  %3154 = vlog2.f32 %v256_v54  ;;  %v4810_v60 = vmul.f32 %v1304_v13, %v1304_v13  ;;  %v1871_v1 = vpop.xlane.xlu0 %1870 }
 0x1d6   :  { %v3151_v12 = vpop.eup %3150  ;;  %1938 = vadd.xlane.f32.xlu2 %v1686_v48  ;;  %v880_v8 = vmul.f32 %v3145_v43, %v752_v24  ;;  %v2521_v30 = vsel %vm2339_vm1, %v2520_v17, %v2519_v35  ;;  %v385_v28 = vadd.f32 1e-10, %v257_v2  ;;  %v1121_v55 = vmul.f32 0.6931472, %v3149_v42  ;;  %v1875_v36 = vpop.xlane.xlu2 %1874 }
 0x1d7   :  { %v3153_v33 = vpop.eup %3152  ;;  %v639_v31 = vmul.f32 %v3151_v12, %v383_v39  ;;  %3156 = vrcp.f32 %v384_v57  ;;  %v2158_v40 = vsub.f32 0.0, %v4776_v52  ;;  %v2523_v44 = vsel %vm2343_vm2, %v2522_v38, %v2521_v30 }
 0x1d8   :  { %v1544_v45 = vmul.f32 %v1416_v34, %v880_v8  ;;  %v625_v10 = vmul.f32 %v3153_v33, %v369_v29  ;;  %3158 = vrcp.f32 %v385_v28  ;;  %v2160_v25 = vsub.f32 0.0, %v4778_v6 }
 0x1d9   :  { %v767_v59 = vsub.f32 2.0, %v639_v31  ;;  %3160 = vlog2.f32 %v257_v2  ;;  %v2524_v19 = vperm.slane %v2158_v40, %v3848_v7  ;;  %v2159_v0 = vsub.f32 0.0, %v4784_v58  ;;  %v1873_v47 = vpop.xlane.xlu1 %1872 }
 0x1da   :  { %v1672_v61 = vadd.f32 %v1544_v45, %v1119_v11  ;;  %v753_v43 = vsub.f32 2.0, %v625_v10  ;;  %v2161_v39 = vsub.f32 0.0, %v1865_v5  ;;  %v2528_v29 = vperm.slane %v2160_v25, %v5015_v49 }
 0x1db   :  { %v3155_v62 = vpop.eup %3154  ;;  %v895_v52 = vmul.f32 %v3151_v12, %v767_v59  ;;  %v2525_v34 = vsel %vm2347_vm3, %v2524_v19, %v2523_v44  ;;  %v2163_v35 = vsub.f32 0.0, %v1869_v21  ;;  %v1433_v13 = vmul.f32 %v1305_v37, %v1305_v37 }
 0x1dc   :  { %1910 = vadd.xlane.f32.xlu0 %v1672_v61  ;;  %v881_v54 = vmul.f32 %v3153_v33, %v753_v43  ;;  %v2526_v6 = vperm.slane %v2159_v0, %v3878_v4  ;;  %v2530_v11 = vperm.slane %v2161_v39, %v5018_v20  ;;  %v2162_v9 = vsub.f32 0.0, %v1867_v26 }
 0x1dd   :  { %v3157_v2 = vpop.eup %3156  ;;  %v1559_v58 = vmul.f32 %v4793_v50, %v895_v52  ;;  %v2534_v5 = vperm.slane %v2163_v35, %v5019_v16  ;;  %v2164_v48 = vsub.f32 0.0, %v1871_v1  ;;  %v2166_v42 = vsub.f32 0.0, %v1875_v36  ;;  %v1877_v19 = vpop.xlane.xlu0 %1876 }
 0x1de   :  { %v3159_v24 = vpop.eup %3158  ;;  %v1545_v38 = vmul.f32 %v4796_v18, %v881_v54  ;;  %v640_v17 = vmul.f32 %v3157_v2, %v384_v57  ;;  %v2527_v21 = vsel %vm2351_vm4, %v2526_v6, %v2525_v34  ;;  %v2532_v33 = vperm.slane %v2162_v9, %v5024_v27 }
 0x1df   :  { %v3161_v12 = vpop.eup %3160  ;;  %v1687_v37 = vadd.f32 %v1559_v58, %v1149_v53  ;;  %v641_v8 = vmul.f32 %v3159_v24, %v385_v28  ;;  %v2529_v30 = vsel %vm2355_vm5, %v2528_v29, %v2527_v21  ;;  %v1151_v40 = vmul.f32 0.6931472, %v3155_v62 }
 0x1e0   :  { %v1673_v31 = vadd.f32 %v1545_v38, %v1121_v55  ;;  %v768_v50 = vsub.f32 2.0, %v640_v17  ;;  %v2531_v26 = vsel %vm2359_vm6, %v2530_v11, %v2529_v30  ;;  %v1153_v10 = vmul.f32 0.6931472, %v3161_v12  ;;  %v1881_v55 = vpop.xlane.xlu2 %1880 }
 0x1e1   :  { %1940 = vadd.xlane.f32.xlu1 %v1687_v37  ;;  %v769_v45 = vsub.f32 2.0, %v641_v8  ;;  %v2533_v18 = vsel %vm2363_vm7, %v2532_v33, %v2531_v26  ;;  %v2536_v57 = vperm.slane %v2164_v48, %v5011_v3  ;;  %v2540_v28 = vperm.slane %v2166_v42, %v5027_v63  ;;  %v1879_v39 = vpop.xlane.xlu1 %1878 }
 0x1e2   :  { %1912 = vadd.xlane.f32.xlu2 %v1673_v31  ;;  %v896_v44 = vmul.f32 %v3157_v2, %v768_v50  ;;  %v2535_v53 = vsel %vm2367_vm8, %v2534_v5, %v2533_v18  ;;  %v2165_v59 = vsub.f32 0.0, %v1873_v47  ;;  %v2167_v43 = vsub.f32 0.0, %v1877_v19 }
 0x1e3   :  { %v897_v25 = vmul.f32 %v3159_v24, %v769_v45  ;;  %v2537_v61 = vsel %vm2371_vm9, %v2536_v57, %v2535_v53  ;;  %v2169_v0 = vsub.f32 0.0, %v1881_v55  ;;  %v2168_v62 = vsub.f32 0.0, %v1879_v39 }
 0x1e4   :  { %v1560_v1 = vmul.f32 %v4810_v60, %v896_v44  ;;  %v2538_v36 = vperm.slane %v2165_v59, %v5025_v14  ;;  %v2542_v34 = vperm.slane %v2167_v43, %v5026_v56  ;;  %vm2618_vm15 = vcmask 1045509  }
 0x1e5   :  { %v1561_v52 = vmul.f32 %v1433_v13, %v897_v25  ;;  %v2546_v47 = vperm.slane %v2169_v0, %v4068_v51  ;;  %v2544_v54 = vperm.slane %v2168_v62, %v5031_v22 }
 0x1e6   :  { %v1688_v29 = vadd.f32 %v1560_v1, %v1151_v40  ;;  %v2539_v35 = vsel %vm2375_vm10, %v2538_v36, %v2537_v61 }
 0x1e7   :  { %v1689_v6 = vadd.f32 %v1561_v52, %v1153_v10  ;;  %v2541_v11 = vsel %vm2379_vm11, %v2540_v28, %v2539_v35 }
 0x1e8   :  { %1942 = vadd.xlane.f32.xlu0 %v1688_v29  ;;  %v2543_v2 = vsel %vm5030_vm12, %v2542_v34, %v2541_v11 }
 0x1e9   :  { %1944 = vadd.xlane.f32.xlu1 %v1689_v6  ;;  %v2545_v60 = vsel %vm2387_vm13, %v2544_v54, %v2543_v2 }
 0x1ea   :  { %v2547_v13 = vsel %vm2391_vm14, %v2546_v47, %v2545_v60 }
 0x1eb   :  { %v1883_v58 = vpop.xlane.xlu0 %1882  ;;  %v4844_v9 = vsel %vm2618_vm15, %v2547_v13, %v4782_v23 }
 0x1ec   :  { %v2170_v5 = vsub.f32 0.0, %v1883_v58  ;;  %v1887_v42 = vpop.xlane.xlu2 %1886 }
 0x1ed   :  { %v2172_v59 = vsub.f32 0.0, %v1887_v42 }
 0x1ee   :  { %v1885_v48 = vpop.xlane.xlu1 %1884  ;;  %v2548_v24 = vperm.slane %v2170_v5, %v3840_v32 }
 0x1ef   :  { %v2171_v38 = vsub.f32 0.0, %v1885_v48  ;;  %v2551_v25 = vperm.slane %v2172_v59, %v3851_v46 }
 0x1f1   :  { %v2549_v17 = vperm.slane %v2171_v38, %v3887_v41 }
 0x1f3   :  { %v2550_v21 = vsel %vm2335_vm0, %v2549_v17, %v2548_v24  ;;  %v1889_v12 = vpop.xlane.xlu0 %1888 }
 0x1f4   :  { %v1893_v8 = vpop.xlane.xlu2 %1892  ;;  %v2173_v55 = vsub.f32 0.0, %v1889_v12  ;;  %v2552_v62 = vsel %vm2339_vm1, %v2551_v25, %v2550_v21 }
 0x1f5   :  { %v2175_v36 = vsub.f32 0.0, %v1893_v8 }
 0x1f6   :  { %v2553_v0 = vperm.slane %v2173_v55, %v3883_v15 }
 0x1f7   :  { %v1891_v37 = vpop.xlane.xlu1 %1890  ;;  %v2557_v60 = vperm.slane %v2175_v36, %v3878_v4 }
 0x1f8   :  { %v2174_v61 = vsub.f32 0.0, %v1891_v37  ;;  %v2554_v35 = vsel %vm2343_vm2, %v2553_v0, %v2552_v62 }
 0x1fa   :  { %v2555_v52 = vperm.slane %v2174_v61, %v3848_v7 }
 0x1fc   :  { %v2556_v58 = vsel %vm2347_vm3, %v2555_v52, %v2554_v35 }
 0x200   :  { %v1895_v30 = vpop.xlane.xlu0 %1894 }
 0x201   :  { %v1899_v31 = vpop.xlane.xlu2 %1898  ;;  %v2176_v34 = vsub.f32 0.0, %v1895_v30 }
 0x203   :  { %v2559_v5 = vperm.slane %v2176_v34, %v5015_v49 }
 0x205   :  { %v1897_v33 = vpop.xlane.xlu1 %1896 }
 0x206   :  { %v2177_v13 = vsub.f32 0.0, %v1897_v33 }
 0x208   :  { %v2561_v42 = vperm.slane %v2177_v13, %v5018_v20 }
 0x209   :  { %v1901_v50 = vpop.xlane.xlu0 %1900 }
 0x20a   :  { %v2179_v12 = vsub.f32 0.0, %v1901_v50 }
 0x20c   :  { %v4849_v26 = vpop.xlane.xlu2 %1904 }
 0x20d   :  { %v1903_v40 = vpop.xlane.xlu1 %1902 }
 0x21b   :  { %v1915_v23 = vpop.xlane.xlu0 %1914 }
 0x21c   :  { %v1919_v10 = vpop.xlane.xlu2 %1918  ;;  %v2186_v39 = vsub.f32 0.0, %v1915_v23 }
 0x21d   :  { %v1917_v45 = vpop.xlane.xlu1 %1916  ;;  %v2188_v29 = vsub.f32 0.0, %v1919_v10  ;;  %v2565_v10 = vperm.slane %v2179_v12, %v5019_v16 }
 0x21e   :  { %v2187_v1 = vsub.f32 0.0, %v1917_v45  ;;  %v2579_v47 = vperm.slane %v2186_v39, %v3840_v32  ;;  %v2178_v32 = vsub.f32 0.0, %v1899_v31 }
 0x21f   :  { %v2582_v48 = vperm.slane %v2188_v29, %v3851_v46 }
 0x220   :  { %v2580_v54 = vperm.slane %v2187_v1, %v3887_v41  ;;  %v2558_v41 = vsel %vm2351_vm4, %v2557_v60, %v2556_v58  ;;  %v2563_v45 = vperm.slane %v2178_v32, %v5024_v27 }
 0x221   :  { %v2560_v8 = vsel %vm2355_vm5, %v2559_v5, %v2558_v41 }
 0x222   :  { %v2581_v38 = vsel %vm2335_vm0, %v2580_v54, %v2579_v47  ;;  %v2562_v31 = vsel %vm2359_vm6, %v2561_v42, %v2560_v8  ;;  %vm5032_vm0 = vmmov %vm5030_vm12 }
 0x223   :  { %v1921_v18 = vpop.xlane.xlu0 %1920  ;;  %v2583_v30 = vsel %vm2339_vm1, %v2582_v48, %v2581_v38  ;;  %vm2620_vm1 = vcmask 1046534  }
 0x224   :  { %v1925_v44 = vpop.xlane.xlu2 %1924  ;;  %v2189_v6 = vsub.f32 0.0, %v1921_v18 }
 0x225   :  { %v1923_v57 = vpop.xlane.xlu1 %1922  ;;  %v2191_v37 = vsub.f32 0.0, %v1925_v44 }
 0x226   :  { %v2190_v24 = vsub.f32 0.0, %v1923_v57  ;;  %v2584_v17 = vperm.slane %v2189_v6, %v3883_v15  ;;  %v2180_v15 = vsub.f32 0.0, %v1903_v40 }
 0x227   :  { %v2588_v18 = vperm.slane %v2191_v37, %v3878_v4 }
 0x228   :  { %v2586_v33 = vperm.slane %v2190_v24, %v3848_v7  ;;  %v2585_v23 = vsel %vm2343_vm2, %v2584_v17, %v2583_v30  ;;  %v2181_v7 = vsub.f32 0.0, %v4849_v26  ;;  %v2567_v25 = vperm.slane %v2180_v15, %v5011_v3  ;;  %vm5033_vm2 = vmmov %vm5032_vm0 }
 0x22a   :  { %v2587_v44 = vsel %vm2347_vm3, %v2586_v33, %v2585_v23  ;;  %v2569_v26 = vperm.slane %v2181_v7, %v5025_v14  ;;  %vm2622_vm3 = vcmask 1047559  }
 0x22b   :  { %v2589_v4 = vsel %vm2351_vm4, %v2588_v18, %v2587_v44 }
 0x22c   :  { %v1927_v53 = vpop.xlane.xlu0 %1926 }
 0x22d   :  { %v2192_v46 = vsub.f32 0.0, %v1927_v53  ;;  %v2564_v53 = vsel %vm2363_vm7, %v2563_v45, %v2562_v31 }
 0x22e   :  { %v2566_v0 = vsel %vm2367_vm8, %v2565_v10, %v2564_v53 }
 0x22f   :  { %v2590_v59 = vperm.slane %v2192_v46, %v5015_v49  ;;  %v2568_v52 = vsel %vm2371_vm9, %v2567_v25, %v2566_v0 }
 0x230   :  { %v2570_v6 = vsel %vm2375_vm10, %v2569_v26, %v2568_v52 }
 0x231   :  { %v4851_v19 = vpop.xlane.xlu2 %1930  ;;  %v2591_v1 = vsel %vm2355_vm5, %v2590_v59, %v2589_v4 }
 0x232   :  { %v2194_v40 = vsub.f32 0.0, %v4851_v19 }
 0x233   :  { %v1929_v28 = vpop.xlane.xlu1 %1928 }
 0x234   :  { %v2193_v50 = vsub.f32 0.0, %v1929_v28  ;;  %v2594_v19 = vperm.slane %v2194_v40, %v5024_v27 }
 0x236   :  { %v2592_v28 = vperm.slane %v2193_v50, %v5018_v20 }
 0x238   :  { %v4854_v43 = vpop.xlane.xlu0 %1932  ;;  %v2593_v29 = vsel %vm2359_vm6, %v2592_v28, %v2591_v1 }
 0x239   :  { %v2195_v49 = vsub.f32 0.0, %v4854_v43  ;;  %v2595_v60 = vsel %vm2363_vm7, %v2594_v19, %v2593_v29 }
 0x23b   :  { %v1907_v2 = vpop.xlane.xlu2 %1906  ;;  %v2596_v47 = vperm.slane %v2195_v49, %v5019_v16 }
 0x23c   :  { %v2182_v61 = vsub.f32 0.0, %v1907_v2 }
 0x23d   :  { %v1935_v11 = vpop.xlane.xlu1 %1934  ;;  %v2597_v24 = vsel %vm2367_vm8, %v2596_v47, %v2595_v60 }
 0x23e   :  { %v2571_v34 = vperm.slane %v2182_v61, %v5027_v63  ;;  %v2196_v35 = vsub.f32 0.0, %v1935_v11 }
 0x240   :  { %v2572_v13 = vsel %vm2379_vm11, %v2571_v34, %v2570_v6  ;;  %v2598_v58 = vperm.slane %v2196_v35, %v5011_v3 }
 0x244   :  { %v1937_v21 = vpop.xlane.xlu0 %1936 }
 0x245   :  { %v2197_v54 = vsub.f32 0.0, %v1937_v21  ;;  %v2599_v21 = vsel %vm2371_vm9, %v2598_v58, %v2597_v24 }
 0x246   :  { %v1909_v57 = vpop.xlane.xlu1 %1908 }
 0x247   :  { %v2183_v39 = vsub.f32 0.0, %v1909_v57  ;;  %v2600_v16 = vperm.slane %v2197_v54, %v5025_v14 }
 0x249   :  { %v1939_v55 = vpop.xlane.xlu2 %1938  ;;  %v2573_v20 = vperm.slane %v2183_v39, %v5026_v56  ;;  %v2601_v42 = vsel %vm2375_vm10, %v2600_v16, %v2599_v21 }
 0x24a   :  { %v2198_v11 = vsub.f32 0.0, %v1939_v55 }
 0x24b   :  { %v2574_v5 = vsel %vm5032_vm0, %v2573_v20, %v2572_v13 }
 0x24c   :  { %v2602_v41 = vperm.slane %v2198_v11, %v5027_v63 }
 0x24e   :  { %v2603_v46 = vsel %vm2379_vm11, %v2602_v41, %v2601_v42 }
 0x24f   :  { %v1911_v36 = vpop.xlane.xlu0 %1910 }
 0x250   :  { %v2184_v62 = vsub.f32 0.0, %v1911_v36 }
 0x252   :  { %v2575_v43 = vperm.slane %v2184_v62, %v5031_v22 }
 0x254   :  { %v1941_v2 = vpop.xlane.xlu1 %1940  ;;  %v2576_v38 = vsel %vm2387_vm13, %v2575_v43, %v2574_v5 }
 0x255   :  { %v1913_v27 = vpop.xlane.xlu2 %1912  ;;  %v2199_v17 = vsub.f32 0.0, %v1941_v2 }
 0x256   :  { %v2185_v48 = vsub.f32 0.0, %v1913_v27 }
 0x257   :  { %v2604_v12 = vperm.slane %v2199_v17, %v5026_v56 }
 0x258   :  { %v2577_v32 = vperm.slane %v2185_v48, %v4068_v51 }
 0x259   :  { %v2605_v63 = vsel %vm5033_vm2, %v2604_v12, %v2603_v46 }
 0x25a   :  { %v2578_v3 = vsel %vm2391_vm14, %v2577_v32, %v2576_v38 }
 0x25b   :  { %v1943_v37 = vpop.xlane.xlu0 %1942  ;;  %v2621_v8 = vsel %vm2620_vm1, %v2578_v3, %v4844_v9 }
 0x25c   :  { %v2200_v14 = vsub.f32 0.0, %v1943_v37  ;;  %v1945_v30 = vpop.xlane.xlu1 %1944 }
 0x25d   :  { %v2201_v33 = vsub.f32 0.0, %v1945_v30 }
 0x25e   :  { %v2606_v23 = vperm.slane %v2200_v14, %v5031_v22 }
 0x25f   :  { %v2608_v56 = vperm.slane %v2201_v33, %v4068_v51 }
 0x260   :  { %v2607_v9 = vsel %vm2387_vm13, %v2606_v23, %v2605_v63 }
 0x261   :  { %v2609_v45 = vsel %vm2391_vm14, %v2608_v56, %v2607_v9 }
 0x262   :  { %v2623_v15 = vsel %vm2622_vm3, %v2609_v45, %v2621_v8 }
 0x263   :  { %2625 = vst [vmem:[#allocation8] sm:$0xff] %v2623_v15 }
 0x264   :  { %2636 = dma.vmem_to_hbm [thread:$0]  %s2632_s17, 128, %s2634_s20, [#allocation4]  }
 0x265   :  { %3364 = dma.done.wait [#allocation4], 128  }
 0x266   :  { %3365 = vsyncadd [#allocation4], 4294967168 }
 0x267   :  { %2641 = vsyncpa [#allocation3], 1 }
 0x268   :  { %2642 = vsyncpa [#allocation6], 1 }
 0x269   :  { %2643 = vsyncpa [#allocation4], 1 }

</bundles_post_ra>
